<compile_context>
chip_gen: v7x
topology: tpu7x:2x2x1
jax: 0.10.0
libtpu: 0.0.40
codegen_flags: <defaults>
</compile_context>

<pallas_src>
import jax
import jax.numpy as jnp
from jax.experimental import pallas as pl
from jax.experimental.pallas import tpu as pltpu


def _cdiv(a, b):
    return -(-a // b)


def _round_up(n, m):
    return _cdiv(n, m) * m


def position_encoding_kernel(x_ref, wt_ref, b_ref, ow_ref, o_ref):
    # MXU matmul in the native x / weight dtype, f32 accumulation.
    h = jnp.dot(x_ref[...], wt_ref[...], preferred_element_type=jnp.float32)
    # f32 epilogue: bias add + sine + per-feature scale.  With large batch
    # tiles this all hides under the output-store DMA.
    o_ref[...] = (jnp.sin(h + b_ref[...]) * ow_ref[...]).astype(o_ref.dtype)


def make_position_encoding(W, output_weight=None, *, param_dtype=jnp.float32,
                           out_dtype=None, max_tile_b=1024):
    """Builds the forward for the frozen PositionEncoding layer.

    W: (F, D_in) Fourier transform matrix.
    output_weight: optional (F,) per-feature output scale.
    Returns encode(x) with x: (B, D_in) -> y: (B, 2F) = [sin(Wx), cos(Wx)] * ow.
    """
    W = jnp.asarray(W)
    F, D_in = W.shape
    f2 = 2 * F
    # Lane-dense output width: pad 2F up to a multiple of 128 so output stores
    # are unmasked vst.
    f2p = _round_up(max(f2, 128), 128)

    # ---- fused, transposed, lane-padded parameters (built ONCE; frozen) ----
    wt = jnp.zeros((D_in, f2p), param_dtype)
    wt = wt.at[:, :F].set(W.T.astype(param_dtype))
    wt = wt.at[:, F:f2].set(W.T.astype(param_dtype))
    # Bias / scale stay f32: tiny (1, f2p) arrays feeding the f32 epilogue.
    bias = jnp.zeros((1, f2p), jnp.float32).at[0, F:f2].set(jnp.pi / 2)
    if output_weight is None:
        ow = jnp.ones((1, f2p), jnp.float32)
    else:
        owv = jnp.asarray(output_weight, jnp.float32)
        ow = jnp.zeros((1, f2p), jnp.float32)
        ow = ow.at[0, :F].set(owv).at[0, F:f2].set(owv)

    def encode(x, dx_dh=None, d2x_dh2=None):
        # TODO(synk): derivative-propagation (dx_dh / d2x_dh2) path not
        #             implemented; x-only forward.
        assert dx_dh is None and d2x_dh2 is None
        B, d = x.shape
        assert d == D_in
        odt = out_dtype if out_dtype is not None else x.dtype

        # ---- batch tiling ----
        # >= 2 grid steps keeps both v7x TensorCores busy; tiles grow towards
        # max_tile_b rows for large B (measured mem-bound tiling: 256 rows ->
        # ~63% of HBM roofline, 512 -> ~85%, 1024 -> ~86%).  Deriving the tile
        # from B keeps padding waste to at most a few rows per tile.
        target_nb = max(2, _cdiv(B, max_tile_b))
        tile_b = max(8, _round_up(_cdiv(B, target_nb), 8))
        bp = _round_up(B, tile_b)
        xk = jnp.pad(x, ((0, bp - B), (0, 0))) if bp != B else x
        nb = bp // tile_b

        out = pl.pallas_call(
            position_encoding_kernel,
            out_shape=jax.ShapeDtypeStruct((bp, f2p), odt),
            grid=(nb,),
            in_specs=[
                pl.BlockSpec((tile_b, D_in), lambda i: (i, 0)),  # x tile (pipelined)
                pl.BlockSpec((D_in, f2p), lambda i: (0, 0)),     # fused weight (resident)
                pl.BlockSpec((1, f2p), lambda i: (0, 0)),        # bias (resident)
                pl.BlockSpec((1, f2p), lambda i: (0, 0)),        # output scale (resident)
            ],
            out_specs=pl.BlockSpec((tile_b, f2p), lambda i: (i, 0)),
            compiler_params=pltpu.CompilerParams(
                dimension_semantics=("parallel",)),
        )(xk, wt, bias, ow)

        # Slice only if padding actually happened; otherwise return the kernel
        # output directly (no extra full pass over a store-bound output).
        if bp != B or f2p != f2:
            out = out[:B, :f2]
        return out

    return encode


def reference(x, W, output_weight=None):
    F = W.shape[0]
    weight = jnp.concatenate([W, W], axis=0)                       # (2F, D_in)
    bias = jnp.concatenate(
        [jnp.zeros((F,), jnp.float32), jnp.full((F,), jnp.pi / 2, jnp.float32)])
    y = jnp.sin(x @ weight.T + bias)
    if output_weight is not None:
        y = y * jnp.concatenate([output_weight, output_weight])
    return y


if __name__ == "__main__":
    # 3-D coordinates, 64 Fourier frequencies -> 2F = 128 output features
    # (exactly one lane width, so no feature padding / no wrapper slice);
    # batch 512 -> two 256-row tiles, one per v7x TensorCore.
    B, D_in, F = 512, 3, 64

    key = jax.random.PRNGKey(0)
    kx, kw, ko = jax.random.split(key, 3)
    x = jax.random.normal(kx, (B, D_in), jnp.float32)
    W = jax.random.normal(kw, (F, D_in), jnp.float32)
    output_weight = jax.random.uniform(ko, (F,), jnp.float32, 0.5, 1.5)

    # Frozen layer: fused / padded parameters are built once here.
    encode = jax.jit(make_position_encoding(W, output_weight))
    out = jax.block_until_ready(encode(x))

    ref = reference(x, W, output_weight)
    assert out.shape == (B, 2 * F)
    assert jnp.allclose(out, ref, atol=1e-4, rtol=1e-4), "mismatch vs reference"

    print("KERNEL_OK")
</pallas_src>

<mosaic_0001>
module attributes {stable_mosaic.version = 11 : i64} {
  func.func @position_encoding_kernel(%arg0: i32, %arg1: memref<256x3xf32, #tpu.memory_space<vmem>>, %arg2: memref<3x128xf32, #tpu.memory_space<vmem>>, %arg3: memref<1x128xf32, #tpu.memory_space<vmem>>, %arg4: memref<1x128xf32, #tpu.memory_space<vmem>>, %arg5: memref<256x128xf32, #tpu.memory_space<vmem>>) attributes {dimension_semantics = [#tpu.dimension_semantics<parallel>], iteration_bounds = array<i64: 2>, scalar_prefetch = 0 : i64, scratch_operands = 0 : i64, tpu.core_type = #tpu.core_type<tc>, window_params = [{transform_indices = @transform_0, window_bounds = array<i64: 256, 3>}, {pipeline_mode = #tpu.pipeline_mode<synchronous>, transform_indices = @transform_1, window_bounds = array<i64: 3, 128>}, {pipeline_mode = #tpu.pipeline_mode<synchronous>, transform_indices = @transform_2, window_bounds = array<i64: 1, 128>}, {pipeline_mode = #tpu.pipeline_mode<synchronous>, transform_indices = @transform_3, window_bounds = array<i64: 1, 128>}, {transform_indices = @transform_4, window_bounds = array<i64: 256, 128>}]} {
    %c0 = arith.constant 0 : index
    %c0_0 = arith.constant 0 : index
    %0 = vector.load %arg1[%c0, %c0_0] : memref<256x3xf32, #tpu.memory_space<vmem>>, vector<256x3xf32>
    %c0_1 = arith.constant 0 : index
    %c0_2 = arith.constant 0 : index
    %1 = vector.load %arg2[%c0_1, %c0_2] : memref<3x128xf32, #tpu.memory_space<vmem>>, vector<3x128xf32>
    %cst = arith.constant dense<0.000000e+00> : vector<256x128xf32>
    %2 = tpu.matmul %0, %1, %cst {dimension_numbers = #tpu.dot_dimension_numbers<[1], [0], [0], [1], [0, 0, 1, 1], [], []>} : vector<256x3xf32>, vector<3x128xf32>, vector<256x128xf32> -> vector<256x128xf32>
    %c0_3 = arith.constant 0 : index
    %c0_4 = arith.constant 0 : index
    %3 = vector.load %arg3[%c0_3, %c0_4] : memref<1x128xf32, #tpu.memory_space<vmem>>, vector<1x128xf32>
    %4 = vector.broadcast %3 : vector<1x128xf32> to vector<256x128xf32>
    %5 = arith.addf %2, %4 : vector<256x128xf32>
    %6 = math.sin %5 : vector<256x128xf32>
    %c0_5 = arith.constant 0 : index
    %c0_6 = arith.constant 0 : index
    %7 = vector.load %arg4[%c0_5, %c0_6] : memref<1x128xf32, #tpu.memory_space<vmem>>, vector<1x128xf32>
    %8 = vector.broadcast %7 : vector<1x128xf32> to vector<256x128xf32>
    %9 = arith.mulf %6, %8 : vector<256x128xf32>
    %c0_7 = arith.constant 0 : index
    %c0_8 = arith.constant 0 : index
    %10 = vector.load %arg5[%c0_7, %c0_8] : memref<256x128xf32, #tpu.memory_space<vmem>>, vector<256x128xf32>
    tpu.vector_store %arg5[%c0_7, %c0_8], %9 {strides = array<i32>} : memref<256x128xf32, #tpu.memory_space<vmem>>, vector<256x128xf32>,
    return
  }
  func.func @transform_0(%arg0: i32) -> (i32, i32) {
    %c0_i32 = arith.constant 0 : i32
    %c0_i32_0 = arith.constant 0 : i32
    return %arg0, %c0_i32 : i32, i32
  }
  func.func @transform_1(%arg0: i32) -> (i32, i32) {
    %c0_i32 = arith.constant 0 : i32
    %c0_i32_0 = arith.constant 0 : i32
    %c0_i32_1 = arith.constant 0 : i32
    return %c0_i32, %c0_i32_0 : i32, i32
  }
  func.func @transform_2(%arg0: i32) -> (i32, i32) {
    %c0_i32 = arith.constant 0 : i32
    %c0_i32_0 = arith.constant 0 : i32
    %c0_i32_1 = arith.constant 0 : i32
    return %c0_i32, %c0_i32_0 : i32, i32
  }
  func.func @transform_3(%arg0: i32) -> (i32, i32) {
    %c0_i32 = arith.constant 0 : i32
    %c0_i32_0 = arith.constant 0 : i32
    %c0_i32_1 = arith.constant 0 : i32
    return %c0_i32, %c0_i32_0 : i32, i32
  }
  func.func @transform_4(%arg0: i32) -> (i32, i32) {
    %c0_i32 = arith.constant 0 : i32
    %c0_i32_0 = arith.constant 0 : i32
    return %arg0, %c0_i32 : i32, i32
  }
}

</mosaic_0001>

<bundles_post_ra>
// kernel: encode.1
= control target key start
LH: loop header
LB: loop body
LE: loop exit
PB: predicated region body
PF: predicated region fallthrough
CT: control target
= control target key end

     0   :  { %9 = vsyncpa [#allocation3], 0  ;;  %s7608_s0 = inlined_call_operand.vmem [shape: f32[512,3], index: 0, kind: input, shape index: {}]   ;;  %s7609_s1 = inlined_call_operand.vmem [shape: f32[3,128], index: 1, kind: input, shape index: {}]   ;;  %s7610_s2 = inlined_call_operand.vmem [shape: f32[1,128], index: 2, kind: input, shape index: {}]   ;;  %s7611_s3 = inlined_call_operand.vmem [shape: f32[1,128], index: 3, kind: input, shape index: {}]   ;;  %s7612_s4 = inlined_call_operand.hbm [shape: f32[512,128], index: 4, kind: output, shape index: {}]  }
   0x1   :  { %11 = vsyncpa [#allocation3 + $0x1], 0  ;;  %s4712_s15 = smov 0   ;;  %s4714_s16 = smov 0  }
   0x2   :  { %s4716_s17 = smov 0   ;;  %s4718_s18 = smov 0  }
   0x3 LB: > { %s4733_s19 = sadd.s32 4294967295, %s4676_s18   ;;  %s4040_s20 = sadd.s32 4294967294, %s4676_s18   ;;  %s4676_s18 = sphi %s4718_s18, %s7678_s18   ;;  %s4672_s17 = sphi %s4716_s17, %s7677_s17   ;;  %s4668_s16 = sphi %s4714_s16, %s7676_s16   ;;  %s4664_s15 = sphi %s4712_s15, %s7675_s15  }
   0x4   : > { %s4737_s21 = sadd.s32 1, %s4676_s18   ;;  %s113_s22 = sadd.s32 1, %s4672_s17 }
   0x5   : > { %s110_s23 = ssub.s32 %s4676_s18, %s4737_s21  ;;  %p123_p0 = scmp.ne.s32.totalorder %s4672_s17, %s4668_s16 }
   0x6   : > { %p111_p1 = scmp.eq.s32.totalorder %s110_s23, 0  ;;  %p124_p2 = scmp.eq.s32.totalorder %s4733_s19, 1 }
   0x7   : > { %p129_p3 = scmp.ne.s32.totalorder %s4668_s16, %s4664_s15  ;;  %p130_p4 = scmp.eq.s32.totalorder %s4040_s20, 1 }
   0x8   : > { %s4748_s24 = scalar_select %p111_p1, %s4672_s17, %s113_s22  }
   0x9   : > { %p4750_p5 = por %p124_p2, %p123_p0  ;;  %p4754_p6 = por %p130_p4, %p129_p3 }
   0xa   : > { %p4043_p7 = scmp.ge.s32.totalorder %s4676_s18, 1  ;;  %p166_p8 = scmp.lt.s32.totalorder %s4676_s18, 3 }
   0xc   : > { %p167_p9 = pnand %p4043_p7, %p166_p8 }
   0xd   : > { %v231_v0 = vld [vmem:[%s7609_s1] sm:$0x7] (!%p167_p9)  ;;  %vm336_vm0 = vcmask (!%p167_p9), 1042432   ;;  %s4045_s29 = sshll.u32 (!%p167_p9), %s4733_s19, 5  ;;  %vm239_vm1 = vcmask (!%p167_p9), 23552   ;;  %s189_s10 = sand.u32 (!%p167_p9), 1, %s4668_s16  }
   0xe   : > { %170 = sbr.rel (%p167_p9) target bundleno = 1091 (0x443), region = 36  ;;  %4249 = vmatprep.subr.msk.mxu0 (!%p167_p9), %vm336_vm0, %v231_v0  ;;  %4299 = vmatprep.subr.msk.mxu1 (!%p167_p9), %vm336_vm0, %v231_v0  ;;  %p193_p10 = scmp.lt.s32.totalorder (!%p167_p9), %s4045_s29, 63  ;;  %v4836_v33 = vld [vmem:[%s7610_s2] ss:$0 sm:$0xff] (!%p167_p9) }
   0xf   : > { %4250 = vmatpush3.msk.msra.mxu0 (!%p167_p9), %vm336_vm0, %v231_v0  ;;  %4300 = vmatpush3.msk.msra.mxu1 (!%p167_p9), %vm336_vm0, %v231_v0  ;;  %s4044_s11 = sshll.u32 (!%p167_p9), %s189_s10, 8  ;;  %s4684_s9 = smov (!%p167_p9), [#allocation2]  }
  0x10   : > { %s5175_s14 = scalar_lea.vmem (!%p167_p9), [#allocation2], %s4044_s11  ;;  %s4618_s11 = sshll.u32 (!%p167_p9), %s4684_s9, 4  ;;  %s4619_s11 = int_to_ptr.vmem [resolvable:$false] %s4618_s11 }
  0x11   : > { %s4620_s12 = scalar_lea.vmem (!%p167_p9), %s4619_s11, 8192 }
  0x15   : > { %s7680_s29 = smov (!%p193_p10, %s4045_s29), 63 }
  0x16   : > { %s4046_s30 = sshll.u32 %s7680_s29, 3  ;;  %s4215_s29 = sshll.u32 %s4733_s19, 12 }
  0x17   : > { %s4767_s7 = scalar_lea.vmem %s7608_s0, %s4046_s30  ;;  %s3978_s30 = sshll.u32 %s5175_s14, 4  ;;  %s7561_s30 = int_to_ptr.vmem [resolvable:$true] %s3978_s30 }
  0x18   : > { %v199_v1 = vld [vmem:[%s4767_s7] sm:$0xff]  ;;  %v200_v3 = vld [vmem:[%s4767_s7 + $0x8] sm:$0xff]  ;;  %v201_v5 = vld [vmem:[%s4767_s7 + $0x10] sm:$0xff]  ;;  %s7567_s19 = scalar_lea.sflag [#allocation3], %s189_s10  ;;  %s4614_s8 = scalar_lea.vmem %s7561_s30, 4096 }
  0x19   : > { %v215_v2 = vld [vmem:[%s4767_s7 + $0x80] sm:$0xff]  ;;  %4251 = vmatprep.mubr.msk.f32.mxu0 %vm239_vm1, %v199_v1  ;;  %v216_v4 = vld [vmem:[%s4767_s7 + $0x88] sm:$0xff]  ;;  %v217_v6 = vld [vmem:[%s4767_s7 + $0x90] sm:$0xff]  ;;  %p4615_p11 = scmp.ne.s32.totalorder %s7561_s30, %s4614_s8  ;;  %p4621_p0 = scmp.lt.s32.totalorder %s7561_s30, %s4619_s11 }
  0x1a   : > { %4275 = vmatprep.mubr.msk.f32.mxu1 %vm239_vm1, %v215_v2  ;;  %4252 = vmatmul.mubr.msk.f32.vlgmr.msra.gmra.mrb[0].mxu0 %vm239_vm1, %v200_v3  ;;  %v202_v7 = vld [vmem:[%s4767_s7 + $0x18] sm:$0xff]  ;;  %v203_v9 = vld [vmem:[%s4767_s7 + $0x20] sm:$0xff]  ;;  %v204_v11 = vld [vmem:[%s4767_s7 + $0x28] sm:$0xff]  ;;  %p4622_p1 = scmp.lt.s32.totalorder %s4620_s12, %s4614_s8 }
  0x1b   : > { %4276 = vmatmul.mubr.msk.f32.vlgmr.msra.gmra.mrb[0].mxu1 %vm239_vm1, %v216_v4  ;;  %4254 = vmatprep.mubr.msk.f32.mxu0 %vm239_vm1, %v201_v5  ;;  %v218_v8 = vld [vmem:[%s4767_s7 + $0x98] sm:$0xff]  ;;  %v219_v10 = vld [vmem:[%s4767_s7 + $0xa0] sm:$0xff]  ;;  %v220_v12 = vld [vmem:[%s4767_s7 + $0xa8] sm:$0xff]  ;;  %p4616_p12 = pnand %p4615_p11, %p4750_p5 }
  0x1c   : > { %4278 = vmatprep.mubr.msk.f32.mxu1 %vm239_vm1, %v217_v6  ;;  %v205_v13 = vld [vmem:[%s4767_s7 + $0x30] sm:$0xff]  ;;  %v206_v15 = vld [vmem:[%s4767_s7 + $0x38] sm:$0xff]  ;;  %v207_v17 = vld [vmem:[%s4767_s7 + $0x40] sm:$0xff]  ;;  %p4623_p2 = por %p4622_p1, %p4621_p0 }
  0x1d   : > { %v221_v14 = vld [vmem:[%s4767_s7 + $0xb0] sm:$0xff]  ;;  %v222_v16 = vld [vmem:[%s4767_s7 + $0xb8] sm:$0xff]  ;;  %v223_v18 = vld [vmem:[%s4767_s7 + $0xc0] sm:$0xff]  ;;  %p4617_p13 = pneg %p4616_p12 }
  0x1e   : > { %4255 = vmatmul.mubr.msk.f32.gmra.mrb[2].mxu0 %vm239_vm1, %v202_v7  ;;  %v208_v19 = vld [vmem:[%s4767_s7 + $0x48] sm:$0xff]  ;;  %v209_v21 = vld [vmem:[%s4767_s7 + $0x50] sm:$0xff]  ;;  %v210_v23 = vld [vmem:[%s4767_s7 + $0x58] sm:$0xff] }
  0x1f   : > { %4279 = vmatmul.mubr.msk.f32.gmra.mrb[2].mxu1 %vm239_vm1, %v218_v8  ;;  %4257 = vmatprep.mubr.msk.f32.mxu0 %vm239_vm1, %v203_v9  ;;  %v224_v20 = vld [vmem:[%s4767_s7 + $0xc8] sm:$0xff]  ;;  %v225_v22 = vld [vmem:[%s4767_s7 + $0xd0] sm:$0xff]  ;;  %v226_v24 = vld [vmem:[%s4767_s7 + $0xd8] sm:$0xff]  ;;  %p4624_p3 = pnand %p4623_p2, %p4617_p13 }
  0x20   : > { %4281 = vmatprep.mubr.msk.f32.mxu1 %vm239_vm1, %v219_v10  ;;  %v211_v25 = vld [vmem:[%s4767_s7 + $0x60] sm:$0xff]  ;;  %v212_v27 = vld [vmem:[%s4767_s7 + $0x68] sm:$0xff]  ;;  %v213_v29 = vld [vmem:[%s4767_s7 + $0x70] sm:$0xff]  ;;  %v4678_v10 = vmov 683565275  }
  0x21   : > { %v227_v26 = vld [vmem:[%s4767_s7 + $0xe0] sm:$0xff]  ;;  %v228_v28 = vld [vmem:[%s4767_s7 + $0xe8] sm:$0xff]  ;;  %v229_v30 = vld [vmem:[%s4767_s7 + $0xf0] sm:$0xff] }
  0x22   : > { %4258 = vmatmul.mubr.msk.f32.gmra.mrb[4].mxu0 %vm239_vm1, %v204_v11  ;;  %v214_v31 = vld [vmem:[%s4767_s7 + $0x78] sm:$0xff] }
  0x23   : > { %4282 = vmatmul.mubr.msk.f32.gmra.mrb[4].mxu1 %vm239_vm1, %v220_v12  ;;  %4260 = vmatprep.mubr.msk.f32.mxu0 %vm239_vm1, %v205_v13  ;;  %v230_v32 = vld [vmem:[%s4767_s7 + $0xf8] sm:$0xff]  ;;  %s7559_s7 = scalar_lea.hbm %s7612_s4, %s4215_s29 }
  0x24   : > { %4284 = vmatprep.mubr.msk.f32.mxu1 %vm239_vm1, %v221_v14  ;;  %v4679_v14 = vmov 2475754826  }
  0x26   : > { %4261 = vmatmul.mubr.msk.f32.gmra.mrb[6].mxu0 %vm239_vm1, %v206_v15 }
  0x27   : > { %4285 = vmatmul.mubr.msk.f32.gmra.mrb[6].mxu1 %vm239_vm1, %v222_v16  ;;  %4263 = vmatprep.mubr.msk.f32.mxu0 %vm239_vm1, %v207_v17  ;;  %v4680_v16 = vmov 2131351028  }
  0x28   : > { %4287 = vmatprep.mubr.msk.f32.mxu1 %vm239_vm1, %v223_v18  ;;  %v4681_v18 = vmov 2102212464  }
  0x2a   : > { %4264 = vmatmul.mubr.msk.f32.gmra.mrb[8].mxu0 %vm239_vm1, %v208_v19 }
  0x2b   : > { %4288 = vmatmul.mubr.msk.f32.gmra.mrb[8].mxu1 %vm239_vm1, %v224_v20  ;;  %4266 = vmatprep.mubr.msk.f32.mxu0 %vm239_vm1, %v209_v21  ;;  %v4682_v20 = vmov 920167782  }
  0x2c   : > { %4290 = vmatprep.mubr.msk.f32.mxu1 %vm239_vm1, %v225_v22 }
  0x2e   : > { %4267 = vmatmul.mubr.msk.f32.gmra.mrb[10].mxu0 %vm239_vm1, %v210_v23 }
  0x2f   : > { %4291 = vmatmul.mubr.msk.f32.gmra.mrb[10].mxu1 %vm239_vm1, %v226_v24  ;;  %4269 = vmatprep.mubr.msk.f32.mxu0 %vm239_vm1, %v211_v25 }
  0x30   : > { %4293 = vmatprep.mubr.msk.f32.mxu1 %vm239_vm1, %v227_v26 }
  0x32   : > { %4270 = vmatmul.mubr.msk.f32.gmra.mrb[12].mxu0 %vm239_vm1, %v212_v27  ;;  %v4683_v27 = vmov 1326507024  }
  0x33   : > { %4294 = vmatmul.mubr.msk.f32.gmra.mrb[12].mxu1 %vm239_vm1, %v228_v28  ;;  %4272 = vmatprep.mubr.msk.f32.mxu0 %vm239_vm1, %v213_v29 }
  0x34   : > { %4296 = vmatprep.mubr.msk.f32.mxu1 %vm239_vm1, %v229_v30 }
  0x36   : > { %4273 = vmatmul.mubr.msk.f32.gmra.mrb[14].mxu0 %vm239_vm1, %v214_v31 }
  0x37   : > { %4297 = vmatmul.mubr.msk.f32.gmra.mrb[14].mxu1 %vm239_vm1, %v230_v32 }
  0xed   : > { %v4253_v34 = vpop.f32.mrb[0].mxu0 }
  0xee   : > { %v4277_v35 = vpop.f32.mrb[0].mxu1  ;;  %v4839_v36 = vadd.f32 %v4253_v34, %v4836_v33  ;;  %v406_v38 = vpop.f32.mrb[1].mxu0 }
  0xef   : > { %v4842_v37 = vadd.f32 %v4277_v35, %v4836_v33  ;;  %v486_v39 = vpop.f32.mrb[1].mxu1  ;;  %v4845_v40 = vadd.f32 %v4836_v33, %v406_v38 }
  0xf0   : > { %v669_v41 = vand.u32 2147483647, %v4839_v36  ;;  %v672_v42 = vand.u32 2139095040, %v4839_v36  ;;  %v4863_v58 = vadd.f32 %v4836_v33, %v486_v39  ;;  %vm671_vm15 = vcmp.lt.s32.totalorder %v4839_v36, 0 }
  0xf1   : > { %v2333_v43 = vand.u32 2147483647, %v4842_v37  ;;  %v2336_v44 = vand.u32 2139095040, %v4842_v37  ;;  %v4851_v45 = vpop.f32.mrb[2].mxu0  ;;  %v568_v51 = vand.u32 2139095040, %v4845_v40 }
  0xf2   : > { %v4853_v46 = vpop.f32.mrb[2].mxu1  ;;  %v673_v47 = vshrl.u32 %v672_v42, 23  ;;  %v676_v48 = vand.u32 8388607, %v669_v41  ;;  %v4860_v53 = vpop.f32.mrb[3].mxu0  ;;  %v2232_v8 = vand.u32 2139095040, %v4863_v58 }
  0xf3   : > { %v2337_v49 = vshrl.u32 %v2336_v44, 23  ;;  %v2340_v50 = vand.u32 8388607, %v2333_v43  ;;  %v569_v55 = vshrl.u32 %v568_v51, 23  ;;  %v565_v61 = vand.u32 2147483647, %v4845_v40 }
  0xf4   : > { %v4085_v52 = vadd.s32 4294967169, %v673_v47  ;;  %v677_v56 = vor.u32 8388608, %v676_v48  ;;  %v4866_v63 = vpop.f32.mrb[3].mxu1  ;;  %vm4966_vm0 = vcmp.le.f32.partialorder %v669_v41, 0.7853982 }
  0xf5   : > { %v4149_v54 = vadd.s32 4294967169, %v2337_v49  ;;  %v2341_v59 = vor.u32 8388608, %v2340_v50  ;;  %v4081_v62 = vadd.s32 4294967169, %v569_v55  ;;  %v4874_v6 = vand.u32 8388607, %v565_v61 }
  0xf6   : > { %v679_v57 = vadd.s32 1, %v4085_v52  ;;  %v4868_v3 = vshll.u32 %v677_v56, 8 }
  0xf7   : > { %v2343_v60 = vadd.s32 1, %v4149_v54  ;;  %v4870_v5 = vshll.u32 %v2341_v59, 8  ;;  %v4876_v7 = vadd.s32 1, %v4081_v62 }
  0xf8   : > { %vm680_vm2 = vcmp.gt.s32.totalorder %v679_v57, 0 }
  0xf9   : > { %v681_v0 = vsel %vm680_vm2, %v679_v57, 0  ;;  %vm2344_vm3 = vcmp.gt.s32.totalorder %v2343_v60, 0  ;;  %vm576_vm8 = vcmp.gt.s32.totalorder %v4876_v7, 0 }
  0xfa   : > { %v682_v1 = vshrl.u32 %v681_v0, 5  ;;  %v683_v2 = vand.u32 31, %v681_v0  ;;  %v2345_v4 = vsel %vm2344_vm3, %v2343_v60, 0 }
  0xfb   : > { %v4880_v12 = vshrl.u32 %v2345_v4, 5  ;;  %v2347_v13 = vand.u32 31, %v2345_v4 }
  0xfc   : > { %v684_v9 = vsub.s32 32, %v683_v2  ;;  %v686_v11 = vshll.u32 %v4678_v10, %v683_v2  ;;  %v689_v15 = vshll.u32 %v4679_v14, %v683_v2  ;;  %v692_v17 = vshll.u32 %v4680_v16, %v683_v2 }
  0xfd   : > { %v695_v19 = vshll.u32 %v4681_v18, %v683_v2  ;;  %v698_v21 = vshll.u32 %v4682_v20, %v683_v2  ;;  %vm701_vm4 = vcmp.lt.s32.totalorder %v682_v1, 1  ;;  %vm702_vm5 = vcmp.lt.s32.totalorder %v682_v1, 2 }
  0xfe   : > { %v687_v22 = vshrl.u32 %v4679_v14, %v684_v9  ;;  %v690_v23 = vshrl.u32 %v4680_v16, %v684_v9  ;;  %v693_v24 = vshrl.u32 %v4681_v18, %v684_v9  ;;  %v685_v25 = vshrl.u32 %v4678_v10, %v684_v9 }
  0xff   : > { %v696_v26 = vshrl.u32 %v4682_v20, %v684_v9  ;;  %v699_v28 = vshrl.u32 %v4683_v27, %v684_v9  ;;  %v2348_v32 = vsub.s32 32, %v2347_v13  ;;  %vm703_vm6 = vcmp.lt.s32.totalorder %v682_v1, 3 }
 0x100   : > { %v688_v29 = vor.u32 %v687_v22, %v686_v11  ;;  %v691_v30 = vor.u32 %v690_v23, %v689_v15  ;;  %v694_v31 = vor.u32 %v693_v24, %v692_v17  ;;  %vm704_vm7 = vcmp.lt.s32.totalorder %v682_v1, 4 }
 0x101   : > { %v697_v34 = vor.u32 %v696_v26, %v695_v19  ;;  %v700_v35 = vor.u32 %v699_v28, %v698_v21  ;;  %v2350_v50 = vshll.u32 %v4678_v10, %v2347_v13  ;;  %v2351_v54 = vshrl.u32 %v4679_v14, %v2348_v32 }
 0x102   : > { %v705_v38 = vsel %vm701_vm4, %v685_v25, %v688_v29  ;;  %v706_v39 = vsel %vm704_vm7, %v694_v31, 2102212464  ;;  %v709_v42 = vsel %vm701_vm4, %v688_v29, %v691_v30  ;;  %v713_v44 = vsel %vm701_vm4, %v691_v30, %v694_v31 }
 0x103   : > { %v707_v47 = vsel %vm703_vm6, %v691_v30, %v706_v39  ;;  %v710_v48 = vsel %vm704_vm7, %v697_v34, 920167782  ;;  %v714_v49 = vsel %vm704_vm7, %v700_v35, 1326507024  ;;  %v2353_v55 = vshll.u32 %v4679_v14, %v2347_v13 }
 0x104   : > { %v711_v51 = vsel %vm703_vm6, %v694_v31, %v710_v48  ;;  %v715_v52 = vsel %vm703_vm6, %v697_v34, %v714_v49  ;;  %v708_v56 = vsel %vm702_vm5, %v705_v38, %v707_v47  ;;  %v2354_v60 = vshrl.u32 %v4680_v16, %v2348_v32 }
 0x105   : > { %v712_v57 = vsel %vm702_vm5, %v709_v42, %v711_v51  ;;  %v716_v59 = vsel %vm702_vm5, %v713_v44, %v715_v52  ;;  %v2352_v9 = vor.u32 %v2351_v54, %v2350_v50  ;;  %v2356_v15 = vshll.u32 %v4680_v16, %v2347_v13 }
 0x106   : > { %v4904_v62 = vmul.u32.u64.low %v4868_v3, %v716_v59  ;;  %v4905_v0 = vmul.u32.u64.high %v4868_v3, %v716_v59, %v4904_v62  ;;  %v4908_v2 = vmul.u32.u64.low %v4868_v3, %v712_v57  ;;  %v4909_v4 = vmul.u32.u64.high %v4868_v3, %v712_v57, %v4908_v2 }
 0x107   : > { %v2355_v11 = vor.u32 %v2354_v60, %v2353_v55  ;;  %v2357_v17 = vshrl.u32 %v4681_v18, %v2348_v32  ;;  %v2349_v19 = vshrl.u32 %v4678_v10, %v2348_v32  ;;  %v2359_v1 = vshll.u32 %v4681_v18, %v2347_v13  ;;  %v4946_v62 = vpop.f32.mrb[4].mxu0 }
 0x108   : > { %v2360_v21 = vshrl.u32 %v4682_v20, %v2348_v32  ;;  %v2363_v22 = vshrl.u32 %v4683_v27, %v2348_v32  ;;  %v724_v23 = vmul.u32 %v4868_v3, %v708_v56  ;;  %v2362_v25 = vshll.u32 %v4682_v20, %v2347_v13 }
 0x109   : > { %v2358_v24 = vor.u32 %v2357_v17, %v2356_v15  ;;  %vm2365_vm9 = vcmp.lt.s32.totalorder %v4880_v12, 1  ;;  %vm726_vm10 = vc.u32 %v4905_v0, %v4908_v2  ;;  %v727_v26 = vadd.s32 1, %v4909_v4 }
 0x10a   : > { %v2361_v28 = vor.u32 %v2360_v21, %v2359_v1  ;;  %vm2366_vm11 = vcmp.lt.s32.totalorder %v4880_v12, 2  ;;  %v2364_v29 = vor.u32 %v2363_v22, %v2362_v25  ;;  %vm2367_vm12 = vcmp.lt.s32.totalorder %v4880_v12, 3 }
 0x10b   : > { %vm2368_vm13 = vcmp.lt.s32.totalorder %v4880_v12, 4  ;;  %v2373_v30 = vsel %vm2365_vm9, %v2352_v9, %v2355_v11  ;;  %v728_v3 = vsel %vm726_vm10, %v727_v26, %v4909_v4  ;;  %v2377_v13 = vsel %vm2365_vm9, %v2355_v11, %v2358_v24 }
 0x10c   : > { %v2370_v31 = vsel %vm2368_vm13, %v2358_v24, 2102212464  ;;  %v2374_v32 = vsel %vm2368_vm13, %v2361_v28, 920167782  ;;  %v729_v34 = vadd.s32 %v728_v3, %v724_v23  ;;  %v2369_v35 = vsel %vm2365_vm9, %v2349_v19, %v2352_v9 }
 0x10d   : > { %v2375_v38 = vsel %vm2367_vm12, %v2358_v24, %v2374_v32  ;;  %v2378_v39 = vsel %vm2368_vm13, %v2364_v29, 1326507024  ;;  %v2371_v42 = vsel %vm2367_vm12, %v2355_v11, %v2370_v31  ;;  %v577_v48 = vsel %vm576_vm8, %v4876_v7, 0 }
 0x10e   : > { %v2376_v44 = vsel %vm2366_vm11, %v2373_v30, %v2375_v38  ;;  %v2379_v47 = vsel %vm2367_vm12, %v2361_v28, %v2378_v39  ;;  %v730_v49 = vadd.s32 536870912, %v729_v34  ;;  %v2229_v56 = vand.u32 2147483647, %v4863_v58 }
 0x10f   : > { %v2380_v50 = vsel %vm2366_vm11, %v2377_v13, %v2379_v47  ;;  %v4934_v51 = vmul.u32.u64.low %v4870_v5, %v2376_v44  ;;  %v4935_v52 = vmul.u32.u64.high %v4870_v5, %v2376_v44, %v4934_v51  ;;  %v2372_v59 = vsel %vm2366_vm11, %v2369_v35, %v2371_v42 }
 0x110   : > { %v4939_v54 = vmul.u32.u64.low %v4870_v5, %v2380_v50  ;;  %v4940_v55 = vmul.u32.u64.high %v4870_v5, %v2380_v50, %v4939_v54  ;;  %v731_v57 = vshrl.u32 %v730_v49, 30  ;;  %v573_v7 = vor.u32 8388608, %v4874_v6 }
 0x111   : > { %v579_v60 = vand.u32 31, %v577_v48  ;;  %v2391_v9 = vadd.s32 1, %v4935_v52  ;;  %v2233_v15 = vshrl.u32 %v2232_v8, 23  ;;  %v2388_v17 = vmul.u32 %v4870_v5, %v2372_v59 }
 0x112   : > { %v732_v4 = vshll.u32 %v731_v57, 30  ;;  %vm2390_vm14 = vc.u32 %v4940_v55, %v4934_v51  ;;  %v4956_v12 = vand.u32 8388607, %v2229_v56  ;;  %v4962_v1 = vshll.u32 %v573_v7, 8 }
 0x113   : > { %v580_v11 = vsub.s32 32, %v579_v60  ;;  %v2392_v19 = vsel %vm2390_vm14, %v2391_v9, %v4935_v52  ;;  %v725_v5 = vadd.s32 %v4908_v2, %v4905_v0  ;;  %v4971_v22 = vshrl.u32 %v577_v48, 5 }
 0x114   : > { %v4959_v6 = vsub.s32 %v729_v34, %v732_v4  ;;  %v2393_v21 = vadd.s32 %v2392_v19, %v2388_v17  ;;  %v4145_v28 = vadd.s32 4294967169, %v2233_v15  ;;  %v755_v29 = vsub.s32 4, %v731_v57 }
 0x115   : > { %v583_v23 = vshrl.u32 %v4679_v14, %v580_v11  ;;  %v586_v25 = vshrl.u32 %v4680_v16, %v580_v11  ;;  %v589_v26 = vshrl.u32 %v4681_v18, %v580_v11  ;;  %v582_v41 = vshll.u32 %v4678_v10, %v579_v60 }
 0x116   : > { %v735_v24 = vsub.s32 0, %v4959_v6  ;;  %v2394_v30 = vadd.s32 536870912, %v2393_v21  ;;  %v2237_v3 = vor.u32 8388608, %v4956_v12  ;;  %v585_v2 = vshll.u32 %v4679_v14, %v579_v60 }
 0x117   : > { %v588_v31 = vshll.u32 %v4680_v16, %v579_v60  ;;  %v592_v32 = vshrl.u32 %v4682_v20, %v580_v11  ;;  %v584_v34 = vor.u32 %v583_v23, %v582_v41  ;;  %v591_v35 = vshll.u32 %v4681_v18, %v579_v60 }
 0x118   : > { %v4086_v0 = vmin.u32 %v735_v24, %v4959_v6  ;;  %v2395_v13 = vshrl.u32 %v2394_v30, 30  ;;  %v595_v38 = vshrl.u32 %v4683_v27, %v580_v11  ;;  %v587_v42 = vor.u32 %v586_v25, %v585_v2 }
 0x119   : > { %v590_v44 = vor.u32 %v589_v26, %v588_v31  ;;  %v594_v47 = vshll.u32 %v4682_v20, %v579_v60  ;;  %v756_v48 = vsel %vm671_vm15, %v755_v29, %v731_v57  ;;  %v593_v50 = vor.u32 %v592_v32, %v591_v35 }
 0x11a   : > { %v737_v39 = vclz %v4086_v0  ;;  %v2396_v49 = vshll.u32 %v2395_v13, 30  ;;  %vm597_vm1 = vcmp.lt.s32.totalorder %v4971_v22, 1  ;;  %vm598_vm2 = vcmp.lt.s32.totalorder %v4971_v22, 2 }
 0x11b   : > { %v596_v54 = vor.u32 %v595_v38, %v594_v47  ;;  %vm600_vm3 = vcmp.lt.s32.totalorder %v4971_v22, 4  ;;  %vm2335_vm4 = vcmp.lt.s32.totalorder %v4842_v37, 0  ;;  %v581_v7 = vshrl.u32 %v4678_v10, %v580_v11 }
 0x11c   : > { %v4087_v52 = vadd.s32 4294967294, %v737_v39  ;;  %v4992_v59 = vsub.s32 %v2393_v21, %v2396_v49  ;;  %vm599_vm5 = vcmp.lt.s32.totalorder %v4971_v22, 3  ;;  %v606_v57 = vsel %vm600_vm3, %v593_v50, 920167782 }
 0x11d   : > { %v758_v60 = vsel %vm4966_vm0, 0, %v756_v48  ;;  %v605_v4 = vsel %vm597_vm1, %v584_v34, %v587_v42  ;;  %v607_v9 = vsel %vm599_vm5, %v590_v44, %v606_v57  ;;  %v2419_v19 = vsub.s32 4, %v2395_v13 }
 0x11e   : > { %vm4088_vm6 = vcmp.lt.s32.totalorder %v4087_v52, 0  ;;  %v2399_v17 = vsub.s32 0, %v4992_v59  ;;  %v609_v11 = vsel %vm597_vm1, %v587_v42, %v590_v44  ;;  %vm5009_vm7 = vcmp.le.f32.partialorder %v2333_v43, 0.7853982 }
 0x11f   : > { %v740_v15 = vsel %vm4088_vm6, 0, %v4087_v52  ;;  %v602_v25 = vsel %vm600_vm3, %v590_v44, 2102212464  ;;  %v610_v26 = vsel %vm600_vm3, %v596_v54, 1326507024  ;;  %v608_v41 = vsel %vm598_vm2, %v605_v4, %v607_v9  ;;  %v5046_v4 = vpop.f32.mrb[4].mxu1 }
 0x120   : > { %v741_v21 = vsub.s32 32, %v740_v15  ;;  %v745_v23 = vsub.s32 4294967266, %v740_v15  ;;  %v742_v29 = vshll.u32 %v4959_v6, %v740_v15  ;;  %v4150_v30 = vmin.u32 %v2399_v17, %v4992_v59 }
 0x121   : > { %v611_v0 = vsel %vm599_vm5, %v593_v50, %v610_v26  ;;  %v2239_v32 = vadd.s32 1, %v4145_v28  ;;  %v762_v35 = vadd.s32 3, %v758_v60  ;;  %v601_v39 = vsel %vm597_vm1, %v581_v7, %v584_v34 }
 0x122   : > { %v743_v43 = vshrl.u32 %v725_v5, %v741_v21  ;;  %v746_v2 = vadd.s32 127, %v745_v23  ;;  %v612_v31 = vsel %vm598_vm2, %v609_v11, %v611_v0  ;;  %v2401_v38 = vclz %v4150_v30 }
 0x123   : > { %v603_v6 = vsel %vm599_vm5, %v587_v42, %v602_v25  ;;  %v5030_v48 = vmul.u32.u64.low %v4962_v1, %v612_v31  ;;  %v5031_v49 = vmul.u32.u64.high %v4962_v1, %v612_v31, %v5030_v48  ;;  %vm2240_vm8 = vcmp.gt.s32.totalorder %v2239_v32, 0 }
 0x124   : > { %v744_v44 = vor.u32 %v743_v43, %v742_v29  ;;  %v747_v47 = vshll.u32 %v746_v2, 23  ;;  %v4151_v5 = vadd.s32 4294967294, %v2401_v38  ;;  %v2389_v34 = vadd.s32 %v4934_v51, %v4940_v55 }
 0x125   : > { %v5034_v50 = vmul.u32.u64.low %v4962_v1, %v608_v41  ;;  %v5035_v52 = vmul.u32.u64.high %v4962_v1, %v608_v41, %v5034_v50  ;;  %v2420_v42 = vsel %vm2335_vm4, %v2419_v19, %v2395_v13  ;;  %v2241_v54 = vsel %vm2240_vm8, %v2239_v32, 0 }
 0x126   : > { %v748_v28 = vor.u32 4788187, %v747_v47  ;;  %v5042_v7 = vand.u32 3, %v762_v35  ;;  %vm4152_vm9 = vcmp.lt.s32.totalorder %v4151_v5, 0  ;;  %v604_v57 = vsel %vm598_vm2, %v601_v39, %v603_v6 }
 0x127   : > { %v2243_v60 = vand.u32 31, %v2241_v54  ;;  %v751_v15 = vcvt.s32.f32 %v744_v44  ;;  %v2404_v17 = vsel %vm4152_vm9, 0, %v4151_v5  ;;  %vm622_vm10 = vc.u32 %v5031_v49, %v5034_v50 }
 0x128   : > { %v749_v9 = vand.u32 2147483647, %v748_v28  ;;  %v2405_v51 = vsub.s32 32, %v2404_v17  ;;  %v2409_v55 = vsub.s32 4294967266, %v2404_v17  ;;  %v2422_v13 = vsel %vm5009_vm7, 0, %v2420_v42 }
 0x129   : > { %v623_v19 = vadd.s32 1, %v5035_v52  ;;  %v620_v22 = vmul.u32 %v4962_v1, %v604_v57  ;;  %v5054_v21 = vshrl.u32 %v2241_v54, 5  ;;  %v2244_v23 = vsub.s32 32, %v2243_v60 }
 0x12a   : > { %v752_v11 = vmul.f32 %v751_v15, %v749_v9  ;;  %v2406_v25 = vshll.u32 %v4992_v59, %v2404_v17  ;;  %v2407_v26 = vshrl.u32 %v2389_v34, %v2405_v51  ;;  %v2410_v29 = vadd.s32 127, %v2409_v55 }
 0x12b   : > { %v624_v30 = vsel %vm622_vm10, %v623_v19, %v5035_v52  ;;  %v2246_v43 = vshll.u32 %v4678_v10, %v2243_v60  ;;  %v2247_v2 = vshrl.u32 %v4679_v14, %v2244_v23  ;;  %v2249_v35 = vshll.u32 %v4679_v14, %v2243_v60 }
 0x12c   : > { %v753_v41 = vxor.u32 2147483648, %v752_v11  ;;  %v625_v0 = vadd.s32 %v624_v30, %v620_v22  ;;  %v2408_v31 = vor.u32 %v2407_v26, %v2406_v25  ;;  %v2411_v32 = vshll.u32 %v2410_v29, 23 }
 0x12d   : > { %v2250_v1 = vshrl.u32 %v4680_v16, %v2244_v23  ;;  %v2252_v39 = vshll.u32 %v4680_v16, %v2243_v60  ;;  %v2253_v6 = vshrl.u32 %v4681_v18, %v2244_v23  ;;  %v2248_v48 = vor.u32 %v2247_v2, %v2246_v43 }
 0x12e   : > { %v754_v38 = vsel %vm671_vm15, %v753_v41, %v752_v11  ;;  %v626_v59 = vadd.s32 536870912, %v625_v0  ;;  %v2412_v47 = vor.u32 4788187, %v2411_v32  ;;  %v2255_v5 = vshll.u32 %v4681_v18, %v2243_v60 }
 0x12f   : > { %v757_v44 = vsel %vm4966_vm0, %v4839_v36, %v754_v38  ;;  %v2415_v52 = vcvt.s32.f32 %v2408_v31  ;;  %v2256_v34 = vshrl.u32 %v4682_v20, %v2244_v23  ;;  %v2251_v54 = vor.u32 %v2250_v1, %v2249_v35 }
 0x130   : > { %4476 = vcosq.f32 %v757_v44  ;;  %v5070_v28 = vshrl.u32 %v626_v59, 30  ;;  %v2413_v42 = vand.u32 2147483647, %v2412_v47  ;;  %v2259_v57 = vshrl.u32 %v4683_v27, %v2244_v23 }
 0x131   : > { %4478 = vsinq.f32 %v757_v44  ;;  %v2257_v15 = vor.u32 %v2256_v34, %v2255_v5  ;;  %v2254_v17 = vor.u32 %v2253_v6, %v2252_v39  ;;  %v2258_v51 = vshll.u32 %v4682_v20, %v2243_v60 }
 0x132   : > { %v628_v9 = vshll.u32 %v5070_v28, 30  ;;  %v2416_v8 = vmul.f32 %v2415_v52, %v2413_v42  ;;  %vm768_vm11 = vcmp.eq.s32.totalorder %v5042_v7, 2  ;;  %v2426_v55 = vadd.s32 3, %v2422_v13 }
 0x133   : > { %vm2261_vm12 = vcmp.lt.s32.totalorder %v5054_v21, 1  ;;  %v5082_v11 = vshll.u32 %v2237_v3, 8  ;;  %vm765_vm13 = vcmp.eq.s32.totalorder %v5042_v7, 0  ;;  %v2260_v25 = vor.u32 %v2259_v57, %v2258_v51 }
 0x134   : > { %v5077_v19 = vsub.s32 %v625_v0, %v628_v9  ;;  %v2417_v22 = vxor.u32 2147483648, %v2416_v8  ;;  %vm2264_vm14 = vcmp.lt.s32.totalorder %v5054_v21, 4  ;;  %v2269_v60 = vsel %vm2261_vm12, %v2248_v48, %v2251_v54 }
 0x135   : > { %vm764_vm15 = vcmp.lt.s32.totalorder %v5042_v7, 2  ;;  %vm567_vm0 = vcmp.lt.s32.totalorder %v4845_v40, 0  ;;  %v2245_v26 = vshrl.u32 %v4678_v10, %v2244_v23  ;;  %vm2263_vm1 = vcmp.lt.s32.totalorder %v5054_v21, 3 }
 0x136   : > { %v631_v13 = vsub.s32 0, %v5077_v19  ;;  %v2270_v12 = vsel %vm2264_vm14, %v2257_v15, 920167782  ;;  %vm761_vm2 = vweird.f32 %v4839_v36  ;;  %v2418_v3 = vsel %vm2335_vm4, %v2417_v22, %v2416_v8 }
 0x137   : > { %vm2262_vm3 = vcmp.lt.s32.totalorder %v5054_v21, 2  ;;  %v2266_v29 = vsel %vm2264_vm14, %v2254_v17, 2102212464  ;;  %v2271_v30 = vsel %vm2263_vm1, %v2254_v17, %v2270_v12  ;;  %v2421_v23 = vsel %vm5009_vm7, %v4842_v37, %v2418_v3 }
 0x138   : > { %v4082_v41 = vmin.u32 %v631_v13, %v5077_v19  ;;  %v2272_v0 = vsel %vm2262_vm3, %v2269_v60, %v2271_v30  ;;  %v2273_v43 = vsel %vm2261_vm12, %v2251_v54, %v2254_v17  ;;  %4480 = vcosq.f32 %v2421_v23 }
 0x139   : > { %v2274_v2 = vsel %vm2264_vm14, %v2260_v25, 1326507024  ;;  %v5114_v31 = vmul.u32.u64.low %v5082_v11, %v2272_v0  ;;  %v5115_v32 = vmul.u32.u64.high %v5082_v11, %v2272_v0, %v5114_v31  ;;  %4482 = vsinq.f32 %v2421_v23 }
 0x13a   : > { %v4477_v35 = vpop.eup %4476  ;;  %vm5121_vm4 = vcmp.le.f32.partialorder %v565_v61, 0.7853982  ;;  %v633_v1 = vclz %v4082_v41  ;;  %v2265_v38 = vsel %vm2261_vm12, %v2245_v26, %v2248_v48  ;;  %v2267_v59 = vsel %vm2263_vm1, %v2251_v54, %v2266_v29 }
 0x13b   : > { %v4479_v39 = vpop.eup %4478  ;;  %v769_v6 = vxor.u32 2147483648, %v4477_v35  ;;  %v2427_v44 = vand.u32 3, %v2426_v55  ;;  %v651_v47 = vsub.s32 4, %v5070_v28  ;;  %v2275_v5 = vsel %vm2263_vm1, %v2257_v15, %v2274_v2 }
 0x13c   : > { %v766_v52 = vxor.u32 2147483648, %v4479_v39  ;;  %v4083_v61 = vadd.s32 4294967294, %v633_v1  ;;  %v2276_v34 = vsel %vm2262_vm3, %v2273_v43, %v2275_v5  ;;  %v5136_v42 = vadd.f32 %v4851_v45, %v4836_v33  ;;  %v5153_v45 = vld [vmem:[%s7611_s3] ss:$0 sm:$0xff] }
 0x13d   : > { %v770_v48 = vsel %vm768_vm11, %v769_v6, %v4479_v39  ;;  %v2268_v54 = vsel %vm2262_vm3, %v2265_v38, %v2267_v59  ;;  %v5145_v57 = vmul.u32.u64.low %v5082_v11, %v2276_v34  ;;  %v5146_v9 = vmul.u32.u64.high %v5082_v11, %v2276_v34, %v5145_v57 }
 0x13e   : > { %v767_v15 = vsel %vm765_vm13, %v4477_v35, %v766_v52  ;;  %v621_v8 = vadd.s32 %v5034_v50, %v5031_v49  ;;  %vm4084_vm5 = vcmp.lt.s32.totalorder %v4083_v61, 0  ;;  %v2287_v17 = vadd.s32 1, %v5115_v32  ;;  %v5167_v50 = vpop.f32.mrb[5].mxu0 }
 0x13f   : > { %v771_v21 = vsel %vm764_vm15, %v767_v15, %v770_v48  ;;  %v636_v51 = vsel %vm4084_vm5, 0, %v4083_v61  ;;  %v652_v55 = vsel %vm567_vm0, %v651_v47, %v5070_v28  ;;  %v880_v22 = vand.u32 2139095040, %v5136_v42 }
 0x140   : > { %v772_v25 = vsel %vm761_vm2, nan, %v771_v21  ;;  %v637_v60 = vsub.s32 32, %v636_v51  ;;  %v641_v13 = vsub.s32 4294967266, %v636_v51  ;;  %v2284_v49 = vmul.u32 %v5082_v11, %v2268_v54 }
 0x141   : > { %v3901_v26 = vmul.f32 %v5153_v45, %v772_v25  ;;  %v638_v7 = vshll.u32 %v5077_v19, %v636_v51  ;;  %vm2286_vm6 = vc.u32 %v5146_v9, %v5114_v31  ;;  %v877_v28 = vand.u32 2147483647, %v5136_v42 }
 0x142   : > { %v639_v12 = vshrl.u32 %v621_v8, %v637_v60  ;;  %v642_v3 = vadd.s32 127, %v641_v13  ;;  %v2288_v36 = vsel %vm2286_vm6, %v2287_v17, %v5115_v32  ;;  %v881_v29 = vshrl.u32 %v880_v22, 23  ;;  %v4481_v30 = vpop.eup %4480 }
 0x143   : > { %3933 = vst [vmem:[%s5175_s14 + $0x8] sm:$0xff] %v3901_v26  ;;  %vm2425_vm7 = vweird.f32 %v4842_v37  ;;  %vm2428_vm8 = vcmp.lt.s32.totalorder %v2427_v44, 2  ;;  %v654_v19 = vsel %vm5121_vm4, 0, %v652_v55  ;;  %v2289_v11 = vadd.s32 %v2288_v36, %v2284_v49  ;;  %v4483_v23 = vpop.eup %4482 }
 0x144   : > { %v2433_v41 = vxor.u32 2147483648, %v4481_v30  ;;  %v640_v0 = vor.u32 %v639_v12, %v638_v7  ;;  %v643_v43 = vshll.u32 %v642_v3, 23  ;;  %v4093_v2 = vadd.s32 4294967169, %v881_v29 }
 0x145   : > { %v2430_v35 = vxor.u32 2147483648, %v4483_v23  ;;  %vm2432_vm9 = vcmp.eq.s32.totalorder %v2427_v44, 2  ;;  %v2290_v32 = vadd.s32 536870912, %v2289_v11  ;;  %v884_v1 = vand.u32 8388607, %v877_v28 }
 0x146   : > { %vm2429_vm10 = vcmp.eq.s32.totalorder %v2427_v44, 0  ;;  %v2434_v38 = vsel %vm2432_vm9, %v2433_v41, %v4483_v23  ;;  %v644_v59 = vor.u32 4788187, %v643_v43  ;;  %v887_v39 = vadd.s32 1, %v4093_v2 }
 0x147   : > { %v2431_v6 = vsel %vm2429_vm10, %v4481_v30, %v2430_v35  ;;  %v658_v47 = vadd.s32 3, %v654_v19  ;;  %v5183_v5 = vshrl.u32 %v2290_v32, 30  ;;  %v5187_v52 = vadd.f32 %v4853_v46, %v4836_v33 }
 0x148   : > { %v2435_v61 = vsel %vm2428_vm8, %v2431_v6, %v2434_v38  ;;  %v645_v34 = vand.u32 2147483647, %v644_v59  ;;  %v647_v48 = vcvt.s32.f32 %v640_v0  ;;  %vm888_vm11 = vcmp.gt.s32.totalorder %v887_v39, 0 }
 0x149   : > { %v2436_v54 = vsel %vm2425_vm7, nan, %v2435_v61  ;;  %v2292_v57 = vshll.u32 %v5183_v5, 30  ;;  %v885_v15 = vor.u32 8388608, %v884_v1  ;;  %v889_v8 = vsel %vm888_vm11, %v887_v39, 0 }
 0x14a   : > { %v3917_v17 = vmul.f32 %v5153_v45, %v2436_v54  ;;  %v648_v21 = vmul.f32 %v647_v48, %v645_v34  ;;  %v891_v51 = vand.u32 31, %v889_v8  ;;  %v5197_v46 = vand.u32 3, %v658_v47 }
 0x14b   : > { %v5194_v55 = vsub.s32 %v2289_v11, %v2292_v57  ;;  %v2285_v22 = vadd.s32 %v5114_v31, %v5146_v9  ;;  %v5202_v25 = vshll.u32 %v885_v15, 8  ;;  %v2541_v60 = vand.u32 2147483647, %v5187_v52 }
 0x14c   : > { %3949 = vst [vmem:[%s5175_s14 + $0x88] sm:$0xff] %v3917_v17  ;;  %v649_v33 = vxor.u32 2147483648, %v648_v21  ;;  %v892_v44 = vsub.s32 32, %v891_v51  ;;  %v2315_v49 = vsub.s32 4, %v5183_v5  ;;  %v894_v9 = vshll.u32 %v4678_v10, %v891_v51 }
 0x14d   : > { %v2295_v37 = vsub.s32 0, %v5194_v55  ;;  %v5216_v36 = vshrl.u32 %v889_v8, 5  ;;  %v897_v29 = vshll.u32 %v4679_v14, %v891_v51  ;;  %v900_v30 = vshll.u32 %v4680_v16, %v891_v51 }
 0x14e   : > { %v650_v13 = vsel %vm567_vm0, %v649_v33, %v648_v21  ;;  %v895_v26 = vshrl.u32 %v4679_v14, %v892_v44  ;;  %v898_v7 = vshrl.u32 %v4680_v16, %v892_v44  ;;  %v901_v3 = vshrl.u32 %v4681_v18, %v892_v44 }
 0x14f   : > { %v653_v12 = vsel %vm5121_vm4, %v4845_v40, %v650_v13  ;;  %v4146_v31 = vmin.u32 %v2295_v37, %v5194_v55  ;;  %v2544_v23 = vand.u32 2139095040, %v5187_v52  ;;  %vm2231_vm12 = vcmp.lt.s32.totalorder %v4863_v58, 0 }
 0x150   : > { %4484 = vcosq.f32 %v653_v12  ;;  %v896_v11 = vor.u32 %v895_v26, %v894_v9  ;;  %v899_v24 = vor.u32 %v898_v7, %v897_v29  ;;  %v902_v41 = vor.u32 %v901_v3, %v900_v30 }
 0x151   : > { %4486 = vsinq.f32 %v653_v12  ;;  %v2297_v19 = vclz %v4146_v31  ;;  %v903_v0 = vshll.u32 %v4681_v18, %v891_v51  ;;  %v904_v43 = vshrl.u32 %v4682_v20, %v892_v44 }
 0x152   : > { %v893_v35 = vshrl.u32 %v4678_v10, %v892_v44  ;;  %v906_v32 = vshll.u32 %v4682_v20, %v891_v51  ;;  %v907_v1 = vshrl.u32 %v4683_v27, %v892_v44  ;;  %vm664_vm13 = vcmp.eq.s32.totalorder %v5197_v46, 2 }
 0x153   : > { %v4147_v2 = vadd.s32 4294967294, %v2297_v19  ;;  %v905_v38 = vor.u32 %v904_v43, %v903_v0  ;;  %vm909_vm14 = vcmp.lt.s32.totalorder %v5216_v36, 1  ;;  %vm910_vm15 = vcmp.lt.s32.totalorder %v5216_v36, 2 }
 0x154   : > { %vm912_vm0 = vcmp.lt.s32.totalorder %v5216_v36, 4  ;;  %vm661_vm1 = vcmp.eq.s32.totalorder %v5197_v46, 0  ;;  %vm5234_vm2 = vcmp.le.f32.partialorder %v2229_v56, 0.7853982  ;;  %v908_v39 = vor.u32 %v907_v1, %v906_v32 }
 0x155   : > { %vm4148_vm3 = vcmp.lt.s32.totalorder %v4147_v2, 0  ;;  %vm911_vm4 = vcmp.lt.s32.totalorder %v5216_v36, 3  ;;  %v914_v6 = vsel %vm912_vm0, %v902_v41, 2102212464  ;;  %vm660_vm5 = vcmp.lt.s32.totalorder %v5197_v46, 2 }
 0x156   : > { %v2300_v47 = vsel %vm4148_vm3, 0, %v4147_v2  ;;  %v913_v61 = vsel %vm909_vm14, %v893_v35, %v896_v11  ;;  %v917_v34 = vsel %vm909_vm14, %v896_v11, %v899_v24  ;;  %v918_v56 = vsel %vm912_vm0, %v905_v38, 920167782 }
 0x157   : > { %vm657_vm6 = vweird.f32 %v4845_v40  ;;  %v2301_v48 = vsub.s32 32, %v2300_v47  ;;  %v2305_v54 = vsub.s32 4294967266, %v2300_v47  ;;  %v915_v57 = vsel %vm911_vm4, %v899_v24, %v914_v6 }
 0x158   : > { %v921_v15 = vsel %vm909_vm14, %v899_v24, %v902_v41  ;;  %v2302_v8 = vshll.u32 %v5194_v55, %v2300_v47  ;;  %v919_v17 = vsel %vm911_vm4, %v902_v41, %v918_v56  ;;  %v922_v21 = vsel %vm912_vm0, %v908_v39, 1326507024  ;;  %v5276_v41 = vpop.f32.mrb[5].mxu1 }
 0x159   : > { %v2545_v51 = vshrl.u32 %v2544_v23, 23  ;;  %v2303_v33 = vshrl.u32 %v2285_v22, %v2301_v48  ;;  %v2306_v44 = vadd.s32 127, %v2305_v54  ;;  %v920_v37 = vsel %vm910_vm15, %v917_v34, %v919_v17 }
 0x15a   : > { %v923_v13 = vsel %vm911_vm4, %v905_v38, %v922_v21  ;;  %v4485_v26 = vpop.eup %4484  ;;  %v5265_v55 = vmul.u32.u64.low %v5202_v25, %v920_v37  ;;  %v5266_v12 = vmul.u32.u64.high %v5202_v25, %v920_v37, %v5265_v55  ;;  %v2316_v30 = vsel %vm2231_vm12, %v2315_v49, %v5183_v5 }
 0x15b   : > { %v924_v7 = vsel %vm910_vm15, %v921_v15, %v923_v13  ;;  %v4157_v31 = vadd.s32 4294967169, %v2545_v51  ;;  %v4487_v9 = vpop.eup %4486  ;;  %v665_v3 = vxor.u32 2147483648, %v4485_v26  ;;  %v2304_v22 = vor.u32 %v2303_v33, %v2302_v8 }
 0x15c   : > { %v2307_v29 = vshll.u32 %v2306_v44, 23  ;;  %v662_v19 = vxor.u32 2147483648, %v4487_v9  ;;  %v5273_v11 = vmul.u32.u64.low %v5202_v25, %v924_v7  ;;  %v5274_v23 = vmul.u32.u64.high %v5202_v25, %v924_v7, %v5273_v11 }
 0x15d   : > { %v2551_v24 = vadd.s32 1, %v4157_v31  ;;  %v666_v0 = vsel %vm664_vm13, %v665_v3, %v4487_v9  ;;  %v916_v2 = vsel %vm910_vm15, %v913_v61, %v915_v57  ;;  %v2548_v35 = vand.u32 8388607, %v2541_v60 }
 0x15e   : > { %v2308_v43 = vor.u32 4788187, %v2307_v29  ;;  %v663_v5 = vsel %vm661_vm1, %v4485_v26, %v662_v19  ;;  %v2318_v49 = vsel %vm5234_vm2, 0, %v2316_v30  ;;  %v935_v32 = vadd.s32 1, %v5266_v12 }
 0x15f   : > { %vm2552_vm7 = vcmp.gt.s32.totalorder %v2551_v24, 0  ;;  %v667_v1 = vsel %vm660_vm5, %v663_v5, %v666_v0  ;;  %v2311_v39 = vcvt.s32.f32 %v2304_v22  ;;  %v932_v47 = vmul.u32 %v5202_v25, %v916_v2 }
 0x160   : > { %v2309_v38 = vand.u32 2147483647, %v2308_v43  ;;  %v2553_v36 = vsel %vm2552_vm7, %v2551_v24, 0  ;;  %v668_v6 = vsel %vm657_vm6, nan, %v667_v1  ;;  %vm934_vm8 = vc.u32 %v5274_v23, %v5265_v55 }
 0x161   : > { %v3900_v61 = vmul.f32 %v5153_v45, %v668_v6  ;;  %v936_v56 = vsel %vm934_vm8, %v935_v32, %v5266_v12  ;;  %v2555_v48 = vand.u32 31, %v2553_v36  ;;  %v2322_v54 = vadd.s32 3, %v2318_v49  ;;  %v5333_v49 = vld [vmem:[%s7610_s2] ss:$0 sm:$0xff] }
 0x162   : > { %v2312_v34 = vmul.f32 %v2311_v39, %v2309_v38  ;;  %v937_v46 = vadd.s32 %v936_v56, %v932_v47  ;;  %v2549_v57 = vor.u32 8388608, %v2548_v35  ;;  %v5299_v8 = vshrl.u32 %v2553_v36, 5 }
 0x163   : > { %3932 = vst [vmem:[%s5175_s14] sm:$0xff] %v3900_v61  ;;  %v2556_v40 = vsub.s32 32, %v2555_v48  ;;  %v2558_v17 = vshll.u32 %v4678_v10, %v2555_v48  ;;  %v2561_v21 = vshll.u32 %v4679_v14, %v2555_v48  ;;  %v2564_v51 = vshll.u32 %v4680_v16, %v2555_v48 }
 0x164   : > { %v2313_v15 = vxor.u32 2147483648, %v2312_v34  ;;  %v938_v25 = vadd.s32 536870912, %v937_v46  ;;  %v2567_v33 = vshll.u32 %v4681_v18, %v2555_v48  ;;  %v2570_v26 = vshll.u32 %v4682_v20, %v2555_v48 }
 0x165   : > { %v2559_v37 = vshrl.u32 %v4679_v14, %v2556_v40  ;;  %v2562_v13 = vshrl.u32 %v4680_v16, %v2556_v40  ;;  %v2565_v31 = vshrl.u32 %v4681_v18, %v2556_v40  ;;  %v2568_v9 = vshrl.u32 %v4682_v20, %v2556_v40 }
 0x166   : > { %v2314_v44 = vsel %vm2231_vm12, %v2313_v15, %v2312_v34  ;;  %v939_v12 = vshrl.u32 %v938_v25, 30  ;;  %v2571_v29 = vshrl.u32 %v4683_v27, %v2556_v40  ;;  %vm879_vm9 = vcmp.lt.s32.totalorder %v5136_v42, 0 }
 0x167   : > { %v2317_v7 = vsel %vm5234_vm2, %v4863_v58, %v2314_v44  ;;  %v2560_v3 = vor.u32 %v2559_v37, %v2558_v17  ;;  %v2563_v22 = vor.u32 %v2562_v13, %v2561_v21  ;;  %v2566_v19 = vor.u32 %v2565_v31, %v2564_v51 }
 0x168   : > { %4488 = vcosq.f32 %v2317_v7  ;;  %v940_v30 = vshll.u32 %v939_v12, 30  ;;  %v2569_v11 = vor.u32 %v2568_v9, %v2567_v33  ;;  %v2572_v24 = vor.u32 %v2571_v29, %v2570_v26 }
 0x169   : > { %4490 = vsinq.f32 %v2317_v7  ;;  %vm2573_vm10 = vcmp.lt.s32.totalorder %v5299_v8, 1  ;;  %v2323_v59 = vand.u32 3, %v2322_v54  ;;  %vm2576_vm11 = vcmp.lt.s32.totalorder %v5299_v8, 4 }
 0x16a   : > { %v5318_v0 = vsub.s32 %v937_v46, %v940_v30  ;;  %v2581_v43 = vsel %vm2573_vm10, %v2560_v3, %v2563_v22  ;;  %vm5325_vm12 = vcmp.le.f32.partialorder %v877_v28, 0.7853982  ;;  %vm2575_vm13 = vcmp.lt.s32.totalorder %v5299_v8, 3 }
 0x16b   : > { %v2582_v35 = vsel %vm2576_vm11, %v2569_v11, 920167782  ;;  %v2589_v5 = vshll.u32 %v2549_v57, 8  ;;  %v5337_v32 = vadd.f32 %v5333_v49, %v4860_v53  ;;  %vm2574_vm14 = vcmp.lt.s32.totalorder %v5299_v8, 2 }
 0x16c   : > { %v943_v1 = vsub.s32 0, %v5318_v0  ;;  %v2583_v28 = vsel %vm2575_vm13, %v2566_v19, %v2582_v35  ;;  %v2585_v38 = vsel %vm2573_vm10, %v2563_v22, %v2566_v19  ;;  %v963_v39 = vsub.s32 4, %v939_v12 }
 0x16d   : > { %v2578_v36 = vsel %vm2576_vm11, %v2566_v19, 2102212464  ;;  %v2584_v6 = vsel %vm2574_vm14, %v2581_v43, %v2583_v28  ;;  %v2586_v47 = vsel %vm2576_vm11, %v2572_v24, 1326507024  ;;  %vm2321_vm15 = vweird.f32 %v4863_v58 }
 0x16e   : > { %vm2324_vm0 = vcmp.lt.s32.totalorder %v2323_v59, 2  ;;  %v4094_v53 = vmin.u32 %v943_v1, %v5318_v0  ;;  %v2557_v61 = vshrl.u32 %v4678_v10, %v2556_v40  ;;  %v2587_v34 = vsel %vm2575_vm13, %v2569_v11, %v2586_v47 }
 0x16f   : > { %v2588_v56 = vsel %vm2574_vm14, %v2585_v38, %v2587_v34  ;;  %v5354_v48 = vmul.u32.u64.low %v2589_v5, %v2584_v6  ;;  %v5355_v54 = vmul.u32.u64.high %v2589_v5, %v2584_v6, %v5354_v48  ;;  %v776_v46 = vand.u32 2139095040, %v5337_v32 }
 0x170   : > { %v945_v57 = vclz %v4094_v53  ;;  %v2577_v15 = vsel %vm2573_vm10, %v2557_v61, %v2560_v3  ;;  %v2579_v17 = vsel %vm2575_vm13, %v2563_v22, %v2578_v36  ;;  %v773_v40 = vand.u32 2147483647, %v5337_v32  ;;  %v5372_v22 = vpop.f32.mrb[6].mxu0 }
 0x171   : > { %v964_v21 = vsel %vm879_vm9, %v963_v39, %v939_v12  ;;  %v5366_v51 = vmul.u32.u64.low %v2589_v5, %v2588_v56  ;;  %v5367_v33 = vmul.u32.u64.high %v2589_v5, %v2588_v56, %v5366_v51  ;;  %v777_v44 = vshrl.u32 %v776_v46, 23 }
 0x172   : > { %v4489_v25 = vpop.eup %4488  ;;  %vm2325_vm1 = vcmp.eq.s32.totalorder %v2323_v59, 0  ;;  %vm2328_vm2 = vcmp.eq.s32.totalorder %v2323_v59, 2  ;;  %v4095_v26 = vadd.s32 4294967294, %v945_v57  ;;  %v2580_v31 = vsel %vm2574_vm14, %v2577_v15, %v2579_v17 }
 0x173   : > { %v4491_v37 = vpop.eup %4490  ;;  %v2329_v13 = vxor.u32 2147483648, %v4489_v25  ;;  %v2599_v9 = vadd.s32 1, %v5355_v54  ;;  %v4089_v3 = vadd.s32 4294967169, %v777_v44  ;;  %v933_v12 = vadd.s32 %v5265_v55, %v5274_v23 }
 0x174   : > { %v2326_v7 = vxor.u32 2147483648, %v4491_v37  ;;  %vm4096_vm3 = vcmp.lt.s32.totalorder %v4095_v26, 0  ;;  %v966_v30 = vsel %vm5325_vm12, 0, %v964_v21  ;;  %vm2598_vm4 = vc.u32 %v5367_v33, %v5354_v48 }
 0x175   : > { %v2330_v29 = vsel %vm2328_vm2, %v2329_v13, %v4491_v37  ;;  %v948_v11 = vsel %vm4096_vm3, 0, %v4095_v26  ;;  %v780_v8 = vand.u32 8388607, %v773_v40  ;;  %v2596_v1 = vmul.u32 %v2589_v5, %v2580_v31 }
 0x176   : > { %v2327_v19 = vsel %vm2325_vm1, %v4489_v25, %v2326_v7  ;;  %v949_v43 = vsub.s32 32, %v948_v11  ;;  %v953_v35 = vsub.s32 4294967266, %v948_v11  ;;  %v950_v23 = vshll.u32 %v5318_v0, %v948_v11 }
 0x177   : > { %v2331_v24 = vsel %vm2324_vm0, %v2327_v19, %v2330_v29  ;;  %v2600_v28 = vsel %vm2598_vm4, %v2599_v9, %v5355_v54  ;;  %v783_v38 = vadd.s32 1, %v4089_v3  ;;  %v970_v53 = vadd.s32 3, %v966_v30 }
 0x178   : > { %v2332_v55 = vsel %vm2321_vm15, nan, %v2331_v24  ;;  %v951_v36 = vshrl.u32 %v933_v12, %v949_v43  ;;  %v954_v6 = vadd.s32 127, %v953_v35  ;;  %v2601_v47 = vadd.s32 %v2600_v28, %v2596_v1 }
 0x179   : > { %v3916_v39 = vmul.f32 %v5153_v45, %v2332_v55  ;;  %v781_v59 = vor.u32 8388608, %v780_v8  ;;  %vm784_vm5 = vcmp.gt.s32.totalorder %v783_v38, 0  ;;  %v5390_v61 = vadd.f32 %v5333_v49, %v4866_v63 }
 0x17a   : > { %v952_v58 = vor.u32 %v951_v36, %v950_v23  ;;  %v955_v5 = vshll.u32 %v954_v6, 23  ;;  %v2602_v34 = vadd.s32 536870912, %v2601_v47  ;;  %v785_v0 = vsel %vm784_vm5, %v783_v38, 0 }
 0x17b   : > { %3948 = vst [vmem:[%s5175_s14 + $0x80] sm:$0xff] %v3916_v39  ;;  %v787_v56 = vand.u32 31, %v785_v0  ;;  %v5393_v57 = vand.u32 3, %v970_v53  ;;  %vm2543_vm6 = vcmp.lt.s32.totalorder %v5187_v52, 0  ;;  %v2437_v17 = vand.u32 2147483647, %v5390_v61 }
 0x17c   : > { %v956_v54 = vor.u32 4788187, %v955_v5  ;;  %v2603_v46 = vshrl.u32 %v2602_v34, 30  ;;  %v959_v21 = vcvt.s32.f32 %v952_v58  ;;  %v5397_v63 = vshll.u32 %v781_v59, 8 }
 0x17d   : > { %v788_v15 = vsub.s32 32, %v787_v56  ;;  %v2440_v26 = vand.u32 2139095040, %v5390_v61  ;;  %v790_v9 = vshll.u32 %v4678_v10, %v787_v56  ;;  %v786_v12 = vshrl.u32 %v785_v0, 5 }
 0x17e   : > { %v957_v25 = vand.u32 2147483647, %v956_v54  ;;  %v2604_v51 = vshll.u32 %v2603_v46, 30  ;;  %v2627_v29 = vsub.s32 4, %v2603_v46  ;;  %v793_v30 = vshll.u32 %v4679_v14, %v787_v56 }
 0x17f   : > { %v791_v44 = vshrl.u32 %v4679_v14, %v788_v15  ;;  %v794_v37 = vshrl.u32 %v4680_v16, %v788_v15  ;;  %v797_v13 = vshrl.u32 %v4681_v18, %v788_v15  ;;  %v800_v3 = vshrl.u32 %v4682_v20, %v788_v15 }
 0x180   : > { %v960_v7 = vmul.f32 %v959_v21, %v957_v25  ;;  %v5403_v31 = vsub.s32 %v2601_v47, %v2604_v51  ;;  %v796_v19 = vshll.u32 %v4680_v16, %v787_v56  ;;  %v799_v43 = vshll.u32 %v4681_v18, %v787_v56 }
 0x181   : > { %v792_v24 = vor.u32 %v791_v44, %v790_v9  ;;  %v795_v35 = vor.u32 %v794_v37, %v793_v30  ;;  %v802_v55 = vshll.u32 %v4682_v20, %v787_v56  ;;  %v803_v23 = vshrl.u32 %v4683_v27, %v788_v15  ;;  %v5435_v9 = vpop.f32.mrb[6].mxu1 }
 0x182   : > { %v961_v11 = vxor.u32 2147483648, %v960_v7  ;;  %v2607_v8 = vsub.s32 0, %v5403_v31  ;;  %v798_v1 = vor.u32 %v797_v13, %v796_v19  ;;  %vm5417_vm7 = vcmp.le.f32.partialorder %v2541_v60, 0.7853982 }
 0x183   : > { %v801_v36 = vor.u32 %v800_v3, %v799_v43  ;;  %v2441_v6 = vshrl.u32 %v2440_v26, 23  ;;  %v2628_v53 = vsel %vm2543_vm6, %v2627_v29, %v2603_v46  ;;  %v789_v59 = vshrl.u32 %v4678_v10, %v788_v15 }
 0x184   : > { %v962_v28 = vsel %vm879_vm9, %v961_v11, %v960_v7  ;;  %v4158_v39 = vmin.u32 %v2607_v8, %v5403_v31  ;;  %v804_v58 = vor.u32 %v803_v23, %v802_v55  ;;  %vm805_vm8 = vcmp.lt.s32.totalorder %v786_v12, 1 }
 0x185   : > { %v965_v47 = vsel %vm5325_vm12, %v5136_v42, %v962_v28  ;;  %vm808_vm9 = vcmp.lt.s32.totalorder %v786_v12, 4  ;;  %vm806_vm10 = vcmp.lt.s32.totalorder %v786_v12, 2  ;;  %v813_v34 = vsel %vm805_vm8, %v792_v24, %v795_v35 }
 0x186   : > { %4492 = vcosq.f32 %v965_v47  ;;  %v2609_v5 = vclz %v4158_v39  ;;  %v810_v60 = vsel %vm808_vm9, %v798_v1, 2102212464  ;;  %vm807_vm11 = vcmp.lt.s32.totalorder %v786_v12, 3 }
 0x187   : > { %4494 = vsinq.f32 %v965_v47  ;;  %v814_v56 = vsel %vm808_vm9, %v801_v36, 920167782  ;;  %v817_v54 = vsel %vm805_vm8, %v795_v35, %v798_v1  ;;  %v809_v2 = vsel %vm805_vm8, %v789_v59, %v792_v24 }
 0x188   : > { %v4159_v0 = vadd.s32 4294967294, %v2609_v5  ;;  %v815_v25 = vsel %vm807_vm11, %v798_v1, %v814_v56  ;;  %v818_v21 = vsel %vm808_vm9, %v804_v58, 1326507024  ;;  %v4153_v51 = vadd.s32 4294967169, %v2441_v6 }
 0x189   : > { %v811_v46 = vsel %vm807_vm11, %v795_v35, %v810_v60  ;;  %v816_v15 = vsel %vm806_vm10, %v813_v34, %v815_v25  ;;  %v819_v44 = vsel %vm807_vm11, %v801_v36, %v818_v21  ;;  %v2597_v3 = vadd.s32 %v5354_v48, %v5367_v33 }
 0x18a   : > { %vm4160_vm12 = vcmp.lt.s32.totalorder %v4159_v0, 0  ;;  %v820_v13 = vsel %vm806_vm10, %v817_v54, %v819_v44  ;;  %v5431_v26 = vmul.u32.u64.low %v5397_v63, %v816_v15  ;;  %v5432_v7 = vmul.u32.u64.high %v5397_v63, %v816_v15, %v5431_v26 }
 0x18b   : > { %v2612_v37 = vsel %vm4160_vm12, 0, %v4159_v0  ;;  %v2447_v19 = vadd.s32 1, %v4153_v51  ;;  %vm969_vm13 = vweird.f32 %v5136_v42  ;;  %v2630_v11 = vsel %vm5417_vm7, 0, %v2628_v53 }
 0x18c   : > { %v2613_v29 = vsub.s32 32, %v2612_v37  ;;  %v2617_v30 = vsub.s32 4294967266, %v2612_v37  ;;  %v812_v8 = vsel %vm806_vm10, %v809_v2, %v811_v46  ;;  %v2614_v35 = vshll.u32 %v5403_v31, %v2612_v37 }
 0x18d   : > { %v5444_v24 = vmul.u32.u64.low %v5397_v63, %v820_v13  ;;  %v5445_v43 = vmul.u32.u64.high %v5397_v63, %v820_v13, %v5444_v24  ;;  %vm2448_vm14 = vcmp.gt.s32.totalorder %v2447_v19, 0  ;;  %vm972_vm15 = vcmp.lt.s32.totalorder %v5393_v57, 2 }
 0x18e   : > { %v2615_v1 = vshrl.u32 %v2597_v3, %v2613_v29  ;;  %v2618_v55 = vadd.s32 127, %v2617_v30  ;;  %v831_v48 = vadd.s32 1, %v5432_v7  ;;  %v2444_v33 = vand.u32 8388607, %v2437_v17 }
 0x18f   : > { %v2449_v23 = vsel %vm2448_vm14, %v2447_v19, 0  ;;  %v2634_v36 = vadd.s32 3, %v2630_v11  ;;  %vm973_vm0 = vcmp.eq.s32.totalorder %v5393_v57, 0  ;;  %v828_v53 = vmul.u32 %v5397_v63, %v812_v8 }
 0x190   : > { %v4493_v28 = vpop.eup %4492  ;;  %v2616_v12 = vor.u32 %v2615_v1, %v2614_v35  ;;  %v2619_v39 = vshll.u32 %v2618_v55, 23  ;;  %v2451_v6 = vand.u32 31, %v2449_v23  ;;  %vm830_vm1 = vc.u32 %v5445_v43, %v5431_v26 }
 0x191   : > { %v4495_v47 = vpop.eup %4494  ;;  %v977_v31 = vxor.u32 2147483648, %v4493_v28  ;;  %vm976_vm2 = vcmp.eq.s32.totalorder %v5393_v57, 2  ;;  %v832_v5 = vsel %vm830_vm1, %v831_v48, %v5432_v7  ;;  %v2445_v0 = vor.u32 8388608, %v2444_v33 }
 0x192   : > { %v974_v59 = vxor.u32 2147483648, %v4495_v47  ;;  %v2620_v58 = vor.u32 4788187, %v2619_v39  ;;  %v833_v34 = vadd.s32 %v832_v5, %v828_v53  ;;  %v2452_v56 = vsub.s32 32, %v2451_v6 }
 0x193   : > { %v978_v60 = vsel %vm976_vm2, %v977_v31, %v4495_v47  ;;  %v2623_v25 = vcvt.s32.f32 %v2616_v12  ;;  %v5458_v21 = vand.u32 3, %v2634_v36  ;;  %v5462_v46 = vshrl.u32 %v2449_v23, 5 }
 0x194   : > { %v975_v54 = vsel %vm973_vm0, %v4493_v28, %v974_v59  ;;  %v2621_v2 = vand.u32 2147483647, %v2620_v58  ;;  %v834_v51 = vadd.s32 536870912, %v833_v34  ;;  %v2455_v15 = vshrl.u32 %v4679_v14, %v2452_v56 }
 0x195   : > { %v979_v63 = vsel %vm972_vm15, %v975_v54, %v978_v60  ;;  %vm775_vm3 = vcmp.lt.s32.totalorder %v5337_v32, 0  ;;  %v2458_v13 = vshrl.u32 %v4680_v16, %v2452_v56  ;;  %v2461_v7 = vshrl.u32 %v4681_v18, %v2452_v56 }
 0x196   : > { %v980_v44 = vsel %vm969_vm13, nan, %v979_v63  ;;  %v2624_v37 = vmul.f32 %v2623_v25, %v2621_v2  ;;  %v835_v57 = vshrl.u32 %v834_v51, 30  ;;  %v2454_v29 = vshll.u32 %v4678_v10, %v2451_v6 }
 0x197   : > { %v3903_v3 = vmul.f32 %v5153_v45, %v980_v44  ;;  %v2457_v30 = vshll.u32 %v4679_v14, %v2451_v6  ;;  %v2460_v11 = vshll.u32 %v4680_v16, %v2451_v6  ;;  %v2463_v42 = vshll.u32 %v4681_v18, %v2451_v6 }
 0x198   : > { %v2625_v19 = vxor.u32 2147483648, %v2624_v37  ;;  %v2464_v8 = vshrl.u32 %v4682_v20, %v2452_v56  ;;  %v836_v24 = vshll.u32 %v835_v57, 30  ;;  %v2456_v35 = vor.u32 %v2455_v15, %v2454_v29 }
 0x199   : > { %3935 = vst [vmem:[%s5175_s14 + $0x18] sm:$0xff] %v3903_v3  ;;  %v2459_v1 = vor.u32 %v2458_v13, %v2457_v30  ;;  %v2467_v55 = vshrl.u32 %v4683_v27, %v2452_v56  ;;  %v2462_v33 = vor.u32 %v2461_v7, %v2460_v11  ;;  %v2466_v28 = vshll.u32 %v4682_v20, %v2451_v6 }
 0x19a   : > { %v2626_v48 = vsel %vm2543_vm6, %v2625_v19, %v2624_v37  ;;  %v2465_v23 = vor.u32 %v2464_v8, %v2463_v42  ;;  %v5484_v39 = vsub.s32 %v833_v34, %v836_v24  ;;  %v859_v36 = vsub.s32 4, %v835_v57 }
 0x19b   : > { %v2629_v12 = vsel %vm5417_vm7, %v5187_v52, %v2626_v48  ;;  %v5486_v47 = vshll.u32 %v2445_v0, 8  ;;  %v2453_v31 = vshrl.u32 %v4678_v10, %v2452_v56  ;;  %v2468_v53 = vor.u32 %v2467_v55, %v2466_v28 }
 0x19c   : > { %4496 = vcosq.f32 %v2629_v12  ;;  %v5491_v59 = vadd.f32 %v5333_v49, %v4946_v62  ;;  %v839_v6 = vsub.s32 0, %v5484_v39  ;;  %vm2469_vm4 = vcmp.lt.s32.totalorder %v5462_v46, 1 }
 0x19d   : > { %4498 = vsinq.f32 %v2629_v12  ;;  %vm2472_vm5 = vcmp.lt.s32.totalorder %v5462_v46, 4  ;;  %vm2471_vm6 = vcmp.lt.s32.totalorder %v5462_v46, 3  ;;  %v2477_v58 = vsel %vm2469_vm4, %v2456_v35, %v2459_v1 }
 0x19e   : > { %v2474_v38 = vsel %vm2472_vm5, %v2462_v33, 2102212464  ;;  %v2478_v5 = vsel %vm2472_vm5, %v2465_v23, 920167782  ;;  %v4090_v60 = vmin.u32 %v839_v6, %v5484_v39  ;;  %v860_v62 = vsel %vm775_vm3, %v859_v36, %v835_v57 }
 0x19f   : > { %vm2470_vm7 = vcmp.lt.s32.totalorder %v5462_v46, 2  ;;  %v2479_v34 = vsel %vm2471_vm6, %v2462_v33, %v2478_v5  ;;  %v2481_v56 = vsel %vm2469_vm4, %v2459_v1, %v2462_v33  ;;  %v2482_v54 = vsel %vm2472_vm5, %v2468_v53, 1326507024  ;;  %v5549_v53 = vpop.f32.mrb[7].mxu0 }
 0x1a0   : > { %v2480_v0 = vsel %vm2470_vm7, %v2477_v58, %v2479_v34  ;;  %v1088_v2 = vand.u32 2139095040, %v5491_v59  ;;  %vm5512_vm8 = vcmp.le.f32.partialorder %v773_v40, 0.7853982  ;;  %v841_v63 = vclz %v4090_v60 }
 0x1a1   : > { %v2473_v51 = vsel %vm2469_vm4, %v2453_v31, %v2456_v35  ;;  %v2475_v15 = vsel %vm2471_vm6, %v2459_v1, %v2474_v38  ;;  %vm2636_vm9 = vcmp.lt.s32.totalorder %v5458_v21, 2  ;;  %v2483_v44 = vsel %vm2471_vm6, %v2465_v23, %v2482_v54 }
 0x1a2   : > { %v5524_v37 = vmul.u32.u64.low %v5486_v47, %v2480_v0  ;;  %v5525_v13 = vmul.u32.u64.high %v5486_v47, %v2480_v0, %v5524_v37  ;;  %vm2633_vm10 = vweird.f32 %v5187_v52  ;;  %v4091_v40 = vadd.s32 4294967294, %v841_v63 }
 0x1a3   : > { %v862_v7 = vsel %vm5512_vm8, 0, %v860_v62  ;;  %v2484_v3 = vsel %vm2470_vm7, %v2481_v56, %v2483_v44  ;;  %v1089_v57 = vshrl.u32 %v1088_v2, 23  ;;  %vm2637_vm11 = vcmp.eq.s32.totalorder %v5458_v21, 0 }
 0x1a4   : > { %v2476_v29 = vsel %vm2470_vm7, %v2473_v51, %v2475_v15  ;;  %v5537_v30 = vmul.u32.u64.low %v5486_v47, %v2484_v3  ;;  %v5538_v19 = vmul.u32.u64.high %v5486_v47, %v2484_v3, %v5537_v30  ;;  %vm2640_vm12 = vcmp.eq.s32.totalorder %v5458_v21, 2 }
 0x1a5   : > { %vm4092_vm13 = vcmp.lt.s32.totalorder %v4091_v40, 0  ;;  %v1085_v11 = vand.u32 2147483647, %v5491_v59  ;;  %v4101_v42 = vadd.s32 4294967169, %v1089_v57  ;;  %v829_v24 = vadd.s32 %v5431_v26, %v5445_v43 }
 0x1a6   : > { %v4497_v8 = vpop.eup %4496  ;;  %v844_v35 = vsel %vm4092_vm13, 0, %v4091_v40  ;;  %v866_v1 = vadd.s32 3, %v862_v7  ;;  %v2495_v55 = vadd.s32 1, %v5525_v13  ;;  %v2492_v28 = vmul.u32 %v5486_v47, %v2476_v29 }
 0x1a7   : > { %v4499_v46 = vpop.eup %4498  ;;  %v2641_v48 = vxor.u32 2147483648, %v4497_v8  ;;  %v845_v33 = vsub.s32 32, %v844_v35  ;;  %v849_v23 = vsub.s32 4294967266, %v844_v35  ;;  %v846_v36 = vshll.u32 %v5484_v39, %v844_v35 }
 0x1a8   : > { %v2638_v12 = vxor.u32 2147483648, %v4499_v46  ;;  %vm2494_vm14 = vc.u32 %v5538_v19, %v5524_v37  ;;  %v1095_v31 = vadd.s32 1, %v4101_v42  ;;  %v1092_v39 = vand.u32 8388607, %v1085_v11 }
 0x1a9   : > { %v2642_v26 = vsel %vm2640_vm12, %v2641_v48, %v4499_v46  ;;  %v847_v43 = vshrl.u32 %v829_v24, %v845_v33  ;;  %v850_v6 = vadd.s32 127, %v849_v23  ;;  %v2496_v38 = vsel %vm2494_vm14, %v2495_v55, %v5525_v13 }
 0x1aa   : > { %v2639_v58 = vsel %vm2637_vm11, %v4497_v8, %v2638_v12  ;;  %v2497_v47 = vadd.s32 %v2496_v38, %v2492_v28  ;;  %vm1096_vm15 = vcmp.gt.s32.totalorder %v1095_v31, 0  ;;  %v5564_v2 = vadd.f32 %v5333_v49, %v5046_v4 }
 0x1ab   : > { %v2643_v5 = vsel %vm2636_vm9, %v2639_v58, %v2642_v26  ;;  %v848_v60 = vor.u32 %v847_v43, %v846_v36  ;;  %v851_v62 = vshll.u32 %v850_v6, 23  ;;  %v1097_v34 = vsel %vm1096_vm15, %v1095_v31, 0 }
 0x1ac   : > { %v2644_v0 = vsel %vm2633_vm10, nan, %v2643_v5  ;;  %v2498_v56 = vadd.s32 536870912, %v2497_v47  ;;  %v1099_v54 = vand.u32 31, %v1097_v34  ;;  %v5570_v40 = vand.u32 3, %v866_v1 }
 0x1ad   : > { %v3919_v63 = vmul.f32 %v5153_v45, %v2644_v0  ;;  %v852_v51 = vor.u32 4788187, %v851_v62  ;;  %v855_v13 = vcvt.s32.f32 %v848_v60  ;;  %v1093_v7 = vor.u32 8388608, %v1092_v39 }
 0x1ae   : > { %v5567_v15 = vshrl.u32 %v2498_v56, 30  ;;  %v1100_v44 = vsub.s32 32, %v1099_v54  ;;  %v1102_v3 = vshll.u32 %v4678_v10, %v1099_v54  ;;  %v2752_v4 = vand.u32 2139095040, %v5564_v2 }
 0x1af   : > { %3951 = vst [vmem:[%s5175_s14 + $0x98] sm:$0xff] %v3919_v63  ;;  %v853_v21 = vand.u32 2147483647, %v852_v51  ;;  %v1105_v24 = vshll.u32 %v4679_v14, %v1099_v54  ;;  %v1108_v35 = vshll.u32 %v4680_v16, %v1099_v54  ;;  %v1098_v46 = vshrl.u32 %v1097_v34, 5 }
 0x1b0   : > { %v2500_v52 = vshll.u32 %v5567_v15, 30  ;;  %v1103_v57 = vshrl.u32 %v4679_v14, %v1100_v44  ;;  %v1106_v45 = vshrl.u32 %v4680_v16, %v1100_v44  ;;  %v1109_v30 = vshrl.u32 %v4681_v18, %v1100_v44 }
 0x1b1   : > { %v856_v29 = vmul.f32 %v855_v13, %v853_v21  ;;  %v1112_v42 = vshrl.u32 %v4682_v20, %v1100_v44  ;;  %v1115_v1 = vshrl.u32 %v4683_v27, %v1100_v44  ;;  %v1111_v48 = vshll.u32 %v4681_v18, %v1099_v54 }
 0x1b2   : > { %v5579_v8 = vsub.s32 %v2497_v47, %v2500_v52  ;;  %v1114_v33 = vshll.u32 %v4682_v20, %v1099_v54  ;;  %v1104_v28 = vor.u32 %v1103_v57, %v1102_v3  ;;  %v1107_v12 = vor.u32 %v1106_v45, %v1105_v24 }
 0x1b3   : > { %v857_v55 = vxor.u32 2147483648, %v856_v29  ;;  %v1110_v36 = vor.u32 %v1109_v30, %v1108_v35  ;;  %v2493_v26 = vadd.s32 %v5524_v37, %v5538_v19  ;;  %v1113_v43 = vor.u32 %v1112_v42, %v1111_v48 }
 0x1b4   : > { %v2503_v23 = vsub.s32 0, %v5579_v8  ;;  %v1133_v6 = vshll.u32 %v1093_v7, 8  ;;  %v1116_v47 = vor.u32 %v1115_v1, %v1114_v33  ;;  %v2753_v39 = vshrl.u32 %v2752_v4, 23 }
 0x1b5   : > { %v858_v31 = vsel %vm775_vm3, %v857_v55, %v856_v29  ;;  %v1101_v5 = vshrl.u32 %v4678_v10, %v1100_v44  ;;  %vm1117_vm0 = vcmp.lt.s32.totalorder %v1098_v46, 1  ;;  %vm1120_vm1 = vcmp.lt.s32.totalorder %v1098_v46, 4  ;;  %v5597_v44 = vpop.f32.mrb[7].mxu1 }
 0x1b6   : > { %v861_v38 = vsel %vm5512_vm8, %v5337_v32, %v858_v31  ;;  %v4154_v58 = vmin.u32 %v2503_v23, %v5579_v8  ;;  %v1122_v62 = vsel %vm1120_vm1, %v1110_v36, 2102212464  ;;  %v1125_v34 = vsel %vm1117_vm0, %v1104_v28, %v1107_v12 }
 0x1b7   : > { %4500 = vcosq.f32 %v861_v38  ;;  %vm1118_vm2 = vcmp.lt.s32.totalorder %v1098_v46, 2  ;;  %vm1119_vm3 = vcmp.lt.s32.totalorder %v1098_v46, 3  ;;  %v1126_v37 = vsel %vm1120_vm1, %v1113_v43, 920167782 }
 0x1b8   : > { %4502 = vsinq.f32 %v861_v38  ;;  %v2505_v60 = vclz %v4154_v58  ;;  %v1129_v19 = vsel %vm1117_vm0, %v1107_v12, %v1110_v36  ;;  %v1121_v25 = vsel %vm1117_vm0, %v1101_v5, %v1104_v28 }
 0x1b9   : > { %v1127_v56 = vsel %vm1119_vm3, %v1110_v36, %v1126_v37  ;;  %v1130_v54 = vsel %vm1120_vm1, %v1116_v47, 1326507024  ;;  %v1123_v63 = vsel %vm1119_vm3, %v1107_v12, %v1122_v62  ;;  %v4165_v13 = vadd.s32 4294967169, %v2753_v39 }
 0x1ba   : > { %v4155_v0 = vadd.s32 4294967294, %v2505_v60  ;;  %v1128_v51 = vsel %vm1118_vm2, %v1125_v34, %v1127_v56  ;;  %v1131_v21 = vsel %vm1119_vm3, %v1113_v43, %v1130_v54  ;;  %v2523_v4 = vsub.s32 4, %v5567_v15 }
 0x1bb   : > { %v1132_v7 = vsel %vm1118_vm2, %v1129_v19, %v1131_v21  ;;  %v5600_v52 = vmul.u32.u64.low %v1133_v6, %v1128_v51  ;;  %v5601_v3 = vmul.u32.u64.high %v1133_v6, %v1128_v51, %v5600_v52  ;;  %v1124_v24 = vsel %vm1118_vm2, %v1121_v25, %v1123_v63  ;;  %v5637_v51 = vld [vmem:[%s7611_s3] ss:$0 sm:$0xff] }
 0x1bc   : > { %vm4156_vm4 = vcmp.lt.s32.totalorder %v4155_v0, 0  ;;  %v5605_v29 = vmul.u32.u64.low %v1133_v6, %v1132_v7  ;;  %v5606_v45 = vmul.u32.u64.high %v1133_v6, %v1132_v7, %v5605_v29  ;;  %v2759_v35 = vadd.s32 1, %v4165_v13 }
 0x1bd   : > { %v2508_v57 = vsel %vm4156_vm4, 0, %v4155_v0  ;;  %vm869_vm5 = vcmp.eq.s32.totalorder %v5570_v40, 0  ;;  %vm5612_vm6 = vcmp.le.f32.partialorder %v2437_v17, 0.7853982  ;;  %vm2439_vm7 = vcmp.lt.s32.totalorder %v5390_v61, 0 }
 0x1be   : > { %v2509_v30 = vsub.s32 32, %v2508_v57  ;;  %v2513_v42 = vsub.s32 4294967266, %v2508_v57  ;;  %v2510_v55 = vshll.u32 %v5579_v8, %v2508_v57  ;;  %v1143_v23 = vadd.s32 1, %v5601_v3 }
 0x1bf   : > { %vm2760_vm8 = vcmp.gt.s32.totalorder %v2759_v35, 0  ;;  %v2524_v28 = vsel %vm2439_vm7, %v2523_v4, %v5567_v15  ;;  %v1140_v12 = vmul.u32 %v1133_v6, %v1124_v24  ;;  %vm1142_vm9 = vc.u32 %v5606_v45, %v5600_v52 }
 0x1c0   : > { %v2511_v48 = vshrl.u32 %v2493_v26, %v2509_v30  ;;  %v2514_v33 = vadd.s32 127, %v2513_v42  ;;  %v2761_v17 = vsel %vm2760_vm8, %v2759_v35, 0  ;;  %v1144_v8 = vsel %vm1142_vm9, %v1143_v23, %v5601_v3 }
 0x1c1   : > { %v4501_v46 = vpop.eup %4500  ;;  %vm872_vm10 = vcmp.eq.s32.totalorder %v5570_v40, 2  ;;  %v1145_v58 = vadd.s32 %v1144_v8, %v1140_v12  ;;  %v2763_v47 = vand.u32 31, %v2761_v17  ;;  %v2526_v15 = vsel %vm5612_vm6, 0, %v2524_v28 }
 0x1c2   : > { %v4503_v36 = vpop.eup %4502  ;;  %v873_v31 = vxor.u32 2147483648, %v4501_v46  ;;  %v2512_v43 = vor.u32 %v2511_v48, %v2510_v55  ;;  %v2515_v38 = vshll.u32 %v2514_v33, 23  ;;  %v2749_v6 = vand.u32 2147483647, %v5564_v2 }
 0x1c3   : > { %v870_v26 = vxor.u32 2147483648, %v4503_v36  ;;  %vm868_vm11 = vcmp.lt.s32.totalorder %v5570_v40, 2  ;;  %v1146_v62 = vadd.s32 536870912, %v1145_v58  ;;  %v2764_v34 = vsub.s32 32, %v2763_v47 }
 0x1c4   : > { %v874_v39 = vsel %vm872_vm10, %v873_v31, %v4503_v36  ;;  %v2516_v5 = vor.u32 4788187, %v2515_v38  ;;  %vm865_vm12 = vweird.f32 %v5337_v32  ;;  %v2519_v0 = vcvt.s32.f32 %v2512_v43 }
 0x1c5   : > { %v871_v60 = vsel %vm869_vm5, %v4501_v46, %v870_v26  ;;  %v2530_v56 = vadd.s32 3, %v2526_v15  ;;  %v1147_v54 = vshrl.u32 %v1146_v62, 30  ;;  %v2767_v63 = vshrl.u32 %v4679_v14, %v2764_v34 }
 0x1c6   : > { %v875_v37 = vsel %vm868_vm11, %v871_v60, %v874_v39  ;;  %v2517_v19 = vand.u32 2147483647, %v2516_v5  ;;  %v2756_v32 = vand.u32 8388607, %v2749_v6  ;;  %v2770_v13 = vshrl.u32 %v4680_v16, %v2764_v34 }
 0x1c7   : > { %v876_v25 = vsel %vm865_vm12, nan, %v875_v37  ;;  %v1148_v7 = vshll.u32 %v1147_v54, 30  ;;  %v5643_v3 = vshrl.u32 %v2761_v17, 5  ;;  %v2766_v57 = vshll.u32 %v4678_v10, %v2763_v47 }
 0x1c8   : > { %v3902_v40 = vmul.f32 %v5637_v51, %v876_v25  ;;  %v2520_v21 = vmul.f32 %v2519_v0, %v2517_v19  ;;  %v2773_v4 = vshrl.u32 %v4681_v18, %v2764_v34  ;;  %v2769_v30 = vshll.u32 %v4679_v14, %v2763_v47 }
 0x1c9   : > { %v2775_v42 = vshll.u32 %v4681_v18, %v2763_v47  ;;  %v2776_v24 = vshrl.u32 %v4682_v20, %v2764_v34  ;;  %v5651_v35 = vsub.s32 %v1145_v58, %v1148_v7  ;;  %v2768_v55 = vor.u32 %v2767_v63, %v2766_v57 }
 0x1ca   : > { %3934 = vst [vmem:[%s5175_s14 + $0x10] sm:$0xff] %v3902_v40  ;;  %v2521_v29 = vxor.u32 2147483648, %v2520_v21  ;;  %v2772_v48 = vshll.u32 %v4680_v16, %v2763_v47  ;;  %v2779_v33 = vshrl.u32 %v4683_v27, %v2764_v34  ;;  %vm1087_vm13 = vcmp.lt.s32.totalorder %v5491_v59, 0 }
 0x1cb   : > { %v2771_v46 = vor.u32 %v2770_v13, %v2769_v30  ;;  %v2777_v28 = vor.u32 %v2776_v24, %v2775_v42  ;;  %v2778_v12 = vshll.u32 %v4682_v20, %v2763_v47  ;;  %v5662_v36 = vand.u32 3, %v2530_v56 }
 0x1cc   : > { %v2522_v23 = vsel %vm2439_vm7, %v2521_v29, %v2520_v21  ;;  %v1151_v31 = vsub.s32 0, %v5651_v35  ;;  %v2774_v43 = vor.u32 %v2773_v4, %v2772_v48  ;;  %v2757_v38 = vor.u32 8388608, %v2756_v32 }
 0x1cd   : > { %v2525_v17 = vsel %vm5612_vm6, %v5390_v61, %v2522_v23  ;;  %v2780_v8 = vor.u32 %v2779_v33, %v2778_v12  ;;  %v5667_v26 = vadd.f32 %v5333_v49, %v5167_v50  ;;  %vm5671_vm14 = vcmp.le.f32.partialorder %v1085_v11, 0.7853982 }
 0x1ce   : > { %4504 = vcosq.f32 %v2525_v17  ;;  %v4102_v1 = vmin.u32 %v1151_v31, %v5651_v35  ;;  %vm2781_vm15 = vcmp.lt.s32.totalorder %v5643_v3, 1  ;;  %vm2784_vm0 = vcmp.lt.s32.totalorder %v5643_v3, 4 }
 0x1cf   : > { %4506 = vsinq.f32 %v2525_v17  ;;  %v1171_v47 = vsub.s32 4, %v1147_v54  ;;  %v2765_v39 = vshrl.u32 %v4678_v10, %v2764_v34  ;;  %v2789_v5 = vsel %vm2781_vm15, %v2768_v55, %v2771_v46 }
 0x1d0   : > { %v2790_v15 = vsel %vm2784_vm0, %v2777_v28, 920167782  ;;  %v1153_v50 = vclz %v4102_v1  ;;  %vm2783_vm1 = vcmp.lt.s32.totalorder %v5643_v3, 3  ;;  %v2786_v60 = vsel %vm2784_vm0, %v2774_v43, 2102212464 }
 0x1d1   : > { %v2793_v62 = vsel %vm2781_vm15, %v2771_v46, %v2774_v43  ;;  %vm2782_vm2 = vcmp.lt.s32.totalorder %v5643_v3, 2  ;;  %v2791_v11 = vsel %vm2783_vm1, %v2774_v43, %v2790_v15  ;;  %v2794_v37 = vsel %vm2784_vm0, %v2780_v8, 1326507024 }
 0x1d2   : > { %v2797_v19 = vshll.u32 %v2757_v38, 8  ;;  %v4103_v0 = vadd.s32 4294967294, %v1153_v50  ;;  %v2785_v25 = vsel %vm2781_vm15, %v2765_v39, %v2768_v55  ;;  %v2792_v56 = vsel %vm2782_vm2, %v2789_v5, %v2791_v11  ;;  %v5718_v50 = vpop.f32.mrb[8].mxu0 }
 0x1d3   : > { %v2795_v63 = vsel %vm2783_vm1, %v2777_v28, %v2794_v37  ;;  %vm2532_vm3 = vcmp.lt.s32.totalorder %v5662_v36, 2  ;;  %v2787_v34 = vsel %vm2783_vm1, %v2771_v46, %v2786_v60  ;;  %v1172_v13 = vsel %vm1087_vm13, %v1171_v47, %v1147_v54 }
 0x1d4   : > { %v2796_v40 = vsel %vm2782_vm2, %v2793_v62, %v2795_v63  ;;  %v5686_v21 = vmul.u32.u64.low %v2797_v19, %v2792_v56  ;;  %v5687_v32 = vmul.u32.u64.high %v2797_v19, %v2792_v56, %v5686_v21  ;;  %vm4104_vm4 = vcmp.lt.s32.totalorder %v4103_v0, 0 }
 0x1d5   : > { %v5692_v7 = vmul.u32.u64.low %v2797_v19, %v2796_v40  ;;  %v5693_v57 = vmul.u32.u64.high %v2797_v19, %v2796_v40, %v5692_v7  ;;  %vm2533_vm5 = vcmp.eq.s32.totalorder %v5662_v36, 0  ;;  %vm2536_vm6 = vcmp.eq.s32.totalorder %v5662_v36, 2 }
 0x1d6   : > { %v1156_v4 = vsel %vm4104_vm4, 0, %v4103_v0  ;;  %v984_v29 = vand.u32 2139095040, %v5667_v26  ;;  %v1141_v30 = vadd.s32 %v5600_v52, %v5606_v45  ;;  %v2788_v55 = vsel %vm2782_vm2, %v2785_v25, %v2787_v34 }
 0x1d7   : > { %v1157_v42 = vsub.s32 32, %v1156_v4  ;;  %v1161_v24 = vsub.s32 4294967266, %v1156_v4  ;;  %v1174_v54 = vsel %vm5671_vm14, 0, %v1172_v13  ;;  %v2807_v33 = vadd.s32 1, %v5687_v32 }
 0x1d8   : > { %v4505_v48 = vpop.eup %4504  ;;  %v981_v23 = vand.u32 2147483647, %v5667_v26  ;;  %v985_v46 = vshrl.u32 %v984_v29, 23  ;;  %v1158_v17 = vshll.u32 %v5651_v35, %v1156_v4  ;;  %v2804_v43 = vmul.u32 %v2797_v19, %v2788_v55 }
 0x1d9   : > { %v4507_v28 = vpop.eup %4506  ;;  %v2537_v12 = vxor.u32 2147483648, %v4505_v48  ;;  %v1159_v31 = vshrl.u32 %v1141_v30, %v1157_v42  ;;  %v1162_v52 = vadd.s32 127, %v1161_v24  ;;  %vm2806_vm7 = vc.u32 %v5693_v57, %v5686_v21 }
 0x1da   : > { %v2534_v45 = vxor.u32 2147483648, %v4507_v28  ;;  %v4097_v3 = vadd.s32 4294967169, %v985_v46  ;;  %v2808_v47 = vsel %vm2806_vm7, %v2807_v33, %v5687_v32  ;;  %v5716_v15 = vadd.f32 %v5333_v49, %v5276_v41 }
 0x1db   : > { %v2538_v38 = vsel %vm2536_vm6, %v2537_v12, %v4507_v28  ;;  %v1160_v8 = vor.u32 %v1159_v31, %v1158_v17  ;;  %v1163_v1 = vshll.u32 %v1162_v52, 23  ;;  %v2809_v5 = vadd.s32 %v2808_v47, %v2804_v43 }
 0x1dc   : > { %v2535_v39 = vsel %vm2533_vm5, %v4505_v48, %v2534_v45  ;;  %v991_v35 = vadd.s32 1, %v4097_v3  ;;  %vm2529_vm8 = vweird.f32 %v5390_v61  ;;  %v1178_v11 = vadd.s32 3, %v1174_v54 }
 0x1dd   : > { %v2539_v60 = vsel %vm2532_vm3, %v2535_v39, %v2538_v38  ;;  %v1164_v62 = vor.u32 4788187, %v1163_v1  ;;  %v2810_v19 = vadd.s32 536870912, %v2809_v5  ;;  %v988_v0 = vand.u32 8388607, %v981_v23 }
 0x1de   : > { %v2540_v37 = vsel %vm2529_vm8, nan, %v2539_v60  ;;  %vm992_vm9 = vcmp.gt.s32.totalorder %v991_v35, 0  ;;  %v1167_v49 = vcvt.s32.f32 %v1160_v8  ;;  %v2648_v61 = vand.u32 2139095040, %v5716_v15 }
 0x1df   : > { %v3918_v25 = vmul.f32 %v5637_v51, %v2540_v37  ;;  %v1165_v41 = vand.u32 2147483647, %v1164_v62  ;;  %v993_v56 = vsel %vm992_vm9, %v991_v35, 0  ;;  %v5726_v63 = vshrl.u32 %v2810_v19, 30 }
 0x1e0   : > { %v995_v34 = vand.u32 31, %v993_v56  ;;  %v5731_v7 = vand.u32 3, %v1178_v11  ;;  %v989_v4 = vor.u32 8388608, %v988_v0  ;;  %v2645_v29 = vand.u32 2147483647, %v5716_v15 }
 0x1e1   : > { %3950 = vst [vmem:[%s5175_s14 + $0x90] sm:$0xff] %v3918_v25  ;;  %v1168_v36 = vmul.f32 %v1167_v49, %v1165_v41  ;;  %v2812_v40 = vshll.u32 %v5726_v63, 30  ;;  %v994_v42 = vshrl.u32 %v993_v56, 5  ;;  %v2649_v55 = vshrl.u32 %v2648_v61, 23 }
 0x1e2   : > { %v996_v32 = vsub.s32 32, %v995_v34  ;;  %v998_v54 = vshll.u32 %v4678_v10, %v995_v34  ;;  %v1001_v17 = vshll.u32 %v4679_v14, %v995_v34  ;;  %v1004_v31 = vshll.u32 %v4680_v16, %v995_v34 }
 0x1e3   : > { %v1169_v13 = vxor.u32 2147483648, %v1168_v36  ;;  %v5734_v30 = vsub.s32 %v2809_v5, %v2812_v40  ;;  %v1007_v45 = vshll.u32 %v4681_v18, %v995_v34  ;;  %v1010_v58 = vshll.u32 %v4682_v20, %v995_v34  ;;  %v5760_v34 = vpop.f32.mrb[8].mxu1 }
 0x1e4   : > { %v999_v24 = vshrl.u32 %v4679_v14, %v996_v32  ;;  %v1002_v33 = vshrl.u32 %v4680_v16, %v996_v32  ;;  %v1005_v46 = vshrl.u32 %v4681_v18, %v996_v32  ;;  %v1008_v43 = vshrl.u32 %v4682_v20, %v996_v32 }
 0x1e5   : > { %v1170_v48 = vsel %vm1087_vm13, %v1169_v13, %v1168_v36  ;;  %v2815_v12 = vsub.s32 0, %v5734_v30  ;;  %v1011_v47 = vshrl.u32 %v4683_v27, %v996_v32  ;;  %v5753_v39 = vshll.u32 %v989_v4, 8 }
 0x1e6   : > { %v1173_v28 = vsel %vm5671_vm14, %v5491_v59, %v1170_v48  ;;  %v1000_v52 = vor.u32 %v999_v24, %v998_v54  ;;  %v1003_v38 = vor.u32 %v1002_v33, %v1001_v17  ;;  %v1006_v8 = vor.u32 %v1005_v46, %v1004_v31 }
 0x1e7   : > { %4508 = vcosq.f32 %v1173_v28  ;;  %v4166_v3 = vmin.u32 %v2815_v12, %v5734_v30  ;;  %v1009_v1 = vor.u32 %v1008_v43, %v1007_v45  ;;  %v997_v35 = vshrl.u32 %v4678_v10, %v996_v32 }
 0x1e8   : > { %4510 = vsinq.f32 %v1173_v28  ;;  %vm1013_vm10 = vcmp.lt.s32.totalorder %v994_v42, 1  ;;  %v4161_v60 = vadd.s32 4294967169, %v2649_v55  ;;  %vm1184_vm11 = vcmp.eq.s32.totalorder %v5731_v7, 2 }
 0x1e9   : > { %v2817_v5 = vclz %v4166_v3  ;;  %v1012_v62 = vor.u32 %v1011_v47, %v1010_v58  ;;  %vm1014_vm12 = vcmp.lt.s32.totalorder %v994_v42, 2  ;;  %vm1015_vm13 = vcmp.lt.s32.totalorder %v994_v42, 3 }
 0x1ea   : > { %vm1016_vm14 = vcmp.lt.s32.totalorder %v994_v42, 4  ;;  %vm1181_vm15 = vcmp.eq.s32.totalorder %v5731_v7, 0  ;;  %v1021_v19 = vsel %vm1013_vm10, %v1000_v52, %v1003_v38  ;;  %vm2751_vm0 = vcmp.lt.s32.totalorder %v5564_v2, 0 }
 0x1eb   : > { %v4167_v11 = vadd.s32 4294967294, %v2817_v5  ;;  %v1018_v37 = vsel %vm1016_vm14, %v1006_v8, 2102212464  ;;  %v1022_v0 = vsel %vm1016_vm14, %v1009_v1, 920167782  ;;  %v1017_v25 = vsel %vm1013_vm10, %v997_v35, %v1000_v52 }
 0x1ec   : > { %v1023_v41 = vsel %vm1015_vm13, %v1006_v8, %v1022_v0  ;;  %v1025_v49 = vsel %vm1013_vm10, %v1003_v38, %v1006_v8  ;;  %v1026_v56 = vsel %vm1016_vm14, %v1012_v62, 1326507024  ;;  %vm1177_vm1 = vweird.f32 %v5491_v59 }
 0x1ed   : > { %vm4168_vm2 = vcmp.lt.s32.totalorder %v4167_v11, 0  ;;  %v1019_v61 = vsel %vm1015_vm13, %v1003_v38, %v1018_v37  ;;  %v1024_v36 = vsel %vm1014_vm12, %v1021_v19, %v1023_v41  ;;  %v1027_v40 = vsel %vm1015_vm13, %v1009_v1, %v1026_v56 }
 0x1ee   : > { %v2820_v32 = vsel %vm4168_vm2, 0, %v4167_v11  ;;  %v1028_v13 = vsel %vm1014_vm12, %v1025_v49, %v1027_v40  ;;  %v5768_v4 = vmul.u32.u64.low %v5753_v39, %v1024_v36  ;;  %v5769_v24 = vmul.u32.u64.high %v5753_v39, %v1024_v36, %v5768_v4 }
 0x1ef   : > { %v2805_v55 = vadd.s32 %v5686_v21, %v5693_v57  ;;  %v2821_v48 = vsub.s32 32, %v2820_v32  ;;  %v2825_v54 = vsub.s32 4294967266, %v2820_v32  ;;  %v2835_v33 = vsub.s32 4, %v5726_v63 }
 0x1f0   : > { %v1020_v28 = vsel %vm1014_vm12, %v1017_v25, %v1019_v61  ;;  %v5777_v12 = vmul.u32.u64.low %v5753_v39, %v1028_v13  ;;  %v5778_v17 = vmul.u32.u64.high %v5753_v39, %v1028_v13, %v5777_v12  ;;  %v2655_v31 = vadd.s32 1, %v4161_v60 }
 0x1f1   : > { %v4509_v46 = vpop.eup %4508  ;;  %v2822_v43 = vshll.u32 %v5734_v30, %v2820_v32  ;;  %v2823_v3 = vshrl.u32 %v2805_v55, %v2821_v48  ;;  %v2826_v38 = vadd.s32 127, %v2825_v54  ;;  %v1039_v21 = vadd.s32 1, %v5769_v24 }
 0x1f2   : > { %v4511_v52 = vpop.eup %4510  ;;  %v1185_v45 = vxor.u32 2147483648, %v4509_v46  ;;  %v5784_v57 = vand.u32 8388607, %v2645_v29  ;;  %vm2656_vm3 = vcmp.gt.s32.totalorder %v2655_v31, 0  ;;  %vm1180_vm4 = vcmp.lt.s32.totalorder %v5731_v7, 2 }
 0x1f3   : > { %v1182_v8 = vxor.u32 2147483648, %v4511_v52  ;;  %v2824_v1 = vor.u32 %v2823_v3, %v2822_v43  ;;  %v2827_v58 = vshll.u32 %v2826_v38, 23  ;;  %v2657_v47 = vsel %vm2656_vm3, %v2655_v31, 0 }
 0x1f4   : > { %v1186_v42 = vsel %vm1184_vm11, %v1185_v45, %v4511_v52  ;;  %v1036_v5 = vmul.u32 %v5753_v39, %v1020_v28  ;;  %vm1038_vm5 = vc.u32 %v5778_v17, %v5768_v4  ;;  %v2836_v62 = vsel %vm2751_vm0, %v2835_v33, %v5726_v63  ;;  %v5826_v45 = vld [vmem:[%s7610_s2] ss:$0 sm:$0xff] }
 0x1f5   : > { %v1183_v30 = vsel %vm1181_vm15, %v4509_v46, %v1182_v8  ;;  %v2828_v60 = vor.u32 4788187, %v2827_v58  ;;  %v1040_v11 = vsel %vm1038_vm5, %v1039_v21, %v5769_v24  ;;  %vm5802_vm6 = vcmp.le.f32.partialorder %v2749_v6, 0.7853982 }
 0x1f6   : > { %v1187_v35 = vsel %vm1180_vm4, %v1183_v30, %v1186_v42  ;;  %v1041_v39 = vadd.s32 %v1040_v11, %v1036_v5  ;;  %v2659_v19 = vand.u32 31, %v2657_v47  ;;  %v2831_v41 = vcvt.s32.f32 %v2824_v1 }
 0x1f7   : > { %v1188_v37 = vsel %vm1177_vm1, nan, %v1187_v35  ;;  %v2829_v25 = vand.u32 2147483647, %v2828_v60  ;;  %v2653_v49 = vor.u32 8388608, %v5784_v57  ;;  %v2838_v63 = vsel %vm5802_vm6, 0, %v2836_v62 }
 0x1f8   : > { %v3905_v0 = vmul.f32 %v5637_v51, %v1188_v37  ;;  %v1042_v56 = vadd.s32 536870912, %v1041_v39  ;;  %v5810_v59 = vshrl.u32 %v2657_v47, 5  ;;  %v2660_v61 = vsub.s32 32, %v2659_v19 }
 0x1f9   : > { %v2832_v6 = vmul.f32 %v2831_v41, %v2829_v25  ;;  %v2662_v36 = vshll.u32 %v4678_v10, %v2659_v19  ;;  %v2665_v40 = vshll.u32 %v4679_v14, %v2659_v19  ;;  %v2668_v32 = vshll.u32 %v4680_v16, %v2659_v19 }
 0x1fa   : > { %3937 = vst [vmem:[%s5175_s14 + $0x28] sm:$0xff] %v3905_v0  ;;  %v1043_v13 = vshrl.u32 %v1042_v56, 30  ;;  %v2663_v24 = vshrl.u32 %v4679_v14, %v2660_v61  ;;  %v2666_v55 = vshrl.u32 %v4680_v16, %v2660_v61  ;;  %v2671_v48 = vshll.u32 %v4681_v18, %v2659_v19 }
 0x1fb   : > { %v2833_v54 = vxor.u32 2147483648, %v2832_v6  ;;  %v2669_v33 = vshrl.u32 %v4681_v18, %v2660_v61  ;;  %v2672_v46 = vshrl.u32 %v4682_v20, %v2660_v61  ;;  %v2675_v28 = vshrl.u32 %v4683_v27, %v2660_v61 }
 0x1fc   : > { %v1044_v12 = vshll.u32 %v1043_v13, 30  ;;  %v2664_v31 = vor.u32 %v2663_v24, %v2662_v36  ;;  %v2674_v52 = vshll.u32 %v4682_v20, %v2659_v19  ;;  %v5830_v43 = vadd.f32 %v5826_v45, %v5372_v22 }
 0x1fd   : > { %v2834_v3 = vsel %vm2751_vm0, %v2833_v54, %v2832_v6  ;;  %v2667_v38 = vor.u32 %v2666_v55, %v2665_v40  ;;  %v2670_v8 = vor.u32 %v2669_v33, %v2668_v32  ;;  %v2673_v21 = vor.u32 %v2672_v46, %v2671_v48 }
 0x1fe   : > { %v2837_v57 = vsel %vm5802_vm6, %v5564_v2, %v2834_v3  ;;  %v2842_v42 = vadd.s32 3, %v2838_v63  ;;  %v5837_v1 = vsub.s32 %v1041_v39, %v1044_v12  ;;  %v2676_v58 = vor.u32 %v2675_v28, %v2674_v52 }
 0x1ff   : > { %4512 = vcosq.f32 %v2837_v57  ;;  %vm2677_vm7 = vcmp.lt.s32.totalorder %v5810_v59, 1  ;;  %vm2678_vm8 = vcmp.lt.s32.totalorder %v5810_v59, 2  ;;  %vm2679_vm9 = vcmp.lt.s32.totalorder %v5810_v59, 3 }
 0x200   : > { %4514 = vsinq.f32 %v2837_v57  ;;  %vm5844_vm10 = vcmp.le.f32.partialorder %v981_v23, 0.7853982  ;;  %v1047_v47 = vsub.s32 0, %v5837_v1  ;;  %v2661_v30 = vshrl.u32 %v4678_v10, %v2660_v61 }
 0x201   : > { %vm2680_vm11 = vcmp.lt.s32.totalorder %v5810_v59, 4  ;;  %v1067_v5 = vsub.s32 4, %v1043_v13  ;;  %v2685_v60 = vsel %vm2677_vm7, %v2664_v31, %v2667_v38  ;;  %v2689_v37 = vsel %vm2677_vm7, %v2667_v38, %v2670_v8 }
 0x202   : > { %v2682_v35 = vsel %vm2680_vm11, %v2670_v8, 2102212464  ;;  %v2686_v62 = vsel %vm2680_vm11, %v2673_v21, 920167782  ;;  %v4098_v11 = vmin.u32 %v1047_v47, %v5837_v1  ;;  %v2690_v7 = vsel %vm2680_vm11, %v2676_v58, 1326507024 }
 0x203   : > { %v2687_v23 = vsel %vm2679_vm9, %v2670_v8, %v2686_v62  ;;  %v2843_v39 = vand.u32 3, %v2842_v42  ;;  %v2691_v0 = vsel %vm2679_vm9, %v2673_v21, %v2690_v7  ;;  %v2693_v25 = vshll.u32 %v2653_v49, 8 }
 0x204   : > { %v2688_v19 = vsel %vm2678_vm8, %v2685_v60, %v2687_v23  ;;  %vm983_vm12 = vcmp.lt.s32.totalorder %v5667_v26, 0  ;;  %v1049_v41 = vclz %v4098_v11  ;;  %v2681_v63 = vsel %vm2677_vm7, %v2661_v30, %v2664_v31 }
 0x205   : > { %v2683_v56 = vsel %vm2679_vm9, %v2667_v38, %v2682_v35  ;;  %v2692_v61 = vsel %vm2678_vm8, %v2689_v37, %v2691_v0  ;;  %v5869_v6 = vmul.u32.u64.low %v2693_v25, %v2688_v19  ;;  %v5870_v36 = vmul.u32.u64.high %v2693_v25, %v2688_v19, %v5869_v6 }
 0x206   : > { %v1296_v40 = vand.u32 2139095040, %v5830_v43  ;;  %vm2841_vm13 = vweird.f32 %v5564_v2  ;;  %v4099_v49 = vadd.s32 4294967294, %v1049_v41  ;;  %v1068_v32 = vsel %vm983_vm12, %v1067_v5, %v1043_v13  ;;  %v5893_v5 = vpop.f32.mrb[9].mxu0 }
 0x207   : > { %v5877_v24 = vmul.u32.u64.low %v2693_v25, %v2692_v61  ;;  %v5878_v55 = vmul.u32.u64.high %v2693_v25, %v2692_v61, %v5877_v24  ;;  %vm2844_vm14 = vcmp.lt.s32.totalorder %v2843_v39, 2  ;;  %vm2845_vm15 = vcmp.eq.s32.totalorder %v2843_v39, 0 }
 0x208   : > { %v2684_v48 = vsel %vm2678_vm8, %v2681_v63, %v2683_v56  ;;  %v1297_v54 = vshrl.u32 %v1296_v40, 23  ;;  %vm2848_vm0 = vcmp.eq.s32.totalorder %v2843_v39, 2  ;;  %v1037_v33 = vadd.s32 %v5768_v4, %v5778_v17 }
 0x209   : > { %vm4100_vm1 = vcmp.lt.s32.totalorder %v4099_v49, 0  ;;  %v1293_v46 = vand.u32 2147483647, %v5830_v43  ;;  %v4513_v28 = vpop.eup %4512  ;;  %v1070_v13 = vsel %vm5844_vm10, 0, %v1068_v32  ;;  %v2703_v31 = vadd.s32 1, %v5870_v36 }
 0x20a   : > { %v1052_v12 = vsel %vm4100_vm1, 0, %v4099_v49  ;;  %v4109_v52 = vadd.s32 4294967169, %v1297_v54  ;;  %v4515_v3 = vpop.eup %4514  ;;  %v2849_v38 = vxor.u32 2147483648, %v4513_v28  ;;  %v2700_v21 = vmul.u32 %v2693_v25, %v2684_v48 }
 0x20b   : > { %v1053_v59 = vsub.s32 32, %v1052_v12  ;;  %v1057_v8 = vsub.s32 4294967266, %v1052_v12  ;;  %v2846_v57 = vxor.u32 2147483648, %v4515_v3  ;;  %v1054_v42 = vshll.u32 %v5837_v1, %v1052_v12 }
 0x20c   : > { %vm2702_vm2 = vc.u32 %v5878_v55, %v5869_v6  ;;  %v1303_v4 = vadd.s32 1, %v4109_v52  ;;  %v2850_v17 = vsel %vm2848_vm0, %v2849_v38, %v4515_v3  ;;  %v1074_v60 = vadd.s32 3, %v1070_v13 }
 0x20d   : > { %v1055_v58 = vshrl.u32 %v1037_v33, %v1053_v59  ;;  %v1058_v47 = vadd.s32 127, %v1057_v8  ;;  %v2704_v30 = vsel %vm2702_vm2, %v2703_v31, %v5870_v36  ;;  %v2847_v35 = vsel %vm2845_vm15, %v4513_v28, %v2846_v57 }
 0x20e   : > { %v2705_v62 = vadd.s32 %v2704_v30, %v2700_v21  ;;  %vm1304_vm3 = vcmp.gt.s32.totalorder %v1303_v4, 0  ;;  %v2851_v1 = vsel %vm2844_vm14, %v2847_v35, %v2850_v17  ;;  %v1300_v0 = vand.u32 8388607, %v1293_v46 }
 0x20f   : > { %v1056_v11 = vor.u32 %v1055_v58, %v1054_v42  ;;  %v1059_v23 = vshll.u32 %v1058_v47, 23  ;;  %v1305_v37 = vsel %vm1304_vm3, %v1303_v4, 0  ;;  %v2852_v7 = vsel %vm2841_vm13, nan, %v2851_v1 }
 0x210   : > { %v2706_v19 = vadd.s32 536870912, %v2705_v62  ;;  %v1307_v25 = vand.u32 31, %v1305_v37  ;;  %v3921_v41 = vmul.f32 %v5637_v51, %v2852_v7  ;;  %v5903_v40 = vand.u32 3, %v1074_v60 }
 0x211   : > { %v1060_v63 = vor.u32 4788187, %v1059_v23  ;;  %v1063_v39 = vcvt.s32.f32 %v1056_v11  ;;  %v5907_v49 = vadd.f32 %v5826_v45, %v5435_v9  ;;  %vm2647_vm4 = vcmp.lt.s32.totalorder %v5716_v15, 0 }
 0x212   : > { %v2707_v56 = vshrl.u32 %v2706_v19, 30  ;;  %v1308_v61 = vsub.s32 32, %v1307_v25  ;;  %3953 = vst [vmem:[%s5175_s14 + $0xa8] sm:$0xff] %v3921_v41  ;;  %v1301_v32 = vor.u32 8388608, %v1300_v0  ;;  %v1310_v24 = vshll.u32 %v4678_v10, %v1307_v25 }
 0x213   : > { %v1061_v36 = vand.u32 2147483647, %v1060_v63  ;;  %v1313_v9 = vshll.u32 %v4679_v14, %v1307_v25  ;;  %v1316_v31 = vshll.u32 %v4680_v16, %v1307_v25  ;;  %v1306_v38 = vshrl.u32 %v1305_v37, 5 }
 0x214   : > { %v2708_v2 = vshll.u32 %v2707_v56, 30  ;;  %v1311_v48 = vshrl.u32 %v4679_v14, %v1308_v61  ;;  %v1314_v33 = vshrl.u32 %v4680_v16, %v1308_v61  ;;  %v1317_v28 = vshrl.u32 %v4681_v18, %v1308_v61 }
 0x215   : > { %v1064_v54 = vmul.f32 %v1063_v39, %v1061_v36  ;;  %v1320_v12 = vshrl.u32 %v4682_v20, %v1308_v61  ;;  %v1323_v52 = vshrl.u32 %v4683_v27, %v1308_v61  ;;  %v1319_v59 = vshll.u32 %v4681_v18, %v1307_v25 }
 0x216   : > { %v5915_v13 = vsub.s32 %v2705_v62, %v2708_v2  ;;  %v1322_v8 = vshll.u32 %v4682_v20, %v1307_v25  ;;  %v1312_v57 = vor.u32 %v1311_v48, %v1310_v24  ;;  %v1315_v42 = vor.u32 %v1314_v33, %v1313_v9 }
 0x217   : > { %v1065_v3 = vxor.u32 2147483648, %v1064_v54  ;;  %v1318_v4 = vor.u32 %v1317_v28, %v1316_v31  ;;  %v2731_v58 = vsub.s32 4, %v2707_v56  ;;  %v1321_v47 = vor.u32 %v1320_v12, %v1319_v59 }
 0x218   : > { %v2711_v21 = vsub.s32 0, %v5915_v13  ;;  %v2957_v30 = vand.u32 2147483647, %v5907_v49  ;;  %vm5931_vm5 = vcmp.le.f32.partialorder %v2645_v29, 0.7853982  ;;  %v1324_v1 = vor.u32 %v1323_v52, %v1322_v8 }
 0x219   : > { %v1066_v17 = vsel %vm983_vm12, %v1065_v3, %v1064_v54  ;;  %v1341_v11 = vshll.u32 %v1301_v32, 8  ;;  %v1309_v23 = vshrl.u32 %v4678_v10, %v1308_v61  ;;  %vm1325_vm6 = vcmp.lt.s32.totalorder %v1306_v38, 1  ;;  %v5940_v32 = vpop.f32.mrb[9].mxu1 }
 0x21a   : > { %v1069_v35 = vsel %vm5844_vm10, %v5667_v26, %v1066_v17  ;;  %v4162_v62 = vmin.u32 %v2711_v21, %v5915_v13  ;;  %vm1328_vm7 = vcmp.lt.s32.totalorder %v1306_v38, 4  ;;  %v1333_v22 = vsel %vm1325_vm6, %v1312_v57, %v1315_v42 }
 0x21b   : > { %4516 = vcosq.f32 %v1069_v35  ;;  %v1330_v7 = vsel %vm1328_vm7, %v1318_v4, 2102212464  ;;  %v2732_v19 = vsel %vm2647_vm4, %v2731_v58, %v2707_v56  ;;  %vm1327_vm8 = vcmp.lt.s32.totalorder %v1306_v38, 3 }
 0x21c   : > { %4518 = vsinq.f32 %v1069_v35  ;;  %v2713_v37 = vclz %v4162_v62  ;;  %v1334_v29 = vsel %vm1328_vm7, %v1321_v47, 920167782  ;;  %v1337_v0 = vsel %vm1325_vm6, %v1315_v42, %v1318_v4 }
 0x21d   : > { %vm1326_vm9 = vcmp.lt.s32.totalorder %v1306_v38, 2  ;;  %v1335_v41 = vsel %vm1327_vm8, %v1318_v4, %v1334_v29  ;;  %v1338_v63 = vsel %vm1328_vm7, %v1324_v1, 1326507024  ;;  %v1329_v36 = vsel %vm1325_vm6, %v1309_v23, %v1312_v57 }
 0x21e   : > { %v4163_v25 = vadd.s32 4294967294, %v2713_v37  ;;  %v1331_v39 = vsel %vm1327_vm8, %v1315_v42, %v1330_v7  ;;  %v1336_v61 = vsel %vm1326_vm9, %v1333_v22, %v1335_v41  ;;  %v1339_v2 = vsel %vm1327_vm8, %v1321_v47, %v1338_v63 }
 0x21f   : > { %v1340_v24 = vsel %vm1326_vm9, %v1337_v0, %v1339_v2  ;;  %v5943_v48 = vmul.u32.u64.low %v1341_v11, %v1336_v61  ;;  %v5944_v54 = vmul.u32.u64.high %v1341_v11, %v1336_v61, %v5943_v48  ;;  %v2960_v12 = vand.u32 2139095040, %v5907_v49 }
 0x220   : > { %vm4164_vm10 = vcmp.lt.s32.totalorder %v4163_v25, 0  ;;  %v5947_v33 = vmul.u32.u64.low %v1341_v11, %v1340_v24  ;;  %v5948_v28 = vmul.u32.u64.high %v1341_v11, %v1340_v24, %v5947_v33  ;;  %vm1073_vm11 = vweird.f32 %v5667_v26 }
 0x221   : > { %v2716_v56 = vsel %vm4164_vm10, 0, %v4163_v25  ;;  %v2701_v9 = vadd.s32 %v5869_v6, %v5878_v55  ;;  %v1332_v3 = vsel %vm1326_vm9, %v1329_v36, %v1331_v39  ;;  %vm1076_vm12 = vcmp.lt.s32.totalorder %v5903_v40, 2 }
 0x222   : > { %v2717_v31 = vsub.s32 32, %v2716_v56  ;;  %v2721_v52 = vsub.s32 4294967266, %v2716_v56  ;;  %vm1080_vm13 = vcmp.eq.s32.totalorder %v5903_v40, 2  ;;  %v2734_v59 = vsel %vm5931_vm5, 0, %v2732_v19 }
 0x223   : > { %v2961_v8 = vshrl.u32 %v2960_v12, 23  ;;  %v2718_v21 = vshll.u32 %v5915_v13, %v2716_v56  ;;  %v1351_v4 = vadd.s32 1, %v5944_v54  ;;  %v1348_v6 = vmul.u32 %v1341_v11, %v1332_v3 }
 0x224   : > { %v2719_v57 = vshrl.u32 %v2701_v9, %v2717_v31  ;;  %v2722_v42 = vadd.s32 127, %v2721_v52  ;;  %vm1350_vm14 = vc.u32 %v5948_v28, %v5943_v48  ;;  %v2964_v38 = vand.u32 8388607, %v2957_v30 }
 0x225   : > { %v4517_v17 = vpop.eup %4516  ;;  %v4173_v55 = vadd.s32 4294967169, %v2961_v8  ;;  %v1352_v1 = vsel %vm1350_vm14, %v1351_v4, %v5944_v54  ;;  %v5968_v7 = vadd.f32 %v5826_v45, %v5549_v53  ;;  %vm1077_vm15 = vcmp.eq.s32.totalorder %v5903_v40, 0 }
 0x226   : > { %v4519_v58 = vpop.eup %4518  ;;  %v1081_v47 = vxor.u32 2147483648, %v4517_v17  ;;  %v2720_v35 = vor.u32 %v2719_v57, %v2718_v21  ;;  %v2723_v62 = vshll.u32 %v2722_v42, 23  ;;  %v1353_v23 = vadd.s32 %v1352_v1, %v1348_v6 }
 0x227   : > { %v1078_v13 = vxor.u32 2147483648, %v4519_v58  ;;  %v2967_v37 = vadd.s32 1, %v4173_v55  ;;  %v2738_v19 = vadd.s32 3, %v2734_v59  ;;  %v2965_v25 = vor.u32 8388608, %v2964_v38 }
 0x228   : > { %v1082_v11 = vsel %vm1080_vm13, %v1081_v47, %v4519_v58  ;;  %v2724_v22 = vor.u32 4788187, %v2723_v62  ;;  %v1354_v0 = vadd.s32 536870912, %v1353_v23  ;;  %v2727_v36 = vcvt.s32.f32 %v2720_v35 }
 0x229   : > { %v1079_v29 = vsel %vm1077_vm15, %v4517_v17, %v1078_v13  ;;  %vm2968_vm0 = vcmp.gt.s32.totalorder %v2967_v37, 0  ;;  %v1192_v24 = vand.u32 2139095040, %v5968_v7  ;;  %v5983_v9 = vand.u32 3, %v2738_v19 }
 0x22a   : > { %v1083_v41 = vsel %vm1076_vm12, %v1079_v29, %v1082_v11  ;;  %v2725_v63 = vand.u32 2147483647, %v2724_v22  ;;  %v2969_v39 = vsel %vm2968_vm0, %v2967_v37, 0  ;;  %v5977_v61 = vshrl.u32 %v1354_v0, 30 }
 0x22b   : > { %v1084_v53 = vsel %vm1073_vm11, nan, %v1083_v41  ;;  %v2971_v2 = vand.u32 31, %v2969_v39  ;;  %v5985_v31 = vshll.u32 %v2965_v25, 8  ;;  %v1189_v26 = vand.u32 2147483647, %v5968_v7 }
 0x22c   : > { %v3904_v54 = vmul.f32 %v5637_v51, %v1084_v53  ;;  %v2728_v56 = vmul.f32 %v2727_v36, %v2725_v63  ;;  %v1356_v33 = vshll.u32 %v5977_v61, 30  ;;  %v2970_v3 = vshrl.u32 %v2969_v39, 5 }
 0x22d   : > { %v2972_v12 = vsub.s32 32, %v2971_v2  ;;  %v1193_v8 = vshrl.u32 %v1192_v24, 23  ;;  %v2974_v21 = vshll.u32 %v4678_v10, %v2971_v2  ;;  %v2977_v6 = vshll.u32 %v4679_v14, %v2971_v2 }
 0x22e   : > { %3936 = vst [vmem:[%s5175_s14 + $0x20] sm:$0xff] %v3904_v54  ;;  %v2729_v40 = vxor.u32 2147483648, %v2728_v56  ;;  %v5988_v52 = vsub.s32 %v1353_v23, %v1356_v33  ;;  %v2980_v55 = vshll.u32 %v4680_v16, %v2971_v2  ;;  %v2983_v58 = vshll.u32 %v4681_v18, %v2971_v2 }
 0x22f   : > { %v2975_v59 = vshrl.u32 %v4679_v14, %v2972_v12  ;;  %v2978_v57 = vshrl.u32 %v4680_v16, %v2972_v12  ;;  %v2981_v42 = vshrl.u32 %v4681_v18, %v2972_v12  ;;  %v2984_v47 = vshrl.u32 %v4682_v20, %v2972_v12 }
 0x230   : > { %v2730_v51 = vsel %vm2647_vm4, %v2729_v40, %v2728_v56  ;;  %v1359_v17 = vsub.s32 0, %v5988_v52  ;;  %v2986_v60 = vshll.u32 %v4682_v20, %v2971_v2  ;;  %v2987_v23 = vshrl.u32 %v4683_v27, %v2972_v12 }
 0x231   : > { %v2733_v4 = vsel %vm5931_vm5, %v5716_v15, %v2730_v51  ;;  %v2976_v38 = vor.u32 %v2975_v59, %v2974_v21  ;;  %v2979_v62 = vor.u32 %v2978_v57, %v2977_v6  ;;  %v2982_v1 = vor.u32 %v2981_v42, %v2980_v55 }
 0x232   : > { %4520 = vcosq.f32 %v2733_v4  ;;  %v4110_v35 = vmin.u32 %v1359_v17, %v5988_v52  ;;  %v2985_v13 = vor.u32 %v2984_v47, %v2983_v58  ;;  %v4105_v37 = vadd.s32 4294967169, %v1193_v8 }
 0x233   : > { %4522 = vsinq.f32 %v2733_v4  ;;  %vm1295_vm1 = vcmp.lt.s32.totalorder %v5830_v43, 0  ;;  %v1379_v22 = vsub.s32 4, %v5977_v61  ;;  %v2973_v19 = vshrl.u32 %v4678_v10, %v2972_v12 }
 0x234   : > { %v1361_v11 = vclz %v4110_v35  ;;  %vm2989_vm2 = vcmp.lt.s32.totalorder %v2970_v3, 1  ;;  %vm2744_vm3 = vcmp.eq.s32.totalorder %v5983_v9, 2  ;;  %v2988_v29 = vor.u32 %v2987_v23, %v2986_v60 }
 0x235   : > { %vm2990_vm4 = vcmp.lt.s32.totalorder %v2970_v3, 2  ;;  %vm2991_vm5 = vcmp.lt.s32.totalorder %v2970_v3, 3  ;;  %vm2992_vm6 = vcmp.lt.s32.totalorder %v2970_v3, 4  ;;  %vm2741_vm7 = vcmp.eq.s32.totalorder %v5983_v9, 0 }
 0x236   : > { %v4111_v0 = vadd.s32 4294967294, %v1361_v11  ;;  %v2994_v25 = vsel %vm2992_vm6, %v2982_v1, 2102212464  ;;  %v2997_v41 = vsel %vm2989_vm2, %v2976_v38, %v2979_v62  ;;  %v2998_v63 = vsel %vm2992_vm6, %v2985_v13, 920167782 }
 0x237   : > { %vm6014_vm8 = vcmp.le.f32.partialorder %v1293_v46, 0.7853982  ;;  %v2993_v39 = vsel %vm2989_vm2, %v2973_v19, %v2976_v38  ;;  %v2999_v53 = vsel %vm2991_vm5, %v2982_v1, %v2998_v63  ;;  %v3001_v2 = vsel %vm2989_vm2, %v2979_v62, %v2982_v1 }
 0x238   : > { %v3002_v24 = vsel %vm2992_vm6, %v2988_v29, 1326507024  ;;  %vm2737_vm9 = vweird.f32 %v5716_v15  ;;  %vm4112_vm10 = vcmp.lt.s32.totalorder %v4111_v0, 0  ;;  %v2995_v54 = vsel %vm2991_vm5, %v2979_v62, %v2994_v25  ;;  %v6056_v29 = vpop.f32.mrb[10].mxu0 }
 0x239   : > { %v3000_v56 = vsel %vm2990_vm4, %v2997_v41, %v2999_v53  ;;  %v3003_v33 = vsel %vm2991_vm5, %v2985_v13, %v3002_v24  ;;  %v1364_v12 = vsel %vm4112_vm10, 0, %v4111_v0  ;;  %v1349_v8 = vadd.s32 %v5943_v48, %v5948_v28  ;;  %v6067_v41 = vld [vmem:[%s7611_s3] ss:$0 sm:$0xff] }
 0x23a   : > { %v3004_v46 = vsel %vm2990_vm4, %v3001_v2, %v3003_v33  ;;  %v6025_v40 = vmul.u32.u64.low %v5985_v31, %v3000_v56  ;;  %v6026_v59 = vmul.u32.u64.high %v5985_v31, %v3000_v56, %v6025_v40  ;;  %v1365_v51 = vsub.s32 32, %v1364_v12 }
 0x23b   : > { %v1369_v21 = vsub.s32 4294967266, %v1364_v12  ;;  %v6033_v57 = vand.u32 8388607, %v1189_v26  ;;  %v2996_v4 = vsel %vm2990_vm4, %v2993_v39, %v2995_v54  ;;  %v1199_v55 = vadd.s32 1, %v4105_v37 }
 0x23c   : > { %v4521_v42 = vpop.eup %4520  ;;  %v6037_v17 = vmul.u32.u64.low %v5985_v31, %v3004_v46  ;;  %v6038_v6 = vmul.u32.u64.high %v5985_v31, %v3004_v46, %v6037_v17  ;;  %v1366_v47 = vshll.u32 %v5988_v52, %v1364_v12  ;;  %v1367_v35 = vshrl.u32 %v1349_v8, %v1365_v51 }
 0x23d   : > { %v4523_v38 = vpop.eup %4522  ;;  %v2745_v58 = vxor.u32 2147483648, %v4521_v42  ;;  %v1370_v48 = vadd.s32 127, %v1369_v21  ;;  %v1380_v62 = vsel %vm1295_vm1, %v1379_v22, %v5977_v61  ;;  %v3015_v1 = vadd.s32 1, %v6026_v59 }
 0x23e   : > { %v2742_v28 = vxor.u32 2147483648, %v4523_v38  ;;  %vm1200_vm11 = vcmp.gt.s32.totalorder %v1199_v55, 0  ;;  %v1368_v13 = vor.u32 %v1367_v35, %v1366_v47  ;;  %vm2740_vm12 = vcmp.lt.s32.totalorder %v5983_v9, 2 }
 0x23f   : > { %v2746_v3 = vsel %vm2744_vm3, %v2745_v58, %v4523_v38  ;;  %v1371_v60 = vshll.u32 %v1370_v48, 23  ;;  %v1201_v23 = vsel %vm1200_vm11, %v1199_v55, 0  ;;  %v3012_v37 = vmul.u32 %v5985_v31, %v2996_v4 }
 0x240   : > { %v2743_v52 = vsel %vm2741_vm7, %v4521_v42, %v2742_v28  ;;  %vm3014_vm13 = vc.u32 %v6038_v6, %v6025_v40  ;;  %v1382_v22 = vsel %vm6014_vm8, 0, %v1380_v62  ;;  %v1203_v25 = vand.u32 31, %v1201_v23 }
 0x241   : > { %v2747_v61 = vsel %vm2740_vm12, %v2743_v52, %v2746_v3  ;;  %v1372_v11 = vor.u32 4788187, %v1371_v60  ;;  %v3016_v19 = vsel %vm3014_vm13, %v3015_v1, %v6026_v59  ;;  %v6062_v31 = vadd.f32 %v5826_v45, %v5597_v44 }
 0x242   : > { %v2748_v0 = vsel %vm2737_vm9, nan, %v2747_v61  ;;  %v3017_v9 = vadd.s32 %v3016_v19, %v3012_v37  ;;  %v1375_v53 = vcvt.s32.f32 %v1368_v13  ;;  %v1197_v2 = vor.u32 8388608, %v6033_v57 }
 0x243   : > { %v3920_v63 = vmul.f32 %v6067_v41, %v2748_v0  ;;  %v1373_v39 = vand.u32 2147483647, %v1372_v11  ;;  %v1386_v24 = vadd.s32 3, %v1382_v22  ;;  %v1202_v54 = vshrl.u32 %v1201_v23, 5 }
 0x244   : > { %v3018_v15 = vadd.s32 536870912, %v3017_v9  ;;  %v1204_v56 = vsub.s32 32, %v1203_v25  ;;  %v1206_v44 = vshll.u32 %v4678_v10, %v1203_v25  ;;  %v1209_v12 = vshll.u32 %v4679_v14, %v1203_v25 }
 0x245   : > { %3952 = vst [vmem:[%s5175_s14 + $0xa0] sm:$0xff] %v3920_v63  ;;  %v1376_v33 = vmul.f32 %v1375_v53, %v1373_v39  ;;  %v1212_v46 = vshll.u32 %v4680_v16, %v1203_v25  ;;  %v1215_v21 = vshll.u32 %v4681_v18, %v1203_v25  ;;  %vm2959_vm14 = vcmp.lt.s32.totalorder %v5907_v49, 0 }
 0x246   : > { %v3019_v59 = vshrl.u32 %v3018_v15, 30  ;;  %v1207_v8 = vshrl.u32 %v4679_v14, %v1204_v56  ;;  %v1210_v51 = vshrl.u32 %v4680_v16, %v1204_v56  ;;  %v1213_v42 = vshrl.u32 %v4681_v18, %v1204_v56 }
 0x247   : > { %v1377_v57 = vxor.u32 2147483648, %v1376_v33  ;;  %v1216_v4 = vshrl.u32 %v4682_v20, %v1204_v56  ;;  %v1219_v17 = vshrl.u32 %v4683_v27, %v1204_v56  ;;  %v1218_v58 = vshll.u32 %v4682_v20, %v1203_v25 }
 0x248   : > { %v3020_v55 = vshll.u32 %v3019_v59, 30  ;;  %v1208_v38 = vor.u32 %v1207_v8, %v1206_v44  ;;  %vm1221_vm15 = vcmp.lt.s32.totalorder %v1202_v54, 1  ;;  %v1211_v35 = vor.u32 %v1210_v51, %v1209_v12 }
 0x249   : > { %v1378_v47 = vsel %vm1295_vm1, %v1377_v57, %v1376_v33  ;;  %v1214_v48 = vor.u32 %v1213_v42, %v1212_v46  ;;  %v1217_v28 = vor.u32 %v1216_v4, %v1215_v21  ;;  %v1220_v3 = vor.u32 %v1219_v17, %v1218_v58  ;;  %v6124_v4 = vpop.f32.mrb[10].mxu1 }
 0x24a   : > { %v1381_v62 = vsel %vm6014_vm8, %v5830_v43, %v1378_v47  ;;  %v6088_v1 = vsub.s32 %v3017_v9, %v3020_v55  ;;  %vm1224_vm0 = vcmp.lt.s32.totalorder %v1202_v54, 4  ;;  %v1205_v13 = vshrl.u32 %v4678_v10, %v1204_v56 }
 0x24b   : > { %4524 = vcosq.f32 %v1381_v62  ;;  %vm1222_vm2 = vcmp.lt.s32.totalorder %v1202_v54, 2  ;;  %v1226_v60 = vsel %vm1224_vm0, %v1214_v48, 2102212464  ;;  %v3043_v52 = vsub.s32 4, %v3019_v59 }
 0x24c   : > { %4526 = vsinq.f32 %v1381_v62  ;;  %v3023_v23 = vsub.s32 0, %v6088_v1  ;;  %vm1223_vm1 = vcmp.lt.s32.totalorder %v1202_v54, 3  ;;  %v1225_v37 = vsel %vm1221_vm15, %v1205_v13, %v1208_v38 }
 0x24d   : > { %v1227_v61 = vsel %vm1223_vm1, %v1211_v35, %v1226_v60  ;;  %v1229_v36 = vsel %vm1221_vm15, %v1208_v38, %v1211_v35  ;;  %v1230_v11 = vsel %vm1224_vm0, %v1217_v28, 920167782  ;;  %v1233_v0 = vsel %vm1221_vm15, %v1211_v35, %v1214_v48 }
 0x24e   : > { %v4174_v22 = vmin.u32 %v3023_v23, %v6088_v1  ;;  %v1231_v19 = vsel %vm1223_vm1, %v1214_v48, %v1230_v11  ;;  %v1234_v9 = vsel %vm1224_vm0, %v1220_v3, 1326507024  ;;  %v1387_v25 = vand.u32 3, %v1386_v24 }
 0x24f   : > { %v1232_v63 = vsel %vm1222_vm2, %v1229_v36, %v1231_v19  ;;  %v1235_v39 = vsel %vm1223_vm1, %v1217_v28, %v1234_v9  ;;  %v1237_v53 = vshll.u32 %v1197_v2, 8  ;;  %v3044_v56 = vsel %vm2959_vm14, %v3043_v52, %v3019_v59 }
 0x250   : > { %v3025_v15 = vclz %v4174_v22  ;;  %v2853_v33 = vand.u32 2147483647, %v6062_v31  ;;  %v1228_v44 = vsel %vm1222_vm2, %v1225_v37, %v1227_v61  ;;  %v1236_v12 = vsel %vm1222_vm2, %v1233_v0, %v1235_v39 }
 0x251   : > { %v6105_v46 = vmul.u32.u64.low %v1237_v53, %v1232_v63  ;;  %v6106_v8 = vmul.u32.u64.high %v1237_v53, %v1232_v63, %v6105_v46  ;;  %v6108_v21 = vmul.u32.u64.low %v1237_v53, %v1236_v12  ;;  %v6109_v24 = vmul.u32.u64.high %v1237_v53, %v1236_v12, %v6108_v21 }
 0x252   : > { %v4175_v51 = vadd.s32 4294967294, %v3025_v15  ;;  %v2856_v57 = vand.u32 2139095040, %v6062_v31  ;;  %vm1389_vm3 = vcmp.eq.s32.totalorder %v1387_v25, 0  ;;  %vm6114_vm4 = vcmp.le.f32.partialorder %v2957_v30, 0.7853982 }
 0x253   : > { %v6120_v54 = vadd.f32 %v5826_v45, %v5718_v50  ;;  %vm1392_vm5 = vcmp.eq.s32.totalorder %v1387_v25, 2  ;;  %v3013_v59 = vadd.s32 %v6025_v40, %v6038_v6  ;;  %v3046_v30 = vsel %vm6114_vm4, 0, %v3044_v56 }
 0x254   : > { %vm4176_vm6 = vcmp.lt.s32.totalorder %v4175_v51, 0  ;;  %v2857_v42 = vshrl.u32 %v2856_v57, 23  ;;  %v1244_v38 = vmul.u32 %v1237_v53, %v1228_v44  ;;  %v1247_v58 = vadd.s32 1, %v6106_v8 }
 0x255   : > { %v4525_v17 = vpop.eup %4524  ;;  %v3028_v55 = vsel %vm4176_vm6, 0, %v4175_v51  ;;  %v2860_v28 = vand.u32 8388607, %v2853_v33  ;;  %vm1246_vm7 = vc.u32 %v6109_v24, %v6105_v46  ;;  %vm1388_vm8 = vcmp.lt.s32.totalorder %v1387_v25, 2 }
 0x256   : > { %v4527_v47 = vpop.eup %4526  ;;  %v1393_v35 = vxor.u32 2147483648, %v4525_v17  ;;  %v3029_v50 = vsub.s32 32, %v3028_v55  ;;  %v3033_v48 = vsub.s32 4294967266, %v3028_v55  ;;  %v3030_v6 = vshll.u32 %v6088_v1, %v3028_v55 }
 0x257   : > { %v1390_v40 = vxor.u32 2147483648, %v4527_v47  ;;  %v4169_v62 = vadd.s32 4294967169, %v2857_v42  ;;  %v1248_v23 = vsel %vm1246_vm7, %v1247_v58, %v6106_v8  ;;  %vm1385_vm9 = vweird.f32 %v5830_v43 }
 0x258   : > { %v1394_v3 = vsel %vm1392_vm5, %v1393_v35, %v4527_v47  ;;  %v3031_v13 = vshrl.u32 %v3013_v59, %v3029_v50  ;;  %v3034_v60 = vadd.s32 127, %v3033_v48  ;;  %v1249_v37 = vadd.s32 %v1248_v23, %v1244_v38 }
 0x259   : > { %v1391_v52 = vsel %vm1389_vm3, %v4525_v17, %v1390_v40  ;;  %v2863_v61 = vadd.s32 1, %v4169_v62  ;;  %v3050_v19 = vadd.s32 3, %v3046_v30  ;;  %v2861_v39 = vor.u32 8388608, %v2860_v28 }
 0x25a   : > { %v1395_v36 = vsel %vm1388_vm8, %v1391_v52, %v1394_v3  ;;  %v3032_v11 = vor.u32 %v3031_v13, %v3030_v6  ;;  %v3035_v1 = vshll.u32 %v3034_v60, 23  ;;  %v1250_v0 = vadd.s32 536870912, %v1249_v37 }
 0x25b   : > { %v1396_v22 = vsel %vm1385_vm9, nan, %v1395_v36  ;;  %vm2864_vm10 = vcmp.gt.s32.totalorder %v2863_v61, 0  ;;  %v1504_v56 = vand.u32 2139095040, %v6120_v54  ;;  %vm1191_vm11 = vcmp.lt.s32.totalorder %v5968_v7, 0 }
 0x25c   : > { %v3907_v9 = vmul.f32 %v6067_v41, %v1396_v22  ;;  %v3036_v63 = vor.u32 4788187, %v3035_v1  ;;  %v2865_v53 = vsel %vm2864_vm10, %v2863_v61, 0  ;;  %v1251_v15 = vshrl.u32 %v1250_v0, 30 }
 0x25d   : > { %v2867_v25 = vand.u32 31, %v2865_v53  ;;  %v3039_v12 = vcvt.s32.f32 %v3032_v11  ;;  %v6141_v43 = vand.u32 3, %v3050_v19  ;;  %vm6145_vm12 = vcmp.le.f32.partialorder %v1189_v26, 0.7853982 }
 0x25e   : > { %3939 = vst [vmem:[%s5175_s14 + $0x38] sm:$0xff] %v3907_v9  ;;  %v3037_v44 = vand.u32 2147483647, %v3036_v63  ;;  %v1252_v51 = vshll.u32 %v1251_v15, 30  ;;  %v1501_v57 = vand.u32 2147483647, %v6120_v54  ;;  %v1245_v42 = vadd.s32 %v6105_v46, %v6109_v24 }
 0x25f   : > { %v2868_v21 = vsub.s32 32, %v2867_v25  ;;  %v1275_v17 = vsub.s32 4, %v1251_v15  ;;  %v6151_v55 = vshll.u32 %v2861_v39, 8  ;;  %v6155_v38 = vshrl.u32 %v2865_v53, 5 }
 0x260   : > { %v3040_v59 = vmul.f32 %v3039_v12, %v3037_v44  ;;  %v6153_v30 = vsub.s32 %v1249_v37, %v1252_v51  ;;  %v1505_v26 = vshrl.u32 %v1504_v56, 23  ;;  %v2870_v35 = vshll.u32 %v4678_v10, %v2867_v25 }
 0x261   : > { %v2871_v58 = vshrl.u32 %v4679_v14, %v2868_v21  ;;  %v2874_v50 = vshrl.u32 %v4680_v16, %v2868_v21  ;;  %v2877_v48 = vshrl.u32 %v4681_v18, %v2868_v21  ;;  %v2873_v46 = vshll.u32 %v4679_v14, %v2867_v25 }
 0x262   : > { %v3041_v47 = vxor.u32 2147483648, %v3040_v59  ;;  %v1255_v28 = vsub.s32 0, %v6153_v30  ;;  %v2876_v24 = vshll.u32 %v4680_v16, %v2867_v25  ;;  %v2880_v40 = vshrl.u32 %v4682_v20, %v2868_v21 }
 0x263   : > { %v1276_v62 = vsel %vm1191_vm11, %v1275_v17, %v1251_v15  ;;  %v2872_v3 = vor.u32 %v2871_v58, %v2870_v35  ;;  %v2879_v13 = vshll.u32 %v4681_v18, %v2867_v25  ;;  %v2875_v52 = vor.u32 %v2874_v50, %v2873_v46  ;;  %v6206_v50 = vpop.f32.mrb[11].mxu0 }
 0x264   : > { %v3042_v6 = vsel %vm2959_vm14, %v3041_v47, %v3040_v59  ;;  %v4106_v23 = vmin.u32 %v1255_v28, %v6153_v30  ;;  %v2878_v37 = vor.u32 %v2877_v48, %v2876_v24  ;;  %v2882_v36 = vshll.u32 %v4682_v20, %v2867_v25 }
 0x265   : > { %v3045_v60 = vsel %vm6114_vm4, %v5907_v49, %v3042_v6  ;;  %v2881_v61 = vor.u32 %v2880_v40, %v2879_v13  ;;  %v2883_v11 = vshrl.u32 %v4683_v27, %v2868_v21  ;;  %v4117_v22 = vadd.s32 4294967169, %v1505_v26 }
 0x266   : > { %4528 = vcosq.f32 %v3045_v60  ;;  %v1257_v1 = vclz %v4106_v23  ;;  %v6178_v19 = vand.u32 8388607, %v1501_v57  ;;  %v1278_v2 = vsel %vm6145_vm12, 0, %v1276_v62 }
 0x267   : > { %4530 = vsinq.f32 %v3045_v60  ;;  %v2869_v0 = vshrl.u32 %v4678_v10, %v2868_v21  ;;  %v2884_v9 = vor.u32 %v2883_v11, %v2882_v36  ;;  %vm2885_vm13 = vcmp.lt.s32.totalorder %v6155_v38, 1 }
 0x268   : > { %v4107_v63 = vadd.s32 4294967294, %v1257_v1  ;;  %vm2887_vm14 = vcmp.lt.s32.totalorder %v6155_v38, 3  ;;  %vm2888_vm15 = vcmp.lt.s32.totalorder %v6155_v38, 4  ;;  %v2893_v39 = vsel %vm2885_vm13, %v2872_v3, %v2875_v52 }
 0x269   : > { %v2890_v53 = vsel %vm2888_vm15, %v2878_v37, 2102212464  ;;  %v2894_v15 = vsel %vm2888_vm15, %v2881_v61, 920167782  ;;  %v2897_v25 = vsel %vm2885_vm13, %v2875_v52, %v2878_v37  ;;  %v2898_v56 = vsel %vm2888_vm15, %v2884_v9, 1326507024 }
 0x26a   : > { %vm3053_vm0 = vcmp.eq.s32.totalorder %v6141_v43, 0  ;;  %vm4108_vm2 = vcmp.lt.s32.totalorder %v4107_v63, 0  ;;  %vm2886_vm1 = vcmp.lt.s32.totalorder %v6155_v38, 2  ;;  %v2895_v44 = vsel %vm2887_vm14, %v2878_v37, %v2894_v15 }
 0x26b   : > { %v2899_v12 = vsel %vm2887_vm14, %v2881_v61, %v2898_v56  ;;  %vm3052_vm3 = vcmp.lt.s32.totalorder %v6141_v43, 2  ;;  %v1260_v51 = vsel %vm4108_vm2, 0, %v4107_v63  ;;  %v2889_v21 = vsel %vm2885_vm13, %v2869_v0, %v2872_v3 }
 0x26c   : > { %v2896_v59 = vsel %vm2886_vm1, %v2893_v39, %v2895_v44  ;;  %v2900_v17 = vsel %vm2886_vm1, %v2897_v25, %v2899_v12  ;;  %vm3049_vm4 = vweird.f32 %v5907_v49  ;;  %v1261_v58 = vsub.s32 32, %v1260_v51 }
 0x26d   : > { %v1265_v26 = vsub.s32 4294967266, %v1260_v51  ;;  %v2891_v47 = vsel %vm2887_vm14, %v2875_v52, %v2890_v53  ;;  %v1511_v35 = vadd.s32 1, %v4117_v22  ;;  %v1262_v40 = vshll.u32 %v6153_v30, %v1260_v51 }
 0x26e   : > { %v6209_v48 = vmul.u32.u64.low %v6151_v55, %v2900_v17  ;;  %v6210_v28 = vmul.u32.u64.high %v6151_v55, %v2900_v17, %v6209_v48  ;;  %v6213_v46 = vmul.u32.u64.low %v6151_v55, %v2896_v59  ;;  %v6214_v24 = vmul.u32.u64.high %v6151_v55, %v2896_v59, %v6213_v46 }
 0x26f   : > { %v1263_v6 = vshrl.u32 %v1245_v42, %v1261_v58  ;;  %v1266_v62 = vadd.s32 127, %v1265_v26  ;;  %vm1512_vm5 = vcmp.gt.s32.totalorder %v1511_v35, 0  ;;  %vm3056_vm6 = vcmp.eq.s32.totalorder %v6141_v43, 2 }
 0x270   : > { %v4529_v3 = vpop.eup %4528  ;;  %v1282_v13 = vadd.s32 3, %v1278_v2  ;;  %v2892_v60 = vsel %vm2886_vm1, %v2889_v21, %v2891_v47  ;;  %v1513_v23 = vsel %vm1512_vm5, %v1511_v35, 0  ;;  %v1509_v11 = vor.u32 8388608, %v6178_v19 }
 0x271   : > { %v4531_v52 = vpop.eup %4530  ;;  %v3057_v37 = vxor.u32 2147483648, %v4529_v3  ;;  %v1264_v61 = vor.u32 %v1263_v6, %v1262_v40  ;;  %v1267_v36 = vshll.u32 %v1266_v62, 23  ;;  %vm2910_vm7 = vc.u32 %v6210_v28, %v6213_v46 }
 0x272   : > { %v3054_v1 = vxor.u32 2147483648, %v4531_v52  ;;  %v2911_v42 = vadd.s32 1, %v6214_v24  ;;  %v6227_v30 = vadd.f32 %v5826_v45, %v5760_v34  ;;  %v2908_v2 = vmul.u32 %v6151_v55, %v2892_v60 }
 0x273   : > { %v3058_v22 = vsel %vm3056_vm6, %v3057_v37, %v4531_v52  ;;  %v1268_v38 = vor.u32 4788187, %v1267_v36  ;;  %v1515_v0 = vand.u32 31, %v1513_v23  ;;  %v1271_v63 = vcvt.s32.f32 %v1264_v61 }
 0x274   : > { %v3055_v9 = vsel %vm3053_vm0, %v4529_v3, %v3054_v1  ;;  %v6232_v19 = vand.u32 3, %v1282_v13  ;;  %v2912_v39 = vsel %vm2910_vm7, %v2911_v42, %v6214_v24  ;;  %v1514_v55 = vshrl.u32 %v1513_v23, 5 }
 0x275   : > { %v3059_v53 = vsel %vm3052_vm3, %v3055_v9, %v3058_v22  ;;  %v1269_v15 = vand.u32 2147483647, %v1268_v38  ;;  %v2913_v34 = vadd.s32 %v2912_v39, %v2908_v2  ;;  %v1516_v45 = vsub.s32 32, %v1515_v0 }
 0x276   : > { %v3060_v25 = vsel %vm3049_vm4, nan, %v3059_v53  ;;  %v1518_v56 = vshll.u32 %v4678_v10, %v1515_v0  ;;  %v1521_v44 = vshll.u32 %v4679_v14, %v1515_v0  ;;  %v1524_v59 = vshll.u32 %v4680_v16, %v1515_v0 }
 0x277   : > { %v3923_v12 = vmul.f32 %v6067_v41, %v3060_v25  ;;  %v1272_v51 = vmul.f32 %v1271_v63, %v1269_v15  ;;  %v2914_v21 = vadd.s32 536870912, %v2913_v34  ;;  %v1519_v43 = vshrl.u32 %v4679_v14, %v1516_v45 }
 0x278   : > { %v1522_v17 = vshrl.u32 %v4680_v16, %v1516_v45  ;;  %v1525_v58 = vshrl.u32 %v4681_v18, %v1516_v45  ;;  %v1527_v49 = vshll.u32 %v4681_v18, %v1515_v0  ;;  %v1528_v35 = vshrl.u32 %v4682_v20, %v1516_v45 }
 0x279   : > { %3955 = vst [vmem:[%s5175_s14 + $0xb8] sm:$0xff] %v3923_v12  ;;  %v1273_v26 = vxor.u32 2147483648, %v1272_v51  ;;  %v2915_v47 = vshrl.u32 %v2914_v21, 30  ;;  %v1530_v48 = vshll.u32 %v4682_v20, %v1515_v0  ;;  %v1520_v24 = vor.u32 %v1519_v43, %v1518_v56  ;;  %v6281_v21 = vld [vmem:[%s7610_s2] ss:$0 sm:$0xff] }
 0x27a   : > { %v1523_v40 = vor.u32 %v1522_v17, %v1521_v44  ;;  %v1526_v6 = vor.u32 %v1525_v58, %v1524_v59  ;;  %v1531_v62 = vshrl.u32 %v4683_v27, %v1516_v45  ;;  %v1529_v60 = vor.u32 %v1528_v35, %v1527_v49 }
 0x27b   : > { %v1274_v3 = vsel %vm1191_vm11, %v1273_v26, %v1272_v51  ;;  %v2916_v13 = vshll.u32 %v2915_v47, 30  ;;  %v6253_v23 = vshll.u32 %v1509_v11, 8  ;;  %vm1533_vm8 = vcmp.lt.s32.totalorder %v1514_v55, 1  ;;  %v6292_v26 = vpop.f32.mrb[11].mxu1 }
 0x27c   : > { %v1277_v52 = vsel %vm6145_vm12, %v5968_v7, %v1274_v3  ;;  %v1532_v37 = vor.u32 %v1531_v62, %v1530_v48  ;;  %v3168_v61 = vand.u32 2139095040, %v6227_v30  ;;  %vm1534_vm9 = vcmp.lt.s32.totalorder %v1514_v55, 2 }
 0x27d   : > { %4532 = vcosq.f32 %v1277_v52  ;;  %v6259_v36 = vsub.s32 %v2913_v34, %v2916_v13  ;;  %vm1536_vm10 = vcmp.lt.s32.totalorder %v1514_v55, 4  ;;  %v1517_v1 = vshrl.u32 %v4678_v10, %v1516_v45 }
 0x27e   : > { %4534 = vsinq.f32 %v1277_v52  ;;  %v1538_v42 = vsel %vm1536_vm10, %v1526_v6, 2102212464  ;;  %v1541_v11 = vsel %vm1533_vm8, %v1520_v24, %v1523_v40  ;;  %v2939_v38 = vsub.s32 4, %v2915_v47 }
 0x27f   : > { %v2919_v22 = vsub.s32 0, %v6259_v36  ;;  %vm1535_vm11 = vcmp.lt.s32.totalorder %v1514_v55, 3  ;;  %v1542_v8 = vsel %vm1536_vm10, %v1529_v60, 920167782  ;;  %v1537_v2 = vsel %vm1533_vm8, %v1517_v1, %v1520_v24 }
 0x280   : > { %v1543_v0 = vsel %vm1535_vm11, %v1526_v6, %v1542_v8  ;;  %v1545_v9 = vsel %vm1533_vm8, %v1523_v40, %v1526_v6  ;;  %v1546_v63 = vsel %vm1536_vm10, %v1532_v37, 1326507024  ;;  %v1539_v53 = vsel %vm1535_vm11, %v1523_v40, %v1538_v42 }
 0x281   : > { %v4170_v39 = vmin.u32 %v2919_v22, %v6259_v36  ;;  %v1544_v15 = vsel %vm1534_vm9, %v1541_v11, %v1543_v0  ;;  %v1547_v34 = vsel %vm1535_vm11, %v1529_v60, %v1546_v63  ;;  %vm2855_vm12 = vcmp.lt.s32.totalorder %v6062_v31, 0 }
 0x282   : > { %v1548_v45 = vsel %vm1534_vm9, %v1545_v9, %v1547_v34  ;;  %v6271_v25 = vmul.u32.u64.low %v6253_v23, %v1544_v15  ;;  %v6272_v56 = vmul.u32.u64.high %v6253_v23, %v1544_v15, %v6271_v25  ;;  %v2940_v12 = vsel %vm2855_vm12, %v2939_v38, %v2915_v47 }
 0x283   : > { %v2921_v44 = vclz %v4170_v39  ;;  %v3165_v51 = vand.u32 2147483647, %v6227_v30  ;;  %v6285_v59 = vadd.f32 %v6281_v21, %v5893_v5  ;;  %v1540_v43 = vsel %vm1534_vm9, %v1537_v2, %v1539_v53 }
 0x284   : > { %v6289_v17 = vmul.u32.u64.low %v6253_v23, %v1548_v45  ;;  %v6290_v58 = vmul.u32.u64.high %v6253_v23, %v1548_v45, %v6289_v17  ;;  %v3169_v49 = vshrl.u32 %v3168_v61, 23  ;;  %vm1284_vm13 = vcmp.lt.s32.totalorder %v6232_v19, 2 }
 0x285   : > { %vm1285_vm14 = vcmp.eq.s32.totalorder %v6232_v19, 0  ;;  %vm6298_vm15 = vcmp.le.f32.partialorder %v2853_v33, 0.7853982  ;;  %v4171_v5 = vadd.s32 4294967294, %v2921_v44  ;;  %vm1288_vm0 = vcmp.eq.s32.totalorder %v6232_v19, 2 }
 0x286   : > { %v2909_v55 = vadd.s32 %v6213_v46, %v6210_v28  ;;  %v1559_v35 = vadd.s32 1, %v6272_v56  ;;  %v4181_v48 = vadd.s32 4294967169, %v3169_v49  ;;  %v2942_v40 = vsel %vm6298_vm15, 0, %v2940_v12 }
 0x287   : > { %v4533_v24 = vpop.eup %4532  ;;  %vm4172_vm2 = vcmp.lt.s32.totalorder %v4171_v5, 0  ;;  %v1556_v6 = vmul.u32 %v6253_v23, %v1540_v43  ;;  %v3172_v33 = vand.u32 8388607, %v3165_v51  ;;  %vm1558_vm1 = vc.u32 %v6290_v58, %v6271_v25 }
 0x288   : > { %v4535_v62 = vpop.eup %4534  ;;  %v1289_v3 = vxor.u32 2147483648, %v4533_v24  ;;  %v2924_v13 = vsel %vm4172_vm2, 0, %v4171_v5  ;;  %v1397_v28 = vand.u32 2147483647, %v6285_v59  ;;  %v1400_v37 = vand.u32 2139095040, %v6285_v59 }
 0x289   : > { %v1286_v46 = vxor.u32 2147483648, %v4535_v62  ;;  %v2925_v60 = vsub.s32 32, %v2924_v13  ;;  %v2929_v52 = vsub.s32 4294967266, %v2924_v13  ;;  %v2926_v23 = vshll.u32 %v6259_v36, %v2924_v13 }
 0x28a   : > { %v1290_v61 = vsel %vm1288_vm0, %v1289_v3, %v4535_v62  ;;  %v1560_v1 = vsel %vm1558_vm1, %v1559_v35, %v6272_v56  ;;  %v3175_v42 = vadd.s32 1, %v4181_v48  ;;  %vm1281_vm3 = vweird.f32 %v5968_v7 }
 0x28b   : > { %v1287_v11 = vsel %vm1285_vm14, %v4533_v24, %v1286_v46  ;;  %v2927_v22 = vshrl.u32 %v2909_v55, %v2925_v60  ;;  %v2930_v38 = vadd.s32 127, %v2929_v52  ;;  %v1561_v8 = vadd.s32 %v1560_v1, %v1556_v6 }
 0x28c   : > { %v1291_v2 = vsel %vm1284_vm13, %v1287_v11, %v1290_v61  ;;  %vm3176_vm4 = vcmp.gt.s32.totalorder %v3175_v42, 0  ;;  %v2946_v53 = vadd.s32 3, %v2942_v40  ;;  %v3173_v15 = vor.u32 8388608, %v3172_v33 }
 0x28d   : > { %v1292_v0 = vsel %vm1281_vm3, nan, %v1291_v2  ;;  %v2928_v9 = vor.u32 %v2927_v22, %v2926_v23  ;;  %v2931_v63 = vshll.u32 %v2930_v38, 23  ;;  %v1562_v36 = vadd.s32 536870912, %v1561_v8 }
 0x28e   : > { %v3906_v39 = vmul.f32 %v6067_v41, %v1292_v0  ;;  %v3177_v34 = vsel %vm3176_vm4, %v3175_v42, 0  ;;  %v1401_v44 = vshrl.u32 %v1400_v37, 23  ;;  %v6327_v12 = vand.u32 8388607, %v1397_v28 }
 0x28f   : > { %v2932_v45 = vor.u32 4788187, %v2931_v63  ;;  %v1563_v56 = vshrl.u32 %v1562_v36, 30  ;;  %v3179_v7 = vand.u32 31, %v3177_v34  ;;  %v2935_v43 = vcvt.s32.f32 %v2928_v9 }
 0x290   : > { %3938 = vst [vmem:[%s5175_s14 + $0x30] sm:$0xff] %v3906_v39  ;;  %v6330_v49 = vand.u32 3, %v2946_v53  ;;  %v6334_v5 = vadd.s32 %v6271_v25, %v6290_v58  ;;  %v6336_v35 = vshll.u32 %v3173_v15, 8  ;;  %v4113_v40 = vadd.s32 4294967169, %v1401_v44 }
 0x291   : > { %v2933_v19 = vand.u32 2147483647, %v2932_v45  ;;  %v1564_v17 = vshll.u32 %v1563_v56, 30  ;;  %v3180_v55 = vsub.s32 32, %v3179_v7  ;;  %v1405_v6 = vor.u32 8388608, %v6327_v12 }
 0x292   : > { %v3178_v33 = vshrl.u32 %v3177_v34, 5  ;;  %v3182_v62 = vshll.u32 %v4678_v10, %v3179_v7  ;;  %vm1503_vm5 = vcmp.lt.s32.totalorder %v6120_v54, 0  ;;  %v3185_v58 = vshll.u32 %v4679_v14, %v3179_v7 }
 0x293   : > { %v2936_v48 = vmul.f32 %v2935_v43, %v2933_v19  ;;  %v6338_v24 = vsub.s32 %v1561_v8, %v1564_v17  ;;  %v3183_v3 = vshrl.u32 %v4679_v14, %v3180_v55  ;;  %v3186_v13 = vshrl.u32 %v4680_v16, %v3180_v55 }
 0x294   : > { %v3189_v60 = vshrl.u32 %v4681_v18, %v3180_v55  ;;  %v3188_v37 = vshll.u32 %v4680_v16, %v3179_v7  ;;  %v3191_v61 = vshll.u32 %v4681_v18, %v3179_v7  ;;  %v3192_v23 = vshrl.u32 %v4682_v20, %v3180_v55 }
 0x295   : > { %v2937_v46 = vxor.u32 2147483648, %v2936_v48  ;;  %v1567_v25 = vsub.s32 0, %v6338_v24  ;;  %v3184_v52 = vor.u32 %v3183_v3, %v3182_v62  ;;  %v3187_v11 = vor.u32 %v3186_v13, %v3185_v58 }
 0x296   : > { %v3194_v22 = vshll.u32 %v4682_v20, %v3179_v7  ;;  %v3190_v8 = vor.u32 %v3189_v60, %v3188_v37  ;;  %v3193_v2 = vor.u32 %v3192_v23, %v3191_v61  ;;  %v3195_v0 = vshrl.u32 %v4683_v27, %v3180_v55 }
 0x297   : > { %v2938_v1 = vsel %vm2855_vm12, %v2937_v46, %v2936_v48  ;;  %v4118_v42 = vmin.u32 %v1567_v25, %v6338_v24  ;;  %v1587_v63 = vsub.s32 4, %v1563_v56  ;;  %v1407_v36 = vadd.s32 1, %v4113_v40 }
 0x298   : > { %v2941_v38 = vsel %vm6298_vm15, %v6062_v31, %v2938_v1  ;;  %vm6361_vm6 = vcmp.le.f32.partialorder %v1501_v57, 0.7853982  ;;  %v3181_v53 = vshrl.u32 %v4678_v10, %v3180_v55  ;;  %v3196_v15 = vor.u32 %v3195_v0, %v3194_v22 }
 0x299   : > { %4536 = vcosq.f32 %v2941_v38  ;;  %v1569_v9 = vclz %v4118_v42  ;;  %vm3197_vm7 = vcmp.lt.s32.totalorder %v3178_v33, 1  ;;  %vm3199_vm8 = vcmp.lt.s32.totalorder %v3178_v33, 3 }
 0x29a   : > { %4538 = vsinq.f32 %v2941_v38  ;;  %vm3200_vm9 = vcmp.lt.s32.totalorder %v3178_v33, 4  ;;  %v3205_v34 = vsel %vm3197_vm7, %v3184_v52, %v3187_v11  ;;  %v3209_v7 = vsel %vm3197_vm7, %v3187_v11, %v3190_v8 }
 0x29b   : > { %v4119_v47 = vadd.s32 4294967294, %v1569_v9  ;;  %v3202_v45 = vsel %vm3200_vm9, %v3190_v8, 2102212464  ;;  %v3206_v44 = vsel %vm3200_vm9, %v3193_v2, 920167782  ;;  %vm3198_vm11 = vcmp.lt.s32.totalorder %v3178_v33, 2 }
 0x29c   : > { %v3210_v19 = vsel %vm3200_vm9, %v3196_v15, 1326507024  ;;  %v3207_v57 = vsel %vm3199_vm8, %v3190_v8, %v3206_v44  ;;  %vm2949_vm12 = vcmp.eq.s32.totalorder %v6330_v49, 0  ;;  %v1588_v55 = vsel %vm1503_vm5, %v1587_v63, %v1563_v56 }
 0x29d   : > { %vm4120_vm10 = vcmp.lt.s32.totalorder %v4119_v47, 0  ;;  %v3211_v43 = vsel %vm3199_vm8, %v3193_v2, %v3210_v19  ;;  %v3208_v48 = vsel %vm3198_vm11, %v3205_v34, %v3207_v57  ;;  %vm2948_vm13 = vcmp.lt.s32.totalorder %v6330_v49, 2 }
 0x29e   : > { %v1572_v17 = vsel %vm4120_vm10, 0, %v4119_v47  ;;  %v3212_v40 = vsel %vm3198_vm11, %v3209_v7, %v3211_v43  ;;  %v3201_v13 = vsel %vm3197_vm7, %v3181_v53, %v3184_v52  ;;  %v3203_v46 = vsel %vm3199_vm8, %v3187_v11, %v3202_v45  ;;  %v6396_v11 = vpop.f32.mrb[12].mxu0 }
 0x29f   : > { %v1573_v62 = vsub.s32 32, %v1572_v17  ;;  %v1577_v3 = vsub.s32 4294967266, %v1572_v17  ;;  %vm2945_vm14 = vweird.f32 %v6062_v31  ;;  %v1574_v37 = vshll.u32 %v6338_v24, %v1572_v17 }
 0x2a0   : > { %v6380_v25 = vmul.u32.u64.low %v6336_v35, %v3212_v40  ;;  %v6381_v58 = vmul.u32.u64.high %v6336_v35, %v3212_v40, %v6380_v25  ;;  %v6384_v56 = vmul.u32.u64.low %v6336_v35, %v3208_v48  ;;  %v6385_v60 = vmul.u32.u64.high %v6336_v35, %v3208_v48, %v6384_v56 }
 0x2a1   : > { %v1575_v61 = vshrl.u32 %v6334_v5, %v1573_v62  ;;  %v1578_v23 = vadd.s32 127, %v1577_v3  ;;  %vm1408_vm15 = vcmp.gt.s32.totalorder %v1407_v36, 0  ;;  %vm2952_vm0 = vcmp.eq.s32.totalorder %v6330_v49, 2 }
 0x2a2   : > { %v3204_v52 = vsel %vm3198_vm11, %v3201_v13, %v3203_v46  ;;  %v1409_v1 = vsel %vm1408_vm15, %v1407_v36, 0  ;;  %v6394_v42 = vshll.u32 %v1405_v6, 8  ;;  %v1590_v24 = vsel %vm6361_vm6, 0, %v1588_v55 }
 0x2a3   : > { %v4537_v22 = vpop.eup %4536  ;;  %v1576_v38 = vor.u32 %v1575_v61, %v1574_v37  ;;  %v1579_v8 = vshll.u32 %v1578_v23, 23  ;;  %v1411_v5 = vand.u32 31, %v1409_v1  ;;  %vm3222_vm2 = vc.u32 %v6381_v58, %v6384_v56 }
 0x2a4   : > { %v4539_v2 = vpop.eup %4538  ;;  %v2953_v0 = vxor.u32 2147483648, %v4537_v22  ;;  %v3223_v33 = vadd.s32 1, %v6385_v60  ;;  %v6405_v12 = vadd.f32 %v6281_v21, %v5940_v32  ;;  %v3220_v63 = vmul.u32 %v6336_v35, %v3204_v52 }
 0x2a5   : > { %v2950_v6 = vxor.u32 2147483648, %v4539_v2  ;;  %v1580_v9 = vor.u32 4788187, %v1579_v8  ;;  %v1412_v36 = vsub.s32 32, %v1411_v5  ;;  %v1594_v15 = vadd.s32 3, %v1590_v24 }
 0x2a6   : > { %v2954_v53 = vsel %vm2952_vm0, %v2953_v0, %v4539_v2  ;;  %v3224_v47 = vsel %vm3222_vm2, %v3223_v33, %v6385_v60  ;;  %v6411_v34 = vshrl.u32 %v1409_v1, 5  ;;  %v1583_v7 = vcvt.s32.f32 %v1576_v38 }
 0x2a7   : > { %v2951_v45 = vsel %vm2949_vm12, %v4537_v22, %v2950_v6  ;;  %v1581_v44 = vand.u32 2147483647, %v1580_v9  ;;  %v3225_v32 = vadd.s32 %v3224_v47, %v3220_v63  ;;  %v1414_v35 = vshll.u32 %v4678_v10, %v1411_v5 }
 0x2a8   : > { %v2955_v19 = vsel %vm2948_vm13, %v2951_v45, %v2954_v53  ;;  %v1415_v57 = vshrl.u32 %v4679_v14, %v1412_v36  ;;  %v1418_v43 = vshrl.u32 %v4680_v16, %v1412_v36  ;;  %v1421_v40 = vshrl.u32 %v4681_v18, %v1412_v36 }
 0x2a9   : > { %v2956_v17 = vsel %vm2945_vm14, nan, %v2955_v19  ;;  %v1584_v55 = vmul.f32 %v1583_v7, %v1581_v44  ;;  %v3226_v48 = vadd.s32 536870912, %v3225_v32  ;;  %v1417_v49 = vshll.u32 %v4679_v14, %v1411_v5 }
 0x2aa   : > { %v3922_v62 = vmul.f32 %v6067_v41, %v2956_v17  ;;  %v1416_v3 = vor.u32 %v1415_v57, %v1414_v35  ;;  %v1420_v13 = vshll.u32 %v4680_v16, %v1411_v5  ;;  %v1423_v60 = vshll.u32 %v4681_v18, %v1411_v5 }
 0x2ab   : > { %v1585_v46 = vxor.u32 2147483648, %v1584_v55  ;;  %v3227_v25 = vshrl.u32 %v3226_v48, 30  ;;  %v1424_v37 = vshrl.u32 %v4682_v20, %v1412_v36  ;;  %v1419_v31 = vor.u32 %v1418_v43, %v1417_v49  ;;  %v6460_v48 = vpop.f32.mrb[12].mxu1 }
 0x2ac   : > { %3954 = vst [vmem:[%s5175_s14 + $0xb0] sm:$0xff] %v3922_v62  ;;  %v1422_v61 = vor.u32 %v1421_v40, %v1420_v13  ;;  %v1426_v23 = vshll.u32 %v4682_v20, %v1411_v5  ;;  %v1427_v52 = vshrl.u32 %v4683_v27, %v1412_v36  ;;  %v6433_v1 = vand.u32 3, %v1594_v15 }
 0x2ad   : > { %v1586_v41 = vsel %vm1503_vm5, %v1585_v46, %v1584_v55  ;;  %v3228_v22 = vshll.u32 %v3227_v25, 30  ;;  %v1425_v38 = vor.u32 %v1424_v37, %v1423_v60  ;;  %v1413_v24 = vshrl.u32 %v4678_v10, %v1412_v36 }
 0x2ae   : > { %v1589_v8 = vsel %vm6361_vm6, %v6120_v54, %v1586_v41  ;;  %v1428_v2 = vor.u32 %v1427_v52, %v1426_v23  ;;  %v3064_v0 = vand.u32 2139095040, %v6405_v12  ;;  %vm1429_vm1 = vcmp.lt.s32.totalorder %v6411_v34, 1 }
 0x2af   : > { %4540 = vcosq.f32 %v1589_v8  ;;  %v6440_v5 = vsub.s32 %v3225_v32, %v3228_v22  ;;  %vm1432_vm3 = vcmp.lt.s32.totalorder %v6411_v34, 4  ;;  %vm1430_vm4 = vcmp.lt.s32.totalorder %v6411_v34, 2 }
 0x2b0   : > { %4542 = vsinq.f32 %v1589_v8  ;;  %v1434_v33 = vsel %vm1432_vm3, %v1422_v61, 2102212464  ;;  %v1437_v6 = vsel %vm1429_vm1, %v1416_v3, %v1419_v31  ;;  %v3251_v9 = vsub.s32 4, %v3227_v25 }
 0x2b1   : > { %v3231_v39 = vsub.s32 0, %v6440_v5  ;;  %vm1431_vm5 = vcmp.lt.s32.totalorder %v6411_v34, 3  ;;  %v1438_v63 = vsel %vm1432_vm3, %v1425_v38, 920167782  ;;  %v1433_v36 = vsel %vm1429_vm1, %v1413_v24, %v1416_v3 }
 0x2b2   : > { %v1439_v53 = vsel %vm1431_vm5, %v1422_v61, %v1438_v63  ;;  %v1441_v15 = vsel %vm1429_vm1, %v1419_v31, %v1422_v61  ;;  %v1442_v47 = vsel %vm1432_vm3, %v1428_v2, 1326507024  ;;  %v1435_v44 = vsel %vm1431_vm5, %v1419_v31, %v1434_v33 }
 0x2b3   : > { %v4182_v45 = vmin.u32 %v3231_v39, %v6440_v5  ;;  %v1440_v7 = vsel %vm1430_vm4, %v1437_v6, %v1439_v53  ;;  %v1443_v32 = vsel %vm1431_vm5, %v1425_v38, %v1442_v47  ;;  %vm3167_vm6 = vcmp.lt.s32.totalorder %v6227_v30, 0  ;;  %v6502_v53 = vld [vmem:[%s7611_s3] ss:$0 sm:$0xff] }
 0x2b4   : > { %v1444_v19 = vsel %vm1430_vm4, %v1441_v15, %v1443_v32  ;;  %v6454_v35 = vmul.u32.u64.low %v6394_v42, %v1440_v7  ;;  %v6455_v57 = vmul.u32.u64.high %v6394_v42, %v1440_v7, %v6454_v35  ;;  %v3252_v17 = vsel %vm3167_vm6, %v3251_v9, %v3227_v25 }
 0x2b5   : > { %v3233_v43 = vclz %v4182_v45  ;;  %v3061_v55 = vand.u32 2147483647, %v6405_v12  ;;  %v1436_v40 = vsel %vm1430_vm4, %v1433_v36, %v1435_v44  ;;  %v3065_v49 = vshrl.u32 %v3064_v0, 23 }
 0x2b6   : > { %v6465_v62 = vmul.u32.u64.low %v6394_v42, %v1444_v19  ;;  %v6466_v3 = vmul.u32.u64.high %v6394_v42, %v1444_v19, %v6465_v62  ;;  %vm1596_vm7 = vcmp.lt.s32.totalorder %v6433_v1, 2  ;;  %vm6471_vm8 = vcmp.le.f32.partialorder %v3165_v51, 0.7853982 }
 0x2b7   : > { %v4183_v46 = vadd.s32 4294967294, %v3233_v43  ;;  %vm1597_vm9 = vcmp.eq.s32.totalorder %v6433_v1, 0  ;;  %vm1600_vm10 = vcmp.eq.s32.totalorder %v6433_v1, 2  ;;  %v1455_v34 = vadd.s32 1, %v6455_v57 }
 0x2b8   : > { %v4177_v25 = vadd.s32 4294967169, %v3065_v49  ;;  %v3221_v37 = vadd.s32 %v6384_v56, %v6381_v58  ;;  %v3254_v31 = vsel %vm6471_vm8, 0, %v3252_v17  ;;  %v1452_v51 = vmul.u32 %v6394_v42, %v1436_v40 }
 0x2b9   : > { %v4541_v60 = vpop.eup %4540  ;;  %vm4184_vm11 = vcmp.lt.s32.totalorder %v4183_v46, 0  ;;  %vm1454_vm12 = vc.u32 %v6466_v3, %v6454_v35  ;;  %v3068_v41 = vand.u32 8388607, %v3061_v55  ;;  %v6488_v58 = vadd.f32 %v6281_v21, %v6056_v29 }
 0x2ba   : > { %v4543_v61 = vpop.eup %4542  ;;  %v1601_v23 = vxor.u32 2147483648, %v4541_v60  ;;  %v3236_v52 = vsel %vm4184_vm11, 0, %v4183_v46  ;;  %v1456_v24 = vsel %vm1454_vm12, %v1455_v34, %v6455_v57  ;;  %v3071_v2 = vadd.s32 1, %v4177_v25 }
 0x2bb   : > { %v1598_v22 = vxor.u32 2147483648, %v4543_v61  ;;  %v3237_v38 = vsub.s32 32, %v3236_v52  ;;  %v3241_v8 = vsub.s32 4294967266, %v3236_v52  ;;  %v3238_v42 = vshll.u32 %v6440_v5, %v3236_v52 }
 0x2bc   : > { %v1602_v56 = vsel %vm1600_vm10, %v1601_v23, %v4543_v61  ;;  %v1457_v39 = vadd.s32 %v1456_v24, %v1452_v51  ;;  %vm1593_vm13 = vweird.f32 %v6120_v54  ;;  %vm3072_vm14 = vcmp.gt.s32.totalorder %v3071_v2, 0 }
 0x2bd   : > { %v1599_v0 = vsel %vm1597_vm9, %v4541_v60, %v1598_v22  ;;  %v3239_v33 = vshrl.u32 %v3221_v37, %v3237_v38  ;;  %v3242_v6 = vadd.s32 127, %v3241_v8  ;;  %v3258_v47 = vadd.s32 3, %v3254_v31 }
 0x2be   : > { %v1603_v29 = vsel %vm1596_vm7, %v1599_v0, %v1602_v56  ;;  %v1458_v5 = vadd.s32 536870912, %v1457_v39  ;;  %v3073_v45 = vsel %vm3072_vm14, %v3071_v2, 0  ;;  %v3069_v54 = vor.u32 8388608, %v3068_v41 }
 0x2bf   : > { %v1604_v9 = vsel %vm1593_vm13, nan, %v1603_v29  ;;  %v3240_v63 = vor.u32 %v3239_v33, %v3238_v42  ;;  %v3243_v36 = vshll.u32 %v3242_v6, 23  ;;  %v1712_v1 = vand.u32 2139095040, %v6488_v58 }
 0x2c0   : > { %v3909_v15 = vmul.f32 %v6502_v53, %v1604_v9  ;;  %v1459_v7 = vshrl.u32 %v1458_v5, 30  ;;  %v3075_v32 = vand.u32 31, %v3073_v45  ;;  %v6507_v17 = vand.u32 3, %v3258_v47 }
 0x2c1   : > { %v3244_v44 = vor.u32 4788187, %v3243_v36  ;;  %v3247_v57 = vcvt.s32.f32 %v3240_v63  ;;  %v1453_v40 = vadd.s32 %v6454_v35, %v6466_v3  ;;  %v1709_v49 = vand.u32 2147483647, %v6488_v58 }
 0x2c2   : > { %3941 = vst [vmem:[%s5175_s14 + $0x48] sm:$0xff] %v3909_v15  ;;  %v1460_v43 = vshll.u32 %v1459_v7, 30  ;;  %v3076_v62 = vsub.s32 32, %v3075_v32  ;;  %v6513_v25 = vshll.u32 %v3069_v54, 8  ;;  %v1713_v60 = vshrl.u32 %v1712_v1, 23 }
 0x2c3   : > { %v3245_v19 = vand.u32 2147483647, %v3244_v44  ;;  %v6515_v37 = vshrl.u32 %v3073_v45, 5  ;;  %v3078_v31 = vshll.u32 %v4678_v10, %v3075_v32  ;;  %vm1399_vm15 = vcmp.lt.s32.totalorder %v6285_v59, 0 }
 0x2c4   : > { %v6511_v34 = vsub.s32 %v1457_v39, %v1460_v43  ;;  %v3079_v51 = vshrl.u32 %v4679_v14, %v3076_v62  ;;  %v3082_v61 = vshrl.u32 %v4680_v16, %v3076_v62  ;;  %v3081_v3 = vshll.u32 %v4679_v14, %v3075_v32 }
 0x2c5   : > { %v3248_v46 = vmul.f32 %v3247_v57, %v3245_v19  ;;  %v3085_v52 = vshrl.u32 %v4681_v18, %v3076_v62  ;;  %v3084_v22 = vshll.u32 %v4680_v16, %v3075_v32  ;;  %v3087_v38 = vshll.u32 %v4681_v18, %v3075_v32 }
 0x2c6   : > { %v1463_v35 = vsub.s32 0, %v6511_v34  ;;  %v3080_v41 = vor.u32 %v3079_v51, %v3078_v31  ;;  %v3088_v8 = vshrl.u32 %v4682_v20, %v3076_v62  ;;  %v3083_v24 = vor.u32 %v3082_v61, %v3081_v3  ;;  %v6564_v61 = vpop.f32.mrb[13].mxu0 }
 0x2c7   : > { %v3249_v23 = vxor.u32 2147483648, %v3248_v46  ;;  %v3090_v2 = vshll.u32 %v4682_v20, %v3075_v32  ;;  %v3086_v33 = vor.u32 %v3085_v52, %v3084_v22  ;;  %v3091_v39 = vshrl.u32 %v4683_v27, %v3076_v62 }
 0x2c8   : > { %v4114_v42 = vmin.u32 %v1463_v35, %v6511_v34  ;;  %v3089_v6 = vor.u32 %v3088_v8, %v3087_v38  ;;  %v1483_v9 = vsub.s32 4, %v1459_v7  ;;  %v4125_v63 = vadd.s32 4294967169, %v1713_v60 }
 0x2c9   : > { %v3250_v56 = vsel %vm3167_vm6, %v3249_v23, %v3248_v46  ;;  %v3077_v36 = vshrl.u32 %v4678_v10, %v3076_v62  ;;  %v3092_v5 = vor.u32 %v3091_v39, %v3090_v2  ;;  %vm3093_vm0 = vcmp.lt.s32.totalorder %v6515_v37, 1 }
 0x2ca   : > { %v3253_v0 = vsel %vm6471_vm8, %v6227_v30, %v3250_v56  ;;  %v1465_v29 = vclz %v4114_v42  ;;  %vm6539_vm2 = vcmp.le.f32.partialorder %v1397_v28, 0.7853982  ;;  %vm3095_vm1 = vcmp.lt.s32.totalorder %v6515_v37, 3 }
 0x2cb   : > { %4544 = vcosq.f32 %v3253_v0  ;;  %vm3096_vm3 = vcmp.lt.s32.totalorder %v6515_v37, 4  ;;  %v3101_v47 = vsel %vm3093_vm0, %v3080_v41, %v3083_v24  ;;  %v3105_v54 = vsel %vm3093_vm0, %v3083_v24, %v3086_v33 }
 0x2cc   : > { %4546 = vsinq.f32 %v3253_v0  ;;  %v4115_v13 = vadd.s32 4294967294, %v1465_v29  ;;  %v3098_v45 = vsel %vm3096_vm3, %v3086_v33, 2102212464  ;;  %v3102_v44 = vsel %vm3096_vm3, %v3089_v6, 920167782 }
 0x2cd   : > { %v3106_v1 = vsel %vm3096_vm3, %v3092_v5, 1326507024  ;;  %vm3094_vm5 = vcmp.lt.s32.totalorder %v6515_v37, 2  ;;  %v3103_v28 = vsel %vm3095_vm1, %v3086_v33, %v3102_v44  ;;  %v1484_v57 = vsel %vm1399_vm15, %v1483_v9, %v1459_v7 }
 0x2ce   : > { %vm4116_vm4 = vcmp.lt.s32.totalorder %v4115_v13, 0  ;;  %v3107_v32 = vsel %vm3095_vm1, %v3089_v6, %v3106_v1  ;;  %v3104_v43 = vsel %vm3094_vm5, %v3101_v47, %v3103_v28  ;;  %v3097_v31 = vsel %vm3093_vm0, %v3077_v36, %v3080_v41 }
 0x2cf   : > { %v1468_v19 = vsel %vm4116_vm4, 0, %v4115_v13  ;;  %v3108_v62 = vsel %vm3094_vm5, %v3105_v54, %v3107_v32  ;;  %v3099_v51 = vsel %vm3095_vm1, %v3083_v24, %v3098_v45  ;;  %vm3257_vm6 = vweird.f32 %v6227_v30 }
 0x2d0   : > { %v1469_v46 = vsub.s32 32, %v1468_v19  ;;  %v1473_v60 = vsub.s32 4294967266, %v1468_v19  ;;  %v6568_v7 = vmul.u32.u64.low %v6513_v25, %v3108_v62  ;;  %v6569_v23 = vmul.u32.u64.high %v6513_v25, %v3108_v62, %v6568_v7 }
 0x2d1   : > { %v6572_v35 = vmul.u32.u64.low %v6513_v25, %v3104_v43  ;;  %v6573_v3 = vmul.u32.u64.high %v6513_v25, %v3104_v43, %v6572_v35  ;;  %v1470_v52 = vshll.u32 %v6511_v34, %v1468_v19  ;;  %v1719_v38 = vadd.s32 1, %v4125_v63 }
 0x2d2   : > { %v1471_v22 = vshrl.u32 %v1453_v40, %v1469_v46  ;;  %v1474_v41 = vadd.s32 127, %v1473_v60  ;;  %vm3260_vm7 = vcmp.lt.s32.totalorder %v6507_v17, 2  ;;  %vm3261_vm8 = vcmp.eq.s32.totalorder %v6507_v17, 0 }
 0x2d3   : > { %vm3264_vm9 = vcmp.eq.s32.totalorder %v6507_v17, 2  ;;  %v3100_v8 = vsel %vm3094_vm5, %v3097_v31, %v3099_v51  ;;  %v1716_v2 = vand.u32 8388607, %v1709_v49  ;;  %vm1720_vm10 = vcmp.gt.s32.totalorder %v1719_v38, 0 }
 0x2d4   : > { %v1472_v42 = vor.u32 %v1471_v22, %v1470_v52  ;;  %v1475_v24 = vshll.u32 %v1474_v41, 23  ;;  %v1486_v0 = vsel %vm6539_vm2, 0, %v1484_v57  ;;  %vm3118_vm11 = vc.u32 %v6569_v23, %v6572_v35 }
 0x2d5   : > { %v4545_v56 = vpop.eup %4544  ;;  %v3119_v33 = vadd.s32 1, %v6573_v3  ;;  %v3116_v39 = vmul.u32 %v6513_v25, %v3100_v8  ;;  %v1721_v29 = vsel %vm1720_vm10, %v1719_v38, 0  ;;  %v6595_v5 = vadd.f32 %v6281_v21, %v6124_v4 }
 0x2d6   : > { %v4547_v34 = vpop.eup %4546  ;;  %v3265_v40 = vxor.u32 2147483648, %v4545_v56  ;;  %v1476_v37 = vor.u32 4788187, %v1475_v24  ;;  %v1723_v36 = vand.u32 31, %v1721_v29  ;;  %v1479_v45 = vcvt.s32.f32 %v1472_v42 }
 0x2d7   : > { %v3262_v6 = vxor.u32 2147483648, %v4547_v34  ;;  %v3120_v63 = vsel %vm3118_vm11, %v3119_v33, %v6573_v3  ;;  %v1490_v54 = vadd.s32 3, %v1486_v0  ;;  %v1717_v1 = vor.u32 8388608, %v1716_v2 }
 0x2d8   : > { %v3266_v9 = vsel %vm3264_vm9, %v3265_v40, %v4547_v34  ;;  %v1477_v47 = vand.u32 2147483647, %v1476_v37  ;;  %v3121_v44 = vadd.s32 %v3120_v63, %v3116_v39  ;;  %v1724_v28 = vsub.s32 32, %v1723_v36 }
 0x2d9   : > { %v3263_v13 = vsel %vm3261_vm8, %v4545_v56, %v3262_v6  ;;  %v1722_v4 = vshrl.u32 %v1721_v29, 5  ;;  %v1726_v62 = vshll.u32 %v4678_v10, %v1723_v36  ;;  %v1729_v51 = vshll.u32 %v4679_v14, %v1723_v36 }
 0x2da   : > { %v3267_v25 = vsel %vm3260_vm7, %v3263_v13, %v3266_v9  ;;  %v1480_v19 = vmul.f32 %v1479_v45, %v1477_v47  ;;  %v3122_v57 = vadd.s32 536870912, %v3121_v44  ;;  %v1727_v46 = vshrl.u32 %v4679_v14, %v1724_v28 }
 0x2db   : > { %v3268_v32 = vsel %vm3257_vm6, nan, %v3267_v25  ;;  %v1730_v60 = vshrl.u32 %v4680_v16, %v1724_v28  ;;  %v1733_v7 = vshrl.u32 %v4681_v18, %v1724_v28  ;;  %v1732_v3 = vshll.u32 %v4680_v16, %v1723_v36 }
 0x2dc   : > { %v3925_v43 = vmul.f32 %v6502_v53, %v3268_v32  ;;  %v1481_v17 = vxor.u32 2147483648, %v1480_v19  ;;  %v6607_v31 = vshrl.u32 %v3122_v57, 30  ;;  %v1728_v30 = vor.u32 %v1727_v46, %v1726_v62  ;;  %v6647_v62 = vpop.f32.mrb[13].mxu1 }
 0x2dd   : > { %v1735_v52 = vshll.u32 %v4681_v18, %v1723_v36  ;;  %v1736_v22 = vshrl.u32 %v4682_v20, %v1724_v28  ;;  %v1731_v8 = vor.u32 %v1730_v60, %v1729_v51  ;;  %v1738_v56 = vshll.u32 %v4682_v20, %v1723_v36 }
 0x2de   : > { %3957 = vst [vmem:[%s5175_s14 + $0xc8] sm:$0xff] %v3925_v43  ;;  %v1482_v41 = vsel %vm1399_vm15, %v1481_v17, %v1480_v19  ;;  %v3124_v38 = vshll.u32 %v6607_v31, 30  ;;  %v1734_v24 = vor.u32 %v1733_v7, %v1732_v3  ;;  %v1739_v34 = vshrl.u32 %v4683_v27, %v1724_v28 }
 0x2df   : > { %v1485_v42 = vsel %vm6539_vm2, %v6285_v59, %v1482_v41  ;;  %v1737_v2 = vor.u32 %v1736_v22, %v1735_v52  ;;  %v6627_v0 = vadd.f32 %v6281_v21, %v6206_v50  ;;  %v1491_v33 = vand.u32 3, %v1490_v54 }
 0x2e0   : > { %4548 = vcosq.f32 %v1485_v42  ;;  %v6623_v40 = vsub.s32 %v3121_v44, %v3124_v38  ;;  %v1740_v6 = vor.u32 %v1739_v34, %v1738_v56  ;;  %v3376_v37 = vand.u32 2139095040, %v6595_v5 }
 0x2e1   : > { %4550 = vsinq.f32 %v1485_v42  ;;  %vm3063_vm12 = vcmp.lt.s32.totalorder %v6405_v12, 0  ;;  %vm1741_vm13 = vcmp.lt.s32.totalorder %v1722_v4, 1  ;;  %vm1744_vm14 = vcmp.lt.s32.totalorder %v1722_v4, 4 }
 0x2e2   : > { %v3127_v15 = vsub.s32 0, %v6623_v40  ;;  %v1757_v39 = vshll.u32 %v1717_v1, 8  ;;  %vm1743_vm15 = vcmp.lt.s32.totalorder %v1722_v4, 3  ;;  %v1746_v29 = vsel %vm1744_vm14, %v1734_v24, 2102212464 }
 0x2e3   : > { %v1749_v9 = vsel %vm1741_vm13, %v1728_v30, %v1731_v8  ;;  %v1750_v63 = vsel %vm1744_vm14, %v1737_v2, 920167782  ;;  %v1725_v36 = vshrl.u32 %v4678_v10, %v1724_v28  ;;  %vm1742_vm0 = vcmp.lt.s32.totalorder %v1722_v4, 2 }
 0x2e4   : > { %v4178_v50 = vmin.u32 %v3127_v15, %v6623_v40  ;;  %v1751_v13 = vsel %vm1743_vm15, %v1734_v24, %v1750_v63  ;;  %v1753_v45 = vsel %vm1741_vm13, %v1731_v8, %v1734_v24  ;;  %v1754_v44 = vsel %vm1744_vm14, %v1740_v6, 1326507024 }
 0x2e5   : > { %v1752_v47 = vsel %vm1742_vm0, %v1749_v9, %v1751_v13  ;;  %v3377_v25 = vshrl.u32 %v3376_v37, 23  ;;  %vm1492_vm2 = vcmp.lt.s32.totalorder %v1491_v33, 2  ;;  %v1745_v1 = vsel %vm1741_vm13, %v1725_v36, %v1728_v30 }
 0x2e6   : > { %v3129_v54 = vclz %v4178_v50  ;;  %v1747_v32 = vsel %vm1743_vm15, %v1731_v8, %v1746_v29  ;;  %vm1489_vm1 = vweird.f32 %v6285_v59  ;;  %v3147_v19 = vsub.s32 4, %v6607_v31 }
 0x2e7   : > { %v1755_v28 = vsel %vm1743_vm15, %v1737_v2, %v1754_v44  ;;  %v6643_v57 = vmul.u32.u64.low %v1757_v39, %v1752_v47  ;;  %v6644_v43 = vmul.u32.u64.high %v1757_v39, %v1752_v47, %v6643_v57  ;;  %vm1493_vm3 = vcmp.eq.s32.totalorder %v1491_v33, 0 }
 0x2e8   : > { %v4179_v46 = vadd.s32 4294967294, %v3129_v54  ;;  %v1756_v60 = vsel %vm1742_vm0, %v1753_v45, %v1755_v28  ;;  %v4189_v17 = vadd.s32 4294967169, %v3377_v25  ;;  %vm1496_vm4 = vcmp.eq.s32.totalorder %v1491_v33, 2 }
 0x2e9   : > { %v1748_v51 = vsel %vm1742_vm0, %v1745_v1, %v1747_v32  ;;  %v6651_v7 = vmul.u32.u64.low %v1757_v39, %v1756_v60  ;;  %v6652_v30 = vmul.u32.u64.high %v1757_v39, %v1756_v60, %v6651_v7  ;;  %v3117_v52 = vadd.s32 %v6572_v35, %v6569_v23 }
 0x2ea   : > { %v4549_v3 = vpop.eup %4548  ;;  %vm4180_vm5 = vcmp.lt.s32.totalorder %v4179_v46, 0  ;;  %v3373_v22 = vand.u32 2147483647, %v6595_v5  ;;  %v3383_v41 = vadd.s32 1, %v4189_v17  ;;  %v3148_v42 = vsel %vm3063_vm12, %v3147_v19, %v6607_v31 }
 0x2eb   : > { %v4551_v38 = vpop.eup %4550  ;;  %v1497_v8 = vxor.u32 2147483648, %v4549_v3  ;;  %v3132_v56 = vsel %vm4180_vm5, 0, %v4179_v46  ;;  %v1767_v4 = vadd.s32 1, %v6644_v43  ;;  %v1764_v6 = vmul.u32 %v1757_v39, %v1748_v51 }
 0x2ec   : > { %v1494_v24 = vxor.u32 2147483648, %v4551_v38  ;;  %v3133_v2 = vsub.s32 32, %v3132_v56  ;;  %v3137_v34 = vsub.s32 4294967266, %v3132_v56  ;;  %v3134_v23 = vshll.u32 %v6623_v40, %v3132_v56 }
 0x2ed   : > { %v1498_v37 = vsel %vm1496_vm4, %v1497_v8, %v4551_v38  ;;  %vm1766_vm6 = vc.u32 %v6652_v30, %v6643_v57  ;;  %vm3384_vm7 = vcmp.gt.s32.totalorder %v3383_v41, 0  ;;  %v3380_v39 = vand.u32 8388607, %v3373_v22 }
 0x2ee   : > { %v1495_v35 = vsel %vm1493_vm3, %v4549_v3, %v1494_v24  ;;  %v3135_v15 = vshrl.u32 %v3117_v52, %v3133_v2  ;;  %v3138_v29 = vadd.s32 127, %v3137_v34  ;;  %v1768_v31 = vsel %vm1766_vm6, %v1767_v4, %v6644_v43 }
 0x2ef   : > { %v1499_v9 = vsel %vm1492_vm2, %v1495_v35, %v1498_v37  ;;  %v1769_v63 = vadd.s32 %v1768_v31, %v1764_v6  ;;  %v3385_v50 = vsel %vm3384_vm7, %v3383_v41, 0  ;;  %vm6675_vm8 = vcmp.le.f32.partialorder %v3061_v55, 0.7853982 }
 0x2f0   : > { %v1500_v40 = vsel %vm1489_vm1, nan, %v1499_v9  ;;  %v3136_v36 = vor.u32 %v3135_v15, %v3134_v23  ;;  %v3139_v13 = vshll.u32 %v3138_v29, 23  ;;  %v3387_v44 = vand.u32 31, %v3385_v50 }
 0x2f1   : > { %v3908_v47 = vmul.f32 %v6502_v53, %v1500_v40  ;;  %v1770_v33 = vadd.s32 536870912, %v1769_v63  ;;  %v3150_v54 = vsel %vm6675_vm8, 0, %v3148_v42  ;;  %v1605_v1 = vand.u32 2147483647, %v6627_v0 }
 0x2f2   : > { %v3140_v25 = vor.u32 4788187, %v3139_v13  ;;  %v6684_v59 = vadd.f32 %v6281_v21, %v6292_v26  ;;  %v3381_v19 = vor.u32 8388608, %v3380_v39  ;;  %v3388_v55 = vsub.s32 32, %v3387_v44 }
 0x2f3   : > { %3940 = vst [vmem:[%s5175_s14 + $0x40] sm:$0xff] %v3908_v47  ;;  %v6687_v32 = vshrl.u32 %v1770_v33, 30  ;;  %v1608_v28 = vand.u32 2139095040, %v6627_v0  ;;  %v3143_v46 = vcvt.s32.f32 %v3136_v36  ;;  %v6690_v60 = vshrl.u32 %v3385_v50, 5 }
 0x2f4   : > { %v3141_v43 = vand.u32 2147483647, %v3140_v25  ;;  %v3390_v17 = vshll.u32 %v4678_v10, %v3387_v44  ;;  %v3391_v7 = vshrl.u32 %v4679_v14, %v3388_v55  ;;  %v3393_v21 = vshll.u32 %v4679_v14, %v3387_v44 }
 0x2f5   : > { %v1772_v51 = vshll.u32 %v6687_v32, 30  ;;  %v3396_v26 = vshll.u32 %v4680_v16, %v3387_v44  ;;  %v3394_v52 = vshrl.u32 %v4680_v16, %v3388_v55  ;;  %v3397_v41 = vshrl.u32 %v4681_v18, %v3388_v55 }
 0x2f6   : > { %v3144_v3 = vmul.f32 %v3143_v46, %v3141_v43  ;;  %v3400_v38 = vshrl.u32 %v4682_v20, %v3388_v55  ;;  %v3154_v8 = vadd.s32 3, %v3150_v54  ;;  %v3399_v42 = vshll.u32 %v4681_v18, %v3387_v44 }
 0x2f7   : > { %v6700_v56 = vsub.s32 %v1769_v63, %v1772_v51  ;;  %v3403_v4 = vshrl.u32 %v4683_v27, %v3388_v55  ;;  %v3392_v2 = vor.u32 %v3391_v7, %v3390_v17  ;;  %v3395_v34 = vor.u32 %v3394_v52, %v3393_v21 }
 0x2f8   : > { %v3145_v24 = vxor.u32 2147483648, %v3144_v3  ;;  %v3398_v6 = vor.u32 %v3397_v41, %v3396_v26  ;;  %v3401_v23 = vor.u32 %v3400_v38, %v3399_v42  ;;  %v3402_v35 = vshll.u32 %v4682_v20, %v3387_v44 }
 0x2f9   : > { %v1775_v37 = vsub.s32 0, %v6700_v56  ;;  %v6706_v15 = vshll.u32 %v3381_v19, 8  ;;  %vm1711_vm9 = vcmp.lt.s32.totalorder %v6488_v58, 0  ;;  %v3389_v31 = vshrl.u32 %v4678_v10, %v3388_v55 }
 0x2fa   : > { %v3146_v29 = vsel %vm3063_vm12, %v3145_v24, %v3144_v3  ;;  %vm3405_vm10 = vcmp.lt.s32.totalorder %v6690_v60, 1  ;;  %v1609_v9 = vshrl.u32 %v1608_v28, 23  ;;  %v3404_v50 = vor.u32 %v3403_v4, %v3402_v35 }
 0x2fb   : > { %v3149_v63 = vsel %vm6675_vm8, %v6405_v12, %v3146_v29  ;;  %v4126_v39 = vmin.u32 %v1775_v37, %v6700_v56  ;;  %vm3408_vm11 = vcmp.lt.s32.totalorder %v6690_v60, 4  ;;  %v3413_v36 = vsel %vm3405_vm10, %v3392_v2, %v3395_v34 }
 0x2fc   : > { %4552 = vcosq.f32 %v3149_v63  ;;  %v3410_v40 = vsel %vm3408_vm11, %v3398_v6, 2102212464  ;;  %v3414_v13 = vsel %vm3408_vm11, %v3401_v23, 920167782  ;;  %vm3406_vm12 = vcmp.lt.s32.totalorder %v6690_v60, 2 }
 0x2fd   : > { %4554 = vsinq.f32 %v3149_v63  ;;  %v1777_v47 = vclz %v4126_v39  ;;  %vm3407_vm13 = vcmp.lt.s32.totalorder %v6690_v60, 3  ;;  %v1795_v45 = vsub.s32 4, %v6687_v32 }
 0x2fe   : > { %v3409_v33 = vsel %vm3405_vm10, %v3389_v31, %v3392_v2  ;;  %v3415_v44 = vsel %vm3407_vm13, %v3398_v6, %v3414_v13  ;;  %v3417_v25 = vsel %vm3405_vm10, %v3395_v34, %v3398_v6  ;;  %v3411_v19 = vsel %vm3407_vm13, %v3395_v34, %v3410_v40 }
 0x2ff   : > { %v4127_v54 = vadd.s32 4294967294, %v1777_v47  ;;  %v3416_v55 = vsel %vm3406_vm12, %v3413_v36, %v3415_v44  ;;  %v3418_v28 = vsel %vm3408_vm11, %v3404_v50, 1326507024  ;;  %v4121_v51 = vadd.s32 4294967169, %v1609_v9 }
 0x300   : > { %v3419_v43 = vsel %vm3407_vm13, %v3401_v23, %v3418_v28  ;;  %v6736_v46 = vmul.u32.u64.low %v6706_v15, %v3416_v55  ;;  %v6737_v17 = vmul.u32.u64.high %v6706_v15, %v3416_v55, %v6736_v46  ;;  %vm6742_vm14 = vcmp.le.f32.partialorder %v1709_v49, 0.7853982 }
 0x301   : > { %v1765_v21 = vadd.s32 %v6643_v57, %v6652_v30  ;;  %vm4128_vm15 = vcmp.lt.s32.totalorder %v4127_v54, 0  ;;  %v3420_v26 = vsel %vm3406_vm12, %v3417_v25, %v3419_v43  ;;  %v1615_v38 = vadd.s32 1, %v4121_v51 }
 0x302   : > { %v1780_v3 = vsel %vm4128_vm15, 0, %v4127_v54  ;;  %v6751_v52 = vmul.u32.u64.low %v6706_v15, %v3420_v26  ;;  %v6752_v41 = vmul.u32.u64.high %v6706_v15, %v3420_v26, %v6751_v52  ;;  %vm3153_vm0 = vweird.f32 %v6405_v12 }
 0x303   : > { %v1781_v42 = vsub.s32 32, %v1780_v3  ;;  %v1785_v49 = vsub.s32 4294967266, %v1780_v3  ;;  %v1796_v4 = vsel %vm1711_vm9, %v1795_v45, %v6687_v32  ;;  %v3412_v57 = vsel %vm3406_vm12, %v3409_v33, %v3411_v19 }
 0x304   : > { %v3155_v30 = vand.u32 3, %v3154_v8  ;;  %v3431_v24 = vadd.s32 1, %v6737_v17  ;;  %v1612_v2 = vand.u32 8388607, %v1605_v1  ;;  %vm1616_vm2 = vcmp.gt.s32.totalorder %v1615_v38, 0 }
 0x305   : > { %v1782_v34 = vshll.u32 %v6700_v56, %v1780_v3  ;;  %v1783_v6 = vshrl.u32 %v1765_v21, %v1781_v42  ;;  %v1786_v37 = vadd.s32 127, %v1785_v49  ;;  %v1617_v23 = vsel %vm1616_vm2, %v1615_v38, 0  ;;  %v6770_v56 = vpop.f32.mrb[14].mxu0 }
 0x306   : > { %v4553_v35 = vpop.eup %4552  ;;  %v1798_v29 = vsel %vm6742_vm14, 0, %v1796_v4  ;;  %v3428_v32 = vmul.u32 %v6706_v15, %v3412_v57  ;;  %vm3430_vm1 = vc.u32 %v6752_v41, %v6736_v46  ;;  %v1619_v60 = vand.u32 31, %v1617_v23 }
 0x307   : > { %v4555_v8 = vpop.eup %4554  ;;  %v3161_v31 = vxor.u32 2147483648, %v4553_v35  ;;  %v1784_v9 = vor.u32 %v1783_v6, %v1782_v34  ;;  %v1787_v63 = vshll.u32 %v1786_v37, 23  ;;  %v3432_v39 = vsel %vm3430_vm1, %v3431_v24, %v6737_v17 }
 0x308   : > { %v3158_v50 = vxor.u32 2147483648, %v4555_v8  ;;  %vm3160_vm3 = vcmp.eq.s32.totalorder %v3155_v30, 2  ;;  %v3433_v40 = vadd.s32 %v3432_v39, %v3428_v32  ;;  %v1620_v36 = vsub.s32 32, %v1619_v60 }
 0x309   : > { %vm3156_vm4 = vcmp.lt.s32.totalorder %v3155_v30, 2  ;;  %vm3157_vm5 = vcmp.eq.s32.totalorder %v3155_v30, 0  ;;  %v3162_v13 = vsel %vm3160_vm3, %v3161_v31, %v4555_v8  ;;  %v1788_v15 = vor.u32 4788187, %v1787_v63 }
 0x30a   : > { %v3159_v47 = vsel %vm3157_vm5, %v4553_v35, %v3158_v50  ;;  %v1802_v45 = vadd.s32 3, %v1798_v29  ;;  %v3434_v33 = vadd.s32 536870912, %v3433_v40  ;;  %v1613_v44 = vor.u32 8388608, %v1612_v2 }
 0x30b   : > { %v3163_v25 = vsel %vm3156_vm4, %v3159_v47, %v3162_v13  ;;  %v1789_v54 = vand.u32 2147483647, %v1788_v15  ;;  %v1791_v19 = vcvt.s32.f32 %v1784_v9  ;;  %v1618_v55 = vshrl.u32 %v1617_v23, 5 }
 0x30c   : > { %v3164_v28 = vsel %vm3153_vm0, nan, %v3163_v25  ;;  %v6774_v43 = vshrl.u32 %v3434_v33, 30  ;;  %v1623_v17 = vshrl.u32 %v4679_v14, %v1620_v36  ;;  %v1629_v51 = vshrl.u32 %v4681_v18, %v1620_v36 }
 0x30d   : > { %v3924_v21 = vmul.f32 %v6502_v53, %v3164_v28  ;;  %v1792_v26 = vmul.f32 %v1791_v19, %v1789_v54  ;;  %v1622_v3 = vshll.u32 %v4678_v10, %v1619_v60  ;;  %v1626_v52 = vshrl.u32 %v4680_v16, %v1620_v36 }
 0x30e   : > { %v3436_v38 = vshll.u32 %v6774_v43, 30  ;;  %v1625_v42 = vshll.u32 %v4679_v14, %v1619_v60  ;;  %v1628_v12 = vshll.u32 %v4680_v16, %v1619_v60  ;;  %v1632_v49 = vshrl.u32 %v4682_v20, %v1620_v36 }
 0x30f   : > { %3956 = vst [vmem:[%s5175_s14 + $0xc0] sm:$0xff] %v3924_v21  ;;  %v1793_v4 = vxor.u32 2147483648, %v1792_v26  ;;  %v1631_v57 = vshll.u32 %v4681_v18, %v1619_v60  ;;  %v1634_v30 = vshll.u32 %v4682_v20, %v1619_v60  ;;  %v1635_v24 = vshrl.u32 %v4683_v27, %v1620_v36 }
 0x310   : > { %v6789_v2 = vsub.s32 %v3433_v40, %v3436_v38  ;;  %v1624_v34 = vor.u32 %v1623_v17, %v1622_v3  ;;  %v1630_v6 = vor.u32 %v1629_v51, %v1628_v12  ;;  %v1627_v23 = vor.u32 %v1626_v52, %v1625_v42  ;;  %v6805_v51 = vpop.f32.mrb[14].mxu1 }
 0x311   : > { %v1794_v37 = vsel %vm1711_vm9, %v1793_v4, %v1792_v26  ;;  %v1633_v35 = vor.u32 %v1632_v49, %v1631_v57  ;;  %v1636_v29 = vor.u32 %v1635_v24, %v1634_v30  ;;  %v6796_v8 = vand.u32 3, %v1802_v45 }
 0x312   : > { %v1797_v32 = vsel %vm6742_vm14, %v6488_v58, %v1794_v37  ;;  %v3439_v60 = vsub.s32 0, %v6789_v2  ;;  %v1653_v31 = vshll.u32 %v1613_v44, 8  ;;  %v1621_v9 = vshrl.u32 %v4678_v10, %v1620_v36 }
 0x313   : > { %4556 = vcosq.f32 %v1797_v32  ;;  %vm1640_vm6 = vcmp.lt.s32.totalorder %v1618_v55, 4  ;;  %v3272_v63 = vand.u32 2139095040, %v6684_v59  ;;  %vm1637_vm7 = vcmp.lt.s32.totalorder %v1618_v55, 1 }
 0x314   : > { %4558 = vsinq.f32 %v1797_v32  ;;  %v4190_v39 = vmin.u32 %v3439_v60, %v6789_v2  ;;  %v1642_v50 = vsel %vm1640_vm6, %v1630_v6, 2102212464  ;;  %v1645_v40 = vsel %vm1637_vm7, %v1624_v34, %v1627_v23 }
 0x315   : > { %v1646_v13 = vsel %vm1640_vm6, %v1633_v35, 920167782  ;;  %v1649_v7 = vsel %vm1637_vm7, %v1627_v23, %v1630_v6  ;;  %v1650_v15 = vsel %vm1640_vm6, %v1636_v29, 1326507024  ;;  %v3459_v45 = vsub.s32 4, %v6774_v43 }
 0x316   : > { %v3441_v47 = vclz %v4190_v39  ;;  %vm1638_vm8 = vcmp.lt.s32.totalorder %v1618_v55, 2  ;;  %vm1639_vm9 = vcmp.lt.s32.totalorder %v1618_v55, 3  ;;  %v1641_v33 = vsel %vm1637_vm7, %v1621_v9, %v1624_v34 }
 0x317   : > { %v1643_v44 = vsel %vm1639_vm9, %v1627_v23, %v1642_v50  ;;  %v1647_v36 = vsel %vm1639_vm9, %v1630_v6, %v1646_v13  ;;  %v1651_v25 = vsel %vm1639_vm9, %v1633_v35, %v1650_v15  ;;  %v3273_v17 = vshrl.u32 %v3272_v63, 23 }
 0x318   : > { %v4191_v54 = vadd.s32 4294967294, %v3441_v47  ;;  %v1648_v19 = vsel %vm1638_vm8, %v1645_v40, %v1647_v36  ;;  %v1652_v28 = vsel %vm1638_vm8, %v1649_v7, %v1651_v25  ;;  %vm1801_vm10 = vweird.f32 %v6488_v58 }
 0x319   : > { %v6807_v21 = vmul.u32.u64.low %v1653_v31, %v1652_v28  ;;  %v6808_v26 = vmul.u32.u64.high %v1653_v31, %v1652_v28, %v6807_v21  ;;  %v6810_v3 = vmul.u32.u64.low %v1653_v31, %v1648_v19  ;;  %v6811_v52 = vmul.u32.u64.high %v1653_v31, %v1648_v19, %v6810_v3  ;;  %v6851_v19 = vld [vmem:[%s7610_s2] ss:$0 sm:$0xff] }
 0x31a   : > { %vm3375_vm11 = vcmp.lt.s32.totalorder %v6595_v5, 0  ;;  %vm4192_vm12 = vcmp.lt.s32.totalorder %v4191_v54, 0  ;;  %v1644_v38 = vsel %vm1638_vm8, %v1641_v33, %v1643_v44  ;;  %v4185_v42 = vadd.s32 4294967169, %v3273_v17 }
 0x31b   : > { %vm1805_vm13 = vcmp.eq.s32.totalorder %v6796_v8, 0  ;;  %vm6820_vm14 = vcmp.le.f32.partialorder %v3373_v22, 0.7853982  ;;  %v3444_v49 = vsel %vm4192_vm12, 0, %v4191_v54  ;;  %v3269_v4 = vand.u32 2147483647, %v6684_v59 }
 0x31c   : > { %v3429_v57 = vadd.s32 %v6736_v46, %v6752_v41  ;;  %v3445_v30 = vsub.s32 32, %v3444_v49  ;;  %v3449_v24 = vsub.s32 4294967266, %v3444_v49  ;;  %v3460_v55 = vsel %vm3375_vm11, %v3459_v45, %v6774_v43 }
 0x31d   : > { %v4557_v34 = vpop.eup %4556  ;;  %v1660_v6 = vmul.u32 %v1653_v31, %v1644_v38  ;;  %vm1662_vm15 = vc.u32 %v6808_v26, %v6810_v3  ;;  %v1663_v22 = vadd.s32 1, %v6811_v52  ;;  %v3279_v37 = vadd.s32 1, %v4185_v42 }
 0x31e   : > { %v4559_v23 = vpop.eup %4558  ;;  %v1809_v35 = vxor.u32 2147483648, %v4557_v34  ;;  %v3446_v29 = vshll.u32 %v6789_v2, %v3444_v49  ;;  %v3447_v32 = vshrl.u32 %v3429_v57, %v3445_v30  ;;  %v3450_v46 = vadd.s32 127, %v3449_v24 }
 0x31f   : > { %v1806_v41 = vxor.u32 2147483648, %v4559_v23  ;;  %vm1808_vm0 = vcmp.eq.s32.totalorder %v6796_v8, 2  ;;  %v1664_v60 = vsel %vm1662_vm15, %v1663_v22, %v6811_v52  ;;  %vm3280_vm2 = vcmp.gt.s32.totalorder %v3279_v37, 0 }
 0x320   : > { %v1810_v43 = vsel %vm1808_vm0, %v1809_v35, %v4559_v23  ;;  %v3448_v31 = vor.u32 %v3447_v32, %v3446_v29  ;;  %v3451_v9 = vshll.u32 %v3450_v46, 23  ;;  %v1665_v63 = vadd.s32 %v1664_v60, %v1660_v6 }
 0x321   : > { %vm1804_vm1 = vcmp.lt.s32.totalorder %v6796_v8, 2  ;;  %v1807_v39 = vsel %vm1805_vm13, %v4557_v34, %v1806_v41  ;;  %v3462_v2 = vsel %vm6820_vm14, 0, %v3460_v55  ;;  %v3281_v50 = vsel %vm3280_vm2, %v3279_v37, 0 }
 0x322   : > { %v1811_v40 = vsel %vm1804_vm1, %v1807_v39, %v1810_v43  ;;  %v3452_v13 = vor.u32 4788187, %v3451_v9  ;;  %v1666_v7 = vadd.s32 536870912, %v1665_v63  ;;  %v3276_v15 = vand.u32 8388607, %v3269_v4 }
 0x323   : > { %v1812_v47 = vsel %vm1801_vm10, nan, %v1811_v40  ;;  %v3283_v45 = vand.u32 31, %v3281_v50  ;;  %v3455_v8 = vcvt.s32.f32 %v3448_v31  ;;  %v3466_v25 = vadd.s32 3, %v3462_v2 }
 0x324   : > { %v3911_v33 = vmul.f32 %v6502_v53, %v1812_v47  ;;  %v3453_v44 = vand.u32 2147483647, %v3452_v13  ;;  %v6846_v36 = vshrl.u32 %v1666_v7, 30  ;;  %v6855_v28 = vadd.f32 %v6851_v19, %v6396_v11 }
 0x325   : > { %v3284_v54 = vsub.s32 32, %v3283_v45  ;;  %v3277_v53 = vor.u32 8388608, %v3276_v15  ;;  %v3286_v21 = vshll.u32 %v4678_v10, %v3283_v45  ;;  %v3289_v38 = vshll.u32 %v4679_v14, %v3283_v45 }
 0x326   : > { %3943 = vst [vmem:[%s5175_s14 + $0x58] sm:$0xff] %v3911_v33  ;;  %v3456_v58 = vmul.f32 %v3455_v8, %v3453_v44  ;;  %v1668_v17 = vshll.u32 %v6846_v36, 30  ;;  %v3292_v11 = vshll.u32 %v4680_v16, %v3283_v45  ;;  %v6868_v55 = vand.u32 3, %v3466_v25 }
 0x327   : > { %v3287_v52 = vshrl.u32 %v4679_v14, %v3284_v54  ;;  %v3290_v42 = vshrl.u32 %v4680_v16, %v3284_v54  ;;  %v3293_v49 = vshrl.u32 %v4681_v18, %v3284_v54  ;;  %v3296_v24 = vshrl.u32 %v4682_v20, %v3284_v54 }
 0x328   : > { %v3457_v57 = vxor.u32 2147483648, %v3456_v58  ;;  %v6864_v30 = vsub.s32 %v1665_v63, %v1668_v17  ;;  %v3282_v34 = vshrl.u32 %v3281_v50, 5  ;;  %v3295_v22 = vshll.u32 %v4681_v18, %v3283_v45 }
 0x329   : > { %v3288_v6 = vor.u32 %v3287_v52, %v3286_v21  ;;  %v3291_v35 = vor.u32 %v3290_v42, %v3289_v38  ;;  %v3294_v29 = vor.u32 %v3293_v49, %v3292_v11  ;;  %vm1607_vm3 = vcmp.lt.s32.totalorder %v6627_v0, 0 }
 0x32a   : > { %v3458_v37 = vsel %vm3375_vm11, %v3457_v57, %v3456_v58  ;;  %v1671_v23 = vsub.s32 0, %v6864_v30  ;;  %v3297_v46 = vor.u32 %v3296_v24, %v3295_v22  ;;  %v3298_v41 = vshll.u32 %v4682_v20, %v3283_v45  ;;  %v6906_v24 = vpop.f32.mrb[15].mxu0 }
 0x32b   : > { %v3461_v32 = vsel %vm6820_vm14, %v6595_v5, %v3458_v37  ;;  %v3299_v60 = vshrl.u32 %v4683_v27, %v3284_v54  ;;  %v6881_v31 = vshll.u32 %v3277_v53, 8  ;;  %v1920_v9 = vand.u32 2139095040, %v6855_v28 }
 0x32c   : > { %4560 = vcosq.f32 %v3461_v32  ;;  %v4122_v43 = vmin.u32 %v1671_v23, %v6864_v30  ;;  %v1691_v63 = vsub.s32 4, %v6846_v36  ;;  %v3285_v12 = vshrl.u32 %v4678_v10, %v3284_v54 }
 0x32d   : > { %4562 = vsinq.f32 %v3461_v32  ;;  %v3300_v39 = vor.u32 %v3299_v60, %v3298_v41  ;;  %vm3301_vm4 = vcmp.lt.s32.totalorder %v3282_v34, 1  ;;  %vm3302_vm5 = vcmp.lt.s32.totalorder %v3282_v34, 2 }
 0x32e   : > { %v1673_v2 = vclz %v4122_v43  ;;  %vm3304_vm6 = vcmp.lt.s32.totalorder %v3282_v34, 4  ;;  %vm3303_vm7 = vcmp.lt.s32.totalorder %v3282_v34, 3  ;;  %v3309_v40 = vsel %vm3301_vm4, %v3288_v6, %v3291_v35 }
 0x32f   : > { %v3306_v50 = vsel %vm3304_vm6, %v3294_v29, 2102212464  ;;  %v3310_v13 = vsel %vm3304_vm6, %v3297_v46, 920167782  ;;  %vm6888_vm8 = vcmp.le.f32.partialorder %v1605_v1, 0.7853982  ;;  %v3305_v47 = vsel %vm3301_vm4, %v3285_v12, %v3288_v6 }
 0x330   : > { %v4123_v15 = vadd.s32 4294967294, %v1673_v2  ;;  %v3311_v45 = vsel %vm3303_vm7, %v3294_v29, %v3310_v13  ;;  %v3313_v33 = vsel %vm3301_vm4, %v3291_v35, %v3294_v29  ;;  %vm3469_vm9 = vcmp.eq.s32.totalorder %v6868_v55, 0 }
 0x331   : > { %v3307_v44 = vsel %vm3303_vm7, %v3291_v35, %v3306_v50  ;;  %v3312_v8 = vsel %vm3302_vm5, %v3309_v40, %v3311_v45  ;;  %v3314_v25 = vsel %vm3304_vm6, %v3300_v39, 1326507024  ;;  %v1921_v54 = vshrl.u32 %v1920_v9, 23 }
 0x332   : > { %vm4124_vm10 = vcmp.lt.s32.totalorder %v4123_v15, 0  ;;  %v3315_v58 = vsel %vm3303_vm7, %v3297_v46, %v3314_v25  ;;  %v6895_v17 = vmul.u32.u64.low %v6881_v31, %v3312_v8  ;;  %v6896_v53 = vmul.u32.u64.high %v6881_v31, %v3312_v8, %v6895_v17 }
 0x333   : > { %v1676_v1 = vsel %vm4124_vm10, 0, %v4123_v15  ;;  %v3316_v21 = vsel %vm3302_vm5, %v3313_v33, %v3315_v58  ;;  %v1917_v52 = vand.u32 2147483647, %v6855_v28  ;;  %v4133_v38 = vadd.s32 4294967169, %v1921_v54 }
 0x334   : > { %v1661_v42 = vadd.s32 %v6810_v3, %v6808_v26  ;;  %v1677_v49 = vsub.s32 32, %v1676_v1  ;;  %v1681_v57 = vsub.s32 4294967266, %v1676_v1  ;;  %v1692_v11 = vsel %vm1607_vm3, %v1691_v63, %v6846_v36 }
 0x335   : > { %v3308_v6 = vsel %vm3302_vm5, %v3305_v47, %v3307_v44  ;;  %v6910_v22 = vmul.u32.u64.low %v6881_v31, %v3316_v21  ;;  %v6911_v37 = vmul.u32.u64.high %v6881_v31, %v3316_v21, %v6910_v22  ;;  %v1927_v23 = vadd.s32 1, %v4133_v38  ;;  %v6931_v44 = vld [vmem:[%s7611_s3] ss:$0 sm:$0xff] }
 0x336   : > { %v4561_v35 = vpop.eup %4560  ;;  %v1678_v29 = vshll.u32 %v6864_v30, %v1676_v1  ;;  %v1679_v32 = vshrl.u32 %v1661_v42, %v1677_v49  ;;  %v1682_v26 = vadd.s32 127, %v1681_v57  ;;  %v3327_v3 = vadd.s32 1, %v6896_v53 }
 0x337   : > { %v4563_v46 = vpop.eup %4562  ;;  %vm3472_vm11 = vcmp.eq.s32.totalorder %v6868_v55, 2  ;;  %v3473_v36 = vxor.u32 2147483648, %v4561_v35  ;;  %v1924_v34 = vand.u32 8388607, %v1917_v52  ;;  %vm1928_vm12 = vcmp.gt.s32.totalorder %v1927_v23, 0 }
 0x338   : > { %v3470_v41 = vxor.u32 2147483648, %v4563_v46  ;;  %v1680_v60 = vor.u32 %v1679_v32, %v1678_v29  ;;  %v1683_v43 = vshll.u32 %v1682_v26, 23  ;;  %v1929_v9 = vsel %vm1928_vm12, %v1927_v23, 0 }
 0x339   : > { %v3474_v63 = vsel %vm3472_vm11, %v3473_v36, %v4563_v46  ;;  %v1694_v30 = vsel %vm6888_vm8, 0, %v1692_v11  ;;  %v3324_v12 = vmul.u32 %v6881_v31, %v3308_v6  ;;  %vm3326_vm13 = vc.u32 %v6911_v37, %v6895_v17 }
 0x33a   : > { %vm3468_vm14 = vcmp.lt.s32.totalorder %v6868_v55, 2  ;;  %v3471_v39 = vsel %vm3469_vm9, %v4561_v35, %v3470_v41  ;;  %v1684_v2 = vor.u32 4788187, %v1683_v43  ;;  %v3328_v50 = vsel %vm3326_vm13, %v3327_v3, %v6896_v53 }
 0x33b   : > { %vm3465_vm15 = vweird.f32 %v6595_v5  ;;  %v3475_v40 = vsel %vm3468_vm14, %v3471_v39, %v3474_v63  ;;  %v3329_v13 = vadd.s32 %v3328_v50, %v3324_v12  ;;  %v1931_v15 = vand.u32 31, %v1929_v9 }
 0x33c   : > { %v3476_v47 = vsel %vm3465_vm15, nan, %v3475_v40  ;;  %v1685_v45 = vand.u32 2147483647, %v1684_v2  ;;  %v1687_v31 = vcvt.s32.f32 %v1680_v60  ;;  %v1698_v33 = vadd.s32 3, %v1694_v30 }
 0x33d   : > { %v3927_v55 = vmul.f32 %v6931_v44, %v3476_v47  ;;  %v3330_v8 = vadd.s32 536870912, %v3329_v13  ;;  %v1925_v25 = vor.u32 8388608, %v1924_v34  ;;  %v1932_v54 = vsub.s32 32, %v1931_v15 }
 0x33e   : > { %v1688_v58 = vmul.f32 %v1687_v31, %v1685_v45  ;;  %v1930_v5 = vshrl.u32 %v1929_v9, 5  ;;  %v1934_v53 = vshll.u32 %v4678_v10, %v1931_v15  ;;  %v1937_v1 = vshll.u32 %v4679_v14, %v1931_v15 }
 0x33f   : > { %3959 = vst [vmem:[%s5175_s14 + $0xd8] sm:$0xff] %v3927_v55  ;;  %vm3271_vm0 = vcmp.lt.s32.totalorder %v6684_v59, 0  ;;  %v3331_v21 = vshrl.u32 %v3330_v8, 30  ;;  %v1935_v38 = vshrl.u32 %v4679_v14, %v1932_v54  ;;  %v1938_v42 = vshrl.u32 %v4680_v16, %v1932_v54 }
 0x340   : > { %v1940_v49 = vshll.u32 %v4680_v16, %v1931_v15  ;;  %v1689_v57 = vxor.u32 2147483648, %v1688_v58  ;;  %v1941_v11 = vshrl.u32 %v4681_v18, %v1932_v54  ;;  %v1943_v6 = vshll.u32 %v4681_v18, %v1931_v15 }
 0x341   : > { %v1944_v22 = vshrl.u32 %v4682_v20, %v1932_v54  ;;  %v3332_v23 = vshll.u32 %v3331_v21, 30  ;;  %v1936_v35 = vor.u32 %v1935_v38, %v1934_v53  ;;  %v1939_v29 = vor.u32 %v1938_v42, %v1937_v1 }
 0x342   : > { %v1946_v32 = vshll.u32 %v4682_v20, %v1931_v15  ;;  %v1690_v26 = vsel %vm1607_vm3, %v1689_v57, %v1688_v58  ;;  %v1942_v3 = vor.u32 %v1941_v11, %v1940_v49  ;;  %v1947_v36 = vshrl.u32 %v4683_v27, %v1932_v54 }
 0x343   : > { %v1945_v46 = vor.u32 %v1944_v22, %v1943_v6  ;;  %v1693_v34 = vsel %vm6888_vm8, %v6627_v0, %v1690_v26  ;;  %v6951_v41 = vand.u32 3, %v1698_v33  ;;  %v6953_v60 = vsub.s32 %v3329_v13, %v3332_v23 }
 0x344   : > { %v6957_v43 = vadd.f32 %v6851_v19, %v6460_v48  ;;  %4564 = vcosq.f32 %v1693_v34  ;;  %v3355_v9 = vsub.s32 4, %v3331_v21  ;;  %v1948_v63 = vor.u32 %v1947_v36, %v1946_v32 }
 0x345   : > { %v1965_v30 = vshll.u32 %v1925_v25, 8  ;;  %4566 = vsinq.f32 %v1693_v34  ;;  %v3335_v12 = vsub.s32 0, %v6953_v60  ;;  %vm1949_vm2 = vcmp.lt.s32.totalorder %v1930_v5, 1  ;;  %v6997_v34 = vpop.f32.mrb[15].mxu1 }
 0x346   : > { %vm1952_vm1 = vcmp.lt.s32.totalorder %v1930_v5, 4  ;;  %vm1951_vm3 = vcmp.lt.s32.totalorder %v1930_v5, 3  ;;  %v1957_v39 = vsel %vm1949_vm2, %v1936_v35, %v1939_v29  ;;  %v1933_v40 = vshrl.u32 %v4678_v10, %v1932_v54 }
 0x347   : > { %v1954_v7 = vsel %vm1952_vm1, %v1942_v3, 2102212464  ;;  %v1958_v2 = vsel %vm1952_vm1, %v1945_v46, 920167782  ;;  %v4186_v50 = vmin.u32 %v3335_v12, %v6953_v60  ;;  %vm1950_vm4 = vcmp.lt.s32.totalorder %v1930_v5, 2 }
 0x348   : > { %v1959_v48 = vsel %vm1951_vm3, %v1942_v3, %v1958_v2  ;;  %v3356_v13 = vsel %vm3271_vm0, %v3355_v9, %v3331_v21  ;;  %v1961_v47 = vsel %vm1949_vm2, %v1939_v29, %v1942_v3  ;;  %v1962_v45 = vsel %vm1952_vm1, %v1948_v63, 1326507024 }
 0x349   : > { %v1960_v15 = vsel %vm1950_vm4, %v1957_v39, %v1959_v48  ;;  %vm6970_vm5 = vcmp.le.f32.partialorder %v3269_v4, 0.7853982  ;;  %v3337_v33 = vclz %v4186_v50  ;;  %v1953_v55 = vsel %vm1949_vm2, %v1933_v40, %v1936_v35 }
 0x34a   : > { %v1955_v8 = vsel %vm1951_vm3, %v1939_v29, %v1954_v7  ;;  %vm1700_vm6 = vcmp.lt.s32.totalorder %v6951_v41, 2  ;;  %v1963_v25 = vsel %vm1951_vm3, %v1945_v46, %v1962_v45  ;;  %v3584_v53 = vand.u32 2139095040, %v6957_v43 }
 0x34b   : > { %v6978_v54 = vmul.u32.u64.low %v1965_v30, %v1960_v15  ;;  %v6979_v58 = vmul.u32.u64.high %v1965_v30, %v1960_v15, %v6978_v54  ;;  %vm1697_vm7 = vweird.f32 %v6627_v0  ;;  %vm1701_vm8 = vcmp.eq.s32.totalorder %v6951_v41, 0 }
 0x34c   : > { %v4187_v4 = vadd.s32 4294967294, %v3337_v33  ;;  %v3358_v1 = vsel %vm6970_vm5, 0, %v3356_v13  ;;  %v1964_v21 = vsel %vm1950_vm4, %v1961_v47, %v1963_v25  ;;  %v1956_v38 = vsel %vm1950_vm4, %v1953_v55, %v1955_v8 }
 0x34d   : > { %v6989_v42 = vmul.u32.u64.low %v1965_v30, %v1964_v21  ;;  %v6990_v49 = vmul.u32.u64.high %v1965_v30, %v1964_v21, %v6989_v42  ;;  %v3585_v57 = vshrl.u32 %v3584_v53, 23  ;;  %vm1704_vm9 = vcmp.eq.s32.totalorder %v6951_v41, 2 }
 0x34e   : > { %v3325_v11 = vadd.s32 %v6895_v17, %v6911_v37  ;;  %vm4188_vm10 = vcmp.lt.s32.totalorder %v4187_v4, 0  ;;  %v3581_v6 = vand.u32 2147483647, %v6957_v43  ;;  %v4565_v22 = vpop.eup %4564  ;;  %v3362_v35 = vadd.s32 3, %v3358_v1 }
 0x34f   : > { %v3340_v23 = vsel %vm4188_vm10, 0, %v4187_v4  ;;  %v1975_v29 = vadd.s32 1, %v6979_v58  ;;  %v4197_v32 = vadd.s32 4294967169, %v3585_v57  ;;  %v4567_v5 = vpop.eup %4566  ;;  %v1705_v26 = vxor.u32 2147483648, %v4565_v22 }
 0x350   : > { %v3341_v3 = vsub.s32 32, %v3340_v23  ;;  %v3345_v46 = vsub.s32 4294967266, %v3340_v23  ;;  %v1972_v36 = vmul.u32 %v1965_v30, %v1956_v38  ;;  %v1702_v9 = vxor.u32 2147483648, %v4567_v5 }
 0x351   : > { %v3342_v63 = vshll.u32 %v6953_v60, %v3340_v23  ;;  %vm1974_vm11 = vc.u32 %v6990_v49, %v6978_v54  ;;  %v3591_v17 = vadd.s32 1, %v4197_v32  ;;  %v1706_v37 = vsel %vm1704_vm9, %v1705_v26, %v4567_v5 }
 0x352   : > { %v3343_v12 = vshrl.u32 %v3325_v11, %v3341_v3  ;;  %v3346_v7 = vadd.s32 127, %v3345_v46  ;;  %v1976_v39 = vsel %vm1974_vm11, %v1975_v29, %v6979_v58  ;;  %v1703_v2 = vsel %vm1701_vm8, %v4565_v22, %v1702_v9 }
 0x353   : > { %v1977_v30 = vadd.s32 %v1976_v39, %v1972_v36  ;;  %v3588_v50 = vand.u32 8388607, %v3581_v6  ;;  %vm3592_vm12 = vcmp.gt.s32.totalorder %v3591_v17, 0  ;;  %v1707_v60 = vsel %vm1700_vm6, %v1703_v2, %v1706_v37 }
 0x354   : > { %v3344_v40 = vor.u32 %v3343_v12, %v3342_v63  ;;  %v3347_v48 = vshll.u32 %v3346_v7, 23  ;;  %v3593_v13 = vsel %vm3592_vm12, %v3591_v17, 0  ;;  %v1708_v15 = vsel %vm1697_vm7, nan, %v1707_v60 }
 0x355   : > { %v1978_v47 = vadd.s32 536870912, %v1977_v30  ;;  %v3595_v45 = vand.u32 31, %v3593_v13  ;;  %v7015_v33 = vadd.f32 %v6851_v19, %v6564_v61  ;;  %v3910_v55 = vmul.f32 %v6931_v44, %v1708_v15 }
 0x356   : > { %v3348_v8 = vor.u32 4788187, %v3347_v48  ;;  %v3351_v53 = vcvt.s32.f32 %v3344_v40  ;;  %v7021_v4 = vand.u32 3, %v3362_v35  ;;  %v3589_v1 = vor.u32 8388608, %v3588_v50 }
 0x357   : > { %v7018_v25 = vshrl.u32 %v1978_v47, 30  ;;  %v3596_v58 = vsub.s32 32, %v3595_v45  ;;  %3942 = vst [vmem:[%s5175_s14 + $0x50] sm:$0xff] %v3910_v55  ;;  %v3598_v21 = vshll.u32 %v4678_v10, %v3595_v45  ;;  %v1816_v61 = vand.u32 2139095040, %v7015_v33 }
 0x358   : > { %v3349_v41 = vand.u32 2147483647, %v3348_v8  ;;  %v3601_v35 = vshll.u32 %v4679_v14, %v3595_v45  ;;  %v3604_v29 = vshll.u32 %v4680_v16, %v3595_v45  ;;  %v3594_v26 = vshrl.u32 %v3593_v13, 5 }
 0x359   : > { %v1980_v0 = vshll.u32 %v7018_v25, 30  ;;  %v3599_v38 = vshrl.u32 %v4679_v14, %v3596_v58  ;;  %v3602_v57 = vshrl.u32 %v4680_v16, %v3596_v58  ;;  %v3605_v11 = vshrl.u32 %v4681_v18, %v3596_v58 }
 0x35a   : > { %v3352_v42 = vmul.f32 %v3351_v53, %v3349_v41  ;;  %v3608_v22 = vshrl.u32 %v4682_v20, %v3596_v58  ;;  %v3611_v32 = vshrl.u32 %v4683_v27, %v3596_v58  ;;  %v3607_v3 = vshll.u32 %v4681_v18, %v3595_v45 }
 0x35b   : > { %v7030_v23 = vsub.s32 %v1977_v30, %v1980_v0  ;;  %v3610_v46 = vshll.u32 %v4682_v20, %v3595_v45  ;;  %v3600_v9 = vor.u32 %v3599_v38, %v3598_v21  ;;  %v3603_v63 = vor.u32 %v3602_v57, %v3601_v35 }
 0x35c   : > { %v3353_v5 = vxor.u32 2147483648, %v3352_v42  ;;  %v3606_v17 = vor.u32 %v3605_v11, %v3604_v29  ;;  %v1973_v12 = vadd.s32 %v6978_v54, %v6990_v49  ;;  %v3609_v7 = vor.u32 %v3608_v22, %v3607_v3 }
 0x35d   : > { %v1983_v36 = vsub.s32 0, %v7030_v23  ;;  %v3629_v39 = vshll.u32 %v3589_v1, 8  ;;  %v3612_v50 = vor.u32 %v3611_v32, %v3610_v46  ;;  %v1817_v60 = vshrl.u32 %v1816_v61, 23 }
 0x35e   : > { %v3354_v37 = vsel %vm3271_vm0, %v3353_v5, %v3352_v42  ;;  %v3597_v40 = vshrl.u32 %v4678_v10, %v3596_v58  ;;  %vm3613_vm13 = vcmp.lt.s32.totalorder %v3594_v26, 1  ;;  %vm3616_vm14 = vcmp.lt.s32.totalorder %v3594_v26, 4 }
 0x35f   : > { %v3357_v2 = vsel %vm6970_vm5, %v6684_v59, %v3354_v37  ;;  %v4134_v30 = vmin.u32 %v1983_v36, %v7030_v23  ;;  %v3618_v13 = vsel %vm3616_vm14, %v3606_v17, 2102212464  ;;  %v3621_v15 = vsel %vm3613_vm13, %v3600_v9, %v3603_v63 }
 0x360   : > { %4568 = vcosq.f32 %v3357_v2  ;;  %vm3614_vm15 = vcmp.lt.s32.totalorder %v3594_v26, 2  ;;  %vm3615_vm0 = vcmp.lt.s32.totalorder %v3594_v26, 3  ;;  %v3622_v54 = vsel %vm3616_vm14, %v3609_v7, 920167782 }
 0x361   : > { %4570 = vsinq.f32 %v3357_v2  ;;  %v1985_v48 = vclz %v4134_v30  ;;  %v3625_v49 = vsel %vm3613_vm13, %v3603_v63, %v3606_v17  ;;  %v3617_v31 = vsel %vm3613_vm13, %v3597_v40, %v3600_v9 }
 0x362   : > { %v3623_v45 = vsel %vm3615_vm0, %v3606_v17, %v3622_v54  ;;  %v3626_v55 = vsel %vm3616_vm14, %v3612_v50, 1326507024  ;;  %v3619_v8 = vsel %vm3615_vm0, %v3603_v63, %v3618_v13  ;;  %v4129_v1 = vadd.s32 4294967169, %v1817_v60 }
 0x363   : > { %v4135_v47 = vadd.s32 4294967294, %v1985_v48  ;;  %v3624_v41 = vsel %vm3614_vm15, %v3621_v15, %v3623_v45  ;;  %v3627_v53 = vsel %vm3615_vm0, %v3609_v7, %v3626_v55  ;;  %v2003_v61 = vsub.s32 4, %v7018_v25 }
 0x364   : > { %v3628_v58 = vsel %vm3614_vm15, %v3625_v49, %v3627_v53  ;;  %v7049_v0 = vmul.u32.u64.low %v3629_v39, %v3624_v41  ;;  %v7050_v21 = vmul.u32.u64.high %v3629_v39, %v3624_v41, %v7049_v0  ;;  %v3620_v35 = vsel %vm3614_vm15, %v3617_v31, %v3619_v8 }
 0x365   : > { %vm4136_vm2 = vcmp.lt.s32.totalorder %v4135_v47, 0  ;;  %v7054_v42 = vmul.u32.u64.low %v3629_v39, %v3628_v58  ;;  %v7055_v57 = vmul.u32.u64.high %v3629_v39, %v3628_v58, %v7054_v42  ;;  %v1823_v29 = vadd.s32 1, %v4129_v1 }
 0x366   : > { %v1988_v38 = vsel %vm4136_vm2, 0, %v4135_v47  ;;  %vm3365_vm1 = vcmp.eq.s32.totalorder %v7021_v4, 0  ;;  %vm7061_vm3 = vcmp.le.f32.partialorder %v1917_v52, 0.7853982  ;;  %vm1919_vm4 = vcmp.lt.s32.totalorder %v6855_v28, 0 }
 0x367   : > { %v1989_v11 = vsub.s32 32, %v1988_v38  ;;  %v1993_v22 = vsub.s32 4294967266, %v1988_v38  ;;  %v1990_v5 = vshll.u32 %v7030_v23, %v1988_v38  ;;  %v3639_v36 = vadd.s32 1, %v7050_v21 }
 0x368   : > { %vm1824_vm5 = vcmp.gt.s32.totalorder %v1823_v29, 0  ;;  %v2004_v9 = vsel %vm1919_vm4, %v2003_v61, %v7018_v25  ;;  %v3636_v63 = vmul.u32 %v3629_v39, %v3620_v35  ;;  %vm3638_vm6 = vc.u32 %v7055_v57, %v7049_v0 }
 0x369   : > { %v1991_v3 = vshrl.u32 %v1973_v12, %v1989_v11  ;;  %v1994_v46 = vadd.s32 127, %v1993_v22  ;;  %v1825_v52 = vsel %vm1824_vm5, %v1823_v29, 0  ;;  %v3640_v23 = vsel %vm3638_vm6, %v3639_v36, %v7050_v21 }
 0x36a   : > { %v4569_v26 = vpop.eup %4568  ;;  %vm3368_vm7 = vcmp.eq.s32.totalorder %v7021_v4, 2  ;;  %v3641_v30 = vadd.s32 %v3640_v23, %v3636_v63  ;;  %v1827_v50 = vand.u32 31, %v1825_v52  ;;  %v2006_v25 = vsel %vm7061_vm3, 0, %v2004_v9 }
 0x36b   : > { %v4571_v17 = vpop.eup %4570  ;;  %v3369_v37 = vxor.u32 2147483648, %v4569_v26  ;;  %v1992_v7 = vor.u32 %v1991_v3, %v1990_v5  ;;  %v1995_v2 = vshll.u32 %v1994_v46, 23  ;;  %v1813_v39 = vand.u32 2147483647, %v7015_v33 }
 0x36c   : > { %v3366_v12 = vxor.u32 2147483648, %v4571_v17  ;;  %vm3364_vm8 = vcmp.lt.s32.totalorder %v7021_v4, 2  ;;  %v3642_v13 = vadd.s32 536870912, %v3641_v30  ;;  %v1828_v15 = vsub.s32 32, %v1827_v50 }
 0x36d   : > { %v3370_v60 = vsel %vm3368_vm7, %v3369_v37, %v4571_v17  ;;  %v1996_v40 = vor.u32 4788187, %v1995_v2  ;;  %vm3361_vm9 = vweird.f32 %v6684_v59  ;;  %v1999_v47 = vcvt.s32.f32 %v1992_v7 }
 0x36e   : > { %v3367_v48 = vsel %vm3365_vm1, %v4569_v26, %v3366_v12  ;;  %v2010_v45 = vadd.s32 3, %v2006_v25  ;;  %v3643_v55 = vshrl.u32 %v3642_v13, 30  ;;  %v1831_v8 = vshrl.u32 %v4679_v14, %v1828_v15 }
 0x36f   : > { %v3371_v54 = vsel %vm3364_vm8, %v3367_v48, %v3370_v60  ;;  %v1997_v49 = vand.u32 2147483647, %v1996_v40  ;;  %v1820_v4 = vand.u32 8388607, %v1813_v39  ;;  %v1834_v1 = vshrl.u32 %v4680_v16, %v1828_v15 }
 0x370   : > { %v3372_v31 = vsel %vm3361_vm9, nan, %v3371_v54  ;;  %v3644_v58 = vshll.u32 %v3643_v55, 30  ;;  %v7087_v21 = vshrl.u32 %v1825_v52, 5  ;;  %v1830_v59 = vshll.u32 %v4678_v10, %v1827_v50 }
 0x371   : > { %v3926_v41 = vmul.f32 %v6931_v44, %v3372_v31  ;;  %v2000_v53 = vmul.f32 %v1999_v47, %v1997_v49  ;;  %v1837_v38 = vshrl.u32 %v4681_v18, %v1828_v15  ;;  %v1833_v42 = vshll.u32 %v4679_v14, %v1827_v50 }
 0x372   : > { %v1839_v11 = vshll.u32 %v4681_v18, %v1827_v50  ;;  %v1840_v22 = vshrl.u32 %v4682_v20, %v1828_v15  ;;  %v7095_v35 = vsub.s32 %v3641_v30, %v3644_v58  ;;  %v1832_v29 = vor.u32 %v1831_v8, %v1830_v59 }
 0x373   : > { %3958 = vst [vmem:[%s5175_s14 + $0xd0] sm:$0xff] %v3926_v41  ;;  %v2001_v61 = vxor.u32 2147483648, %v2000_v53  ;;  %v1836_v5 = vshll.u32 %v4680_v16, %v1827_v50  ;;  %v1843_v3 = vshrl.u32 %v4683_v27, %v1828_v15  ;;  %vm3583_vm10 = vcmp.lt.s32.totalorder %v6957_v43, 0 }
 0x374   : > { %v1835_v36 = vor.u32 %v1834_v1, %v1833_v42  ;;  %v1841_v26 = vor.u32 %v1840_v22, %v1839_v11  ;;  %v1842_v9 = vshll.u32 %v4682_v20, %v1827_v50  ;;  %v7106_v52 = vand.u32 3, %v2010_v45 }
 0x375   : > { %v2002_v46 = vsel %vm1919_vm4, %v2001_v61, %v2000_v53  ;;  %v3647_v17 = vsub.s32 0, %v7095_v35  ;;  %v1838_v37 = vor.u32 %v1837_v38, %v1836_v5  ;;  %v1821_v7 = vor.u32 8388608, %v1820_v4 }
 0x376   : > { %v2005_v63 = vsel %vm7061_vm3, %v6855_v28, %v2002_v46  ;;  %v1844_v2 = vor.u32 %v1843_v3, %v1842_v9  ;;  %v7111_v23 = vadd.f32 %v6851_v19, %v6647_v62  ;;  %vm7115_vm11 = vcmp.le.f32.partialorder %v3581_v6, 0.7853982 }
 0x377   : > { %4572 = vcosq.f32 %v2005_v63  ;;  %v4198_v32 = vmin.u32 %v3647_v17, %v7095_v35  ;;  %vm1845_vm12 = vcmp.lt.s32.totalorder %v7087_v21, 1  ;;  %vm1848_vm13 = vcmp.lt.s32.totalorder %v7087_v21, 4 }
 0x378   : > { %4574 = vsinq.f32 %v2005_v63  ;;  %v3667_v30 = vsub.s32 4, %v3643_v55  ;;  %v1829_v50 = vshrl.u32 %v4678_v10, %v1828_v15  ;;  %v1853_v60 = vsel %vm1845_vm12, %v1832_v29, %v1835_v36 }
 0x379   : > { %v1854_v40 = vsel %vm1848_vm13, %v1841_v26, 920167782  ;;  %v3649_v62 = vclz %v4198_v32  ;;  %vm1847_vm14 = vcmp.lt.s32.totalorder %v7087_v21, 3  ;;  %v1850_v25 = vsel %vm1848_vm13, %v1838_v37, 2102212464 }
 0x37a   : > { %v1857_v48 = vsel %vm1845_vm12, %v1835_v36, %v1838_v37  ;;  %vm1846_vm15 = vcmp.lt.s32.totalorder %v7087_v21, 2  ;;  %v1855_v6 = vsel %vm1847_vm14, %v1838_v37, %v1854_v40  ;;  %v1858_v13 = vsel %vm1848_vm13, %v1844_v2, 1326507024 }
 0x37b   : > { %v1861_v54 = vshll.u32 %v1821_v7, 8  ;;  %v4199_v49 = vadd.s32 4294967294, %v3649_v62  ;;  %v1849_v47 = vsel %vm1845_vm12, %v1829_v50, %v1832_v29  ;;  %v1856_v31 = vsel %vm1846_vm15, %v1853_v60, %v1855_v6 }
 0x37c   : > { %v1859_v45 = vsel %vm1847_vm14, %v1841_v26, %v1858_v13  ;;  %vm2012_vm0 = vcmp.lt.s32.totalorder %v7106_v52, 2  ;;  %v1851_v15 = vsel %vm1847_vm14, %v1835_v36, %v1850_v25  ;;  %v3668_v4 = vsel %vm3583_vm10, %v3667_v30, %v3643_v55 }
 0x37d   : > { %v1860_v8 = vsel %vm1846_vm15, %v1857_v48, %v1859_v45  ;;  %v7130_v41 = vmul.u32.u64.low %v1861_v54, %v1856_v31  ;;  %v7131_v53 = vmul.u32.u64.high %v1861_v54, %v1856_v31, %v7130_v41  ;;  %vm4200_vm2 = vcmp.lt.s32.totalorder %v4199_v49, 0 }
 0x37e   : > { %v7136_v1 = vmul.u32.u64.low %v1861_v54, %v1860_v8  ;;  %v7137_v58 = vmul.u32.u64.high %v1861_v54, %v1860_v8, %v7136_v1  ;;  %vm2013_vm1 = vcmp.eq.s32.totalorder %v7106_v52, 0  ;;  %vm2016_vm3 = vcmp.eq.s32.totalorder %v7106_v52, 2 }
 0x37f   : > { %v3652_v59 = vsel %vm4200_vm2, 0, %v4199_v49  ;;  %v3480_v38 = vand.u32 2139095040, %v7111_v23  ;;  %v3637_v61 = vadd.s32 %v7049_v0, %v7055_v57  ;;  %v1852_v22 = vsel %vm1846_vm15, %v1849_v47, %v1851_v15 }
 0x380   : > { %v3653_v42 = vsub.s32 32, %v3652_v59  ;;  %v3657_v11 = vsub.s32 4294967266, %v3652_v59  ;;  %v3670_v55 = vsel %vm7115_vm11, 0, %v3668_v4  ;;  %v1871_v5 = vadd.s32 1, %v7131_v53 }
 0x381   : > { %v4573_v29 = vpop.eup %4572  ;;  %v3477_v3 = vand.u32 2147483647, %v7111_v23  ;;  %v3481_v46 = vshrl.u32 %v3480_v38, 23  ;;  %v3654_v9 = vshll.u32 %v7095_v35, %v3652_v59  ;;  %v1868_v17 = vmul.u32 %v1861_v54, %v1852_v22 }
 0x382   : > { %v4575_v36 = vpop.eup %4574  ;;  %v2017_v26 = vxor.u32 2147483648, %v4573_v29  ;;  %v3655_v63 = vshrl.u32 %v3637_v61, %v3653_v42  ;;  %v3658_v0 = vadd.s32 127, %v3657_v11  ;;  %vm1870_vm4 = vc.u32 %v7137_v58, %v7130_v41 }
 0x383   : > { %v2014_v57 = vxor.u32 2147483648, %v4575_v36  ;;  %v4193_v21 = vadd.s32 4294967169, %v3481_v46  ;;  %v1872_v32 = vsel %vm1870_vm4, %v1871_v5, %v7131_v53  ;;  %v7160_v60 = vadd.f32 %v6851_v19, %v6770_v56 }
 0x384   : > { %v2018_v37 = vsel %vm2016_vm3, %v2017_v26, %v4575_v36  ;;  %v3656_v7 = vor.u32 %v3655_v63, %v3654_v9  ;;  %v3659_v2 = vshll.u32 %v3658_v0, 23  ;;  %v1873_v50 = vadd.s32 %v1872_v32, %v1868_v17 }
 0x385   : > { %v2015_v30 = vsel %vm2013_vm1, %v4573_v29, %v2014_v57  ;;  %v3487_v35 = vadd.s32 1, %v4193_v21  ;;  %vm2009_vm5 = vweird.f32 %v6855_v28  ;;  %v3674_v25 = vadd.s32 3, %v3670_v55 }
 0x386   : > { %v2019_v40 = vsel %vm2012_vm0, %v2015_v30, %v2018_v37  ;;  %v3660_v62 = vor.u32 4788187, %v3659_v2  ;;  %v1874_v6 = vadd.s32 536870912, %v1873_v50  ;;  %v3484_v13 = vand.u32 8388607, %v3477_v3 }
 0x387   : > { %v2020_v48 = vsel %vm2009_vm5, nan, %v2019_v40  ;;  %vm3488_vm6 = vcmp.gt.s32.totalorder %v3487_v35, 0  ;;  %v3663_v47 = vcvt.s32.f32 %v3656_v7  ;;  %v2128_v28 = vand.u32 2139095040, %v7160_v60 }
 0x388   : > { %v3913_v54 = vmul.f32 %v6931_v44, %v2020_v48  ;;  %v3661_v49 = vand.u32 2147483647, %v3660_v62  ;;  %v3489_v56 = vsel %vm3488_vm6, %v3487_v35, 0  ;;  %v7168_v19 = vshrl.u32 %v1874_v6, 30 }
 0x389   : > { %v3491_v31 = vand.u32 31, %v3489_v56  ;;  %v7173_v53 = vand.u32 3, %v3674_v25  ;;  %v3485_v4 = vor.u32 8388608, %v3484_v13  ;;  %v2125_v1 = vand.u32 2147483647, %v7160_v60 }
 0x38a   : > { %3945 = vst [vmem:[%s5175_s14 + $0x68] sm:$0xff] %v3913_v54  ;;  %v3664_v52 = vmul.f32 %v3663_v47, %v3661_v49  ;;  %v1876_v45 = vshll.u32 %v7168_v19, 30  ;;  %v3490_v38 = vshrl.u32 %v3489_v56, 5  ;;  %v2129_v42 = vshrl.u32 %v2128_v28, 23 }
 0x38b   : > { %v3492_v15 = vsub.s32 32, %v3491_v31  ;;  %v3494_v22 = vshll.u32 %v4678_v10, %v3491_v31  ;;  %v3497_v36 = vshll.u32 %v4679_v14, %v3491_v31  ;;  %v3500_v26 = vshll.u32 %v4680_v16, %v3491_v31 }
 0x38c   : > { %v3665_v8 = vxor.u32 2147483648, %v3664_v52  ;;  %v7176_v59 = vsub.s32 %v1873_v50, %v1876_v45  ;;  %v3503_v63 = vshll.u32 %v4681_v18, %v3491_v31  ;;  %v3506_v12 = vshll.u32 %v4682_v20, %v3491_v31 }
 0x38d   : > { %v3495_v61 = vshrl.u32 %v4679_v14, %v3492_v15  ;;  %v3498_v29 = vshrl.u32 %v4680_v16, %v3492_v15  ;;  %v3501_v55 = vshrl.u32 %v4681_v18, %v3492_v15  ;;  %v3504_v0 = vshrl.u32 %v4682_v20, %v3492_v15 }
 0x38e   : > { %v3666_v11 = vsel %vm3583_vm10, %v3665_v8, %v3664_v52  ;;  %v1879_v46 = vsub.s32 0, %v7176_v59  ;;  %v3507_v7 = vshrl.u32 %v4683_v27, %v3492_v15  ;;  %v3525_v2 = vshll.u32 %v3485_v4, 8 }
 0x38f   : > { %v3669_v5 = vsel %vm7115_vm11, %v6957_v43, %v3666_v11  ;;  %v3496_v9 = vor.u32 %v3495_v61, %v3494_v22  ;;  %v3499_v17 = vor.u32 %v3498_v29, %v3497_v36  ;;  %v3502_v21 = vor.u32 %v3501_v55, %v3500_v26 }
 0x390   : > { %4576 = vcosq.f32 %v3669_v5  ;;  %v4130_v57 = vmin.u32 %v1879_v46, %v7176_v59  ;;  %v3505_v37 = vor.u32 %v3504_v0, %v3503_v63  ;;  %v3493_v30 = vshrl.u32 %v4678_v10, %v3492_v15 }
 0x391   : > { %4578 = vsinq.f32 %v3669_v5  ;;  %vm3509_vm7 = vcmp.lt.s32.totalorder %v3490_v38, 1  ;;  %v4141_v50 = vadd.s32 4294967169, %v2129_v42  ;;  %vm3680_vm8 = vcmp.eq.s32.totalorder %v7173_v53, 2 }
 0x392   : > { %v1881_v32 = vclz %v4130_v57  ;;  %v3508_v35 = vor.u32 %v3507_v7, %v3506_v12  ;;  %vm3510_vm9 = vcmp.lt.s32.totalorder %v3490_v38, 2  ;;  %vm3511_vm10 = vcmp.lt.s32.totalorder %v3490_v38, 3 }
 0x393   : > { %vm3512_vm11 = vcmp.lt.s32.totalorder %v3490_v38, 4  ;;  %vm3677_vm12 = vcmp.eq.s32.totalorder %v7173_v53, 0  ;;  %v3517_v25 = vsel %vm3509_vm7, %v3496_v9, %v3499_v17  ;;  %vm1815_vm13 = vcmp.lt.s32.totalorder %v7015_v33, 0 }
 0x394   : > { %v4131_v40 = vadd.s32 4294967294, %v1881_v32  ;;  %v3514_v62 = vsel %vm3512_vm11, %v3502_v21, 2102212464  ;;  %v3518_v48 = vsel %vm3512_vm11, %v3505_v37, 920167782  ;;  %v3513_v6 = vsel %vm3509_vm7, %v3493_v30, %v3496_v9 }
 0x395   : > { %v3519_v13 = vsel %vm3511_vm10, %v3502_v21, %v3518_v48  ;;  %v3521_v54 = vsel %vm3509_vm7, %v3499_v17, %v3502_v21  ;;  %v3522_v49 = vsel %vm3512_vm11, %v3508_v35, 1326507024  ;;  %vm3673_vm14 = vweird.f32 %v6957_v43 }
 0x396   : > { %vm4132_vm15 = vcmp.lt.s32.totalorder %v4131_v40, 0  ;;  %v3515_v47 = vsel %vm3511_vm10, %v3499_v17, %v3514_v62  ;;  %v3520_v56 = vsel %vm3510_vm9, %v3517_v25, %v3519_v13  ;;  %v3523_v31 = vsel %vm3511_vm10, %v3505_v37, %v3522_v49 }
 0x397   : > { %v1884_v28 = vsel %vm4132_vm15, 0, %v4131_v40  ;;  %v3524_v52 = vsel %vm3510_vm9, %v3521_v54, %v3523_v31  ;;  %v7205_v45 = vmul.u32.u64.low %v3525_v2, %v3520_v56  ;;  %v7206_v15 = vmul.u32.u64.high %v3525_v2, %v3520_v56, %v7205_v45 }
 0x398   : > { %v1869_v8 = vadd.s32 %v7130_v41, %v7137_v58  ;;  %v1885_v4 = vsub.s32 32, %v1884_v28  ;;  %v1889_v61 = vsub.s32 4294967266, %v1884_v28  ;;  %v1899_v42 = vsub.s32 4, %v7168_v19 }
 0x399   : > { %v3516_v22 = vsel %vm3510_vm9, %v3513_v6, %v3515_v47  ;;  %v7213_v29 = vmul.u32.u64.low %v3525_v2, %v3524_v52  ;;  %v7214_v55 = vmul.u32.u64.high %v3525_v2, %v3524_v52, %v7213_v29  ;;  %v2135_v5 = vadd.s32 1, %v4141_v50 }
 0x39a   : > { %v4577_v11 = vpop.eup %4576  ;;  %v1886_v26 = vshll.u32 %v7176_v59, %v1884_v28  ;;  %v1887_v9 = vshrl.u32 %v1869_v8, %v1885_v4  ;;  %v1890_v63 = vadd.s32 127, %v1889_v61  ;;  %v3535_v41 = vadd.s32 1, %v7206_v15 }
 0x39b   : > { %v4579_v46 = vpop.eup %4578  ;;  %v3681_v36 = vxor.u32 2147483648, %v4577_v11  ;;  %v7220_v58 = vand.u32 8388607, %v2125_v1  ;;  %vm2136_vm0 = vcmp.gt.s32.totalorder %v2135_v5, 0  ;;  %vm3676_vm2 = vcmp.lt.s32.totalorder %v7173_v53, 2 }
 0x39c   : > { %v3678_v0 = vxor.u32 2147483648, %v4579_v46  ;;  %v1888_v57 = vor.u32 %v1887_v9, %v1886_v26  ;;  %v1891_v17 = vshll.u32 %v1890_v63, 23  ;;  %v2137_v21 = vsel %vm2136_vm0, %v2135_v5, 0 }
 0x39d   : > { %v3682_v38 = vsel %vm3680_vm8, %v3681_v36, %v4579_v46  ;;  %v3532_v37 = vmul.u32 %v3525_v2, %v3516_v22  ;;  %vm3534_vm1 = vc.u32 %v7214_v55, %v7205_v45  ;;  %v1900_v32 = vsel %vm1815_vm13, %v1899_v42, %v7168_v19  ;;  %v7261_v22 = vld [vmem:[%s7610_s2] ss:$0 sm:$0xff] }
 0x39e   : > { %v3679_v59 = vsel %vm3677_vm12, %v4577_v11, %v3678_v0  ;;  %v1892_v7 = vor.u32 4788187, %v1891_v17  ;;  %v3536_v30 = vsel %vm3534_vm1, %v3535_v41, %v7206_v15  ;;  %vm7237_vm3 = vcmp.le.f32.partialorder %v1813_v39, 0.7853982 }
 0x39f   : > { %v3683_v12 = vsel %vm3676_vm2, %v3679_v59, %v3682_v38  ;;  %v3537_v2 = vadd.s32 %v3536_v30, %v3532_v37  ;;  %v2139_v35 = vand.u32 31, %v2137_v21  ;;  %v1895_v25 = vcvt.s32.f32 %v1888_v57 }
 0x3a0   : > { %v3684_v50 = vsel %vm3673_vm14, nan, %v3683_v12  ;;  %v1893_v62 = vand.u32 2147483647, %v1892_v7  ;;  %v2133_v48 = vor.u32 8388608, %v7220_v58  ;;  %v1902_v19 = vsel %vm7237_vm3, 0, %v1900_v32 }
 0x3a1   : > { %v3929_v40 = vmul.f32 %v6931_v44, %v3684_v50  ;;  %v3538_v6 = vadd.s32 536870912, %v3537_v2  ;;  %v7245_v43 = vshrl.u32 %v2137_v21, 5  ;;  %v2140_v13 = vsub.s32 32, %v2139_v35 }
 0x3a2   : > { %v1896_v39 = vmul.f32 %v1895_v25, %v1893_v62  ;;  %v2142_v54 = vshll.u32 %v4678_v10, %v2139_v35  ;;  %v2145_v49 = vshll.u32 %v4679_v14, %v2139_v35  ;;  %v2148_v47 = vshll.u32 %v4680_v16, %v2139_v35 }
 0x3a3   : > { %3961 = vst [vmem:[%s5175_s14 + $0xe8] sm:$0xff] %v3929_v40  ;;  %v3539_v44 = vshrl.u32 %v3538_v6, 30  ;;  %v2143_v56 = vshrl.u32 %v4679_v14, %v2140_v13  ;;  %v2146_v31 = vshrl.u32 %v4680_v16, %v2140_v13  ;;  %v2151_v28 = vshll.u32 %v4681_v18, %v2139_v35 }
 0x3a4   : > { %v1897_v52 = vxor.u32 2147483648, %v1896_v39  ;;  %v2149_v15 = vshrl.u32 %v4681_v18, %v2140_v13  ;;  %v2152_v8 = vshrl.u32 %v4682_v20, %v2140_v13  ;;  %v2155_v4 = vshrl.u32 %v4683_v27, %v2140_v13 }
 0x3a5   : > { %v3540_v61 = vshll.u32 %v3539_v44, 30  ;;  %v2144_v42 = vor.u32 %v2143_v56, %v2142_v54  ;;  %v2154_v11 = vshll.u32 %v4682_v20, %v2139_v35  ;;  %v7265_v29 = vadd.f32 %v7261_v22, %v6805_v51 }
 0x3a6   : > { %v1898_v5 = vsel %vm1815_vm13, %v1897_v52, %v1896_v39  ;;  %v2147_v46 = vor.u32 %v2146_v31, %v2145_v49  ;;  %v2150_v36 = vor.u32 %v2149_v15, %v2148_v47  ;;  %v2153_v26 = vor.u32 %v2152_v8, %v2151_v28 }
 0x3a7   : > { %v1901_v9 = vsel %vm7237_vm3, %v7015_v33, %v1898_v5  ;;  %v1906_v63 = vadd.s32 3, %v1902_v19  ;;  %v7272_v0 = vsub.s32 %v3537_v2, %v3540_v61  ;;  %v2156_v41 = vor.u32 %v2155_v4, %v2154_v11 }
 0x3a8   : > { %4580 = vcosq.f32 %v1901_v9  ;;  %vm2157_vm4 = vcmp.lt.s32.totalorder %v7245_v43, 1  ;;  %vm2158_vm5 = vcmp.lt.s32.totalorder %v7245_v43, 2  ;;  %vm2159_vm6 = vcmp.lt.s32.totalorder %v7245_v43, 3 }
 0x3a9   : > { %4582 = vsinq.f32 %v1901_v9  ;;  %vm7279_vm7 = vcmp.le.f32.partialorder %v3477_v3, 0.7853982  ;;  %v3543_v58 = vsub.s32 0, %v7272_v0  ;;  %v2141_v38 = vshrl.u32 %v4678_v10, %v2140_v13 }
 0x3aa   : > { %vm2160_vm8 = vcmp.lt.s32.totalorder %v7245_v43, 4  ;;  %v3563_v57 = vsub.s32 4, %v3539_v44  ;;  %v2165_v21 = vsel %vm2157_vm4, %v2144_v42, %v2147_v46  ;;  %v2169_v12 = vsel %vm2157_vm4, %v2147_v46, %v2150_v36 }
 0x3ab   : > { %v2162_v17 = vsel %vm2160_vm8, %v2150_v36, 2102212464  ;;  %v2166_v59 = vsel %vm2160_vm8, %v2153_v26, 920167782  ;;  %v4194_v37 = vmin.u32 %v3543_v58, %v7272_v0  ;;  %v2170_v7 = vsel %vm2160_vm8, %v2156_v41, 1326507024 }
 0x3ac   : > { %v2167_v3 = vsel %vm2159_vm6, %v2150_v36, %v2166_v59  ;;  %v1907_v32 = vand.u32 3, %v1906_v63  ;;  %v2171_v50 = vsel %vm2159_vm6, %v2153_v26, %v2170_v7  ;;  %v2173_v53 = vshll.u32 %v2133_v48, 8 }
 0x3ad   : > { %v2168_v30 = vsel %vm2158_vm5, %v2165_v21, %v2167_v3  ;;  %vm3479_vm9 = vcmp.lt.s32.totalorder %v7111_v23, 0  ;;  %v3545_v2 = vclz %v4194_v37  ;;  %v2161_v35 = vsel %vm2157_vm4, %v2141_v38, %v2144_v42 }
 0x3ae   : > { %v2163_v40 = vsel %vm2159_vm6, %v2147_v46, %v2162_v17  ;;  %v2172_v62 = vsel %vm2158_vm5, %v2169_v12, %v2171_v50  ;;  %v7304_v25 = vmul.u32.u64.low %v2173_v53, %v2168_v30  ;;  %v7305_v19 = vmul.u32.u64.high %v2173_v53, %v2168_v30, %v7304_v25  ;;  %v7337_v12 = vld [vmem:[%s7611_s3] ss:$0 sm:$0xff] }
 0x3af   : > { %v3792_v6 = vand.u32 2139095040, %v7265_v29  ;;  %vm1905_vm10 = vweird.f32 %v7015_v33  ;;  %v4195_v48 = vadd.s32 4294967294, %v3545_v2  ;;  %v3564_v13 = vsel %vm3479_vm9, %v3563_v57, %v3539_v44 }
 0x3b0   : > { %v7312_v39 = vmul.u32.u64.low %v2173_v53, %v2172_v62  ;;  %v7313_v54 = vmul.u32.u64.high %v2173_v53, %v2172_v62, %v7312_v39  ;;  %vm1908_vm11 = vcmp.lt.s32.totalorder %v1907_v32, 2  ;;  %vm1909_vm12 = vcmp.eq.s32.totalorder %v1907_v32, 0 }
 0x3b1   : > { %v2164_v49 = vsel %vm2158_vm5, %v2161_v35, %v2163_v40  ;;  %v3793_v47 = vshrl.u32 %v3792_v6, 23  ;;  %vm1912_vm13 = vcmp.eq.s32.totalorder %v1907_v32, 2  ;;  %v3533_v56 = vadd.s32 %v7205_v45, %v7214_v55 }
 0x3b2   : > { %vm4196_vm14 = vcmp.lt.s32.totalorder %v4195_v48, 0  ;;  %v3789_v31 = vand.u32 2147483647, %v7265_v29  ;;  %v4581_v28 = vpop.eup %4580  ;;  %v3566_v44 = vsel %vm7279_vm7, 0, %v3564_v13  ;;  %v2183_v15 = vadd.s32 1, %v7305_v19 }
 0x3b3   : > { %v3548_v52 = vsel %vm4196_vm14, 0, %v4195_v48  ;;  %v4205_v8 = vadd.s32 4294967169, %v3793_v47  ;;  %v4583_v4 = vpop.eup %4582  ;;  %v1913_v61 = vxor.u32 2147483648, %v4581_v28  ;;  %v2180_v11 = vmul.u32 %v2173_v53, %v2164_v49 }
 0x3b4   : > { %v3549_v43 = vsub.s32 32, %v3548_v52  ;;  %v3553_v42 = vsub.s32 4294967266, %v3548_v52  ;;  %v1910_v5 = vxor.u32 2147483648, %v4583_v4  ;;  %v3550_v46 = vshll.u32 %v7272_v0, %v3548_v52 }
 0x3b5   : > { %vm2182_vm15 = vc.u32 %v7313_v54, %v7304_v25  ;;  %v3799_v45 = vadd.s32 1, %v4205_v8  ;;  %v1914_v55 = vsel %vm1912_vm13, %v1913_v61, %v4583_v4  ;;  %v3570_v41 = vadd.s32 3, %v3566_v44 }
 0x3b6   : > { %v3551_v36 = vshrl.u32 %v3533_v56, %v3549_v43  ;;  %v3554_v26 = vadd.s32 127, %v3553_v42  ;;  %v2184_v9 = vsel %vm2182_vm15, %v2183_v15, %v7305_v19  ;;  %v1911_v63 = vsel %vm1909_vm12, %v4581_v28, %v1910_v5 }
 0x3b7   : > { %v2185_v58 = vadd.s32 %v2184_v9, %v2180_v11  ;;  %vm3800_vm0 = vcmp.gt.s32.totalorder %v3799_v45, 0  ;;  %v1915_v38 = vsel %vm1908_vm11, %v1911_v63, %v1914_v55  ;;  %v3796_v37 = vand.u32 8388607, %v3789_v31 }
 0x3b8   : > { %v3552_v57 = vor.u32 %v3551_v36, %v3550_v46  ;;  %v3555_v0 = vshll.u32 %v3554_v26, 23  ;;  %v3801_v17 = vsel %vm3800_vm0, %v3799_v45, 0  ;;  %v1916_v21 = vsel %vm1905_vm10, nan, %v1915_v38 }
 0x3b9   : > { %v2186_v59 = vadd.s32 536870912, %v2185_v58  ;;  %v3803_v3 = vand.u32 31, %v3801_v17  ;;  %v3912_v7 = vmul.f32 %v7337_v12, %v1916_v21  ;;  %v7343_v2 = vand.u32 3, %v3570_v41 }
 0x3ba   : > { %v3556_v32 = vor.u32 4788187, %v3555_v0  ;;  %v3559_v33 = vcvt.s32.f32 %v3552_v57  ;;  %v3797_v40 = vor.u32 8388608, %v3796_v37  ;;  %v3802_v44 = vshrl.u32 %v3801_v17, 5 }
 0x3bb   : > { %v7340_v30 = vshrl.u32 %v2186_v59, 30  ;;  %v3804_v50 = vsub.s32 32, %v3803_v3  ;;  %3944 = vst [vmem:[%s5175_s14 + $0x60] sm:$0xff] %v3912_v7  ;;  %v3806_v62 = vshll.u32 %v4678_v10, %v3803_v3  ;;  %v3809_v47 = vshll.u32 %v4679_v14, %v3803_v3 }
 0x3bc   : > { %v3557_v53 = vand.u32 2147483647, %v3556_v32  ;;  %v3812_v56 = vshll.u32 %v4680_v16, %v3803_v3  ;;  %v3815_v15 = vshll.u32 %v4681_v18, %v3803_v3  ;;  %v3818_v8 = vshll.u32 %v4682_v20, %v3803_v3 }
 0x3bd   : > { %v2188_v35 = vshll.u32 %v7340_v30, 30  ;;  %v3807_v19 = vshrl.u32 %v4679_v14, %v3804_v50  ;;  %v3810_v48 = vshrl.u32 %v4680_v16, %v3804_v50  ;;  %v3813_v13 = vshrl.u32 %v4681_v18, %v3804_v50 }
 0x3be   : > { %v3560_v6 = vmul.f32 %v3559_v33, %v3557_v53  ;;  %v3816_v39 = vshrl.u32 %v4682_v20, %v3804_v50  ;;  %v3819_v28 = vshrl.u32 %v4683_v27, %v3804_v50  ;;  %vm2127_vm2 = vcmp.lt.s32.totalorder %v7160_v60, 0 }
 0x3bf   : > { %v7351_v49 = vsub.s32 %v2185_v58, %v2188_v35  ;;  %v3808_v61 = vor.u32 %v3807_v19, %v3806_v62  ;;  %v3811_v43 = vor.u32 %v3810_v48, %v3809_v47  ;;  %v3814_v42 = vor.u32 %v3813_v13, %v3812_v56 }
 0x3c0   : > { %v3561_v52 = vxor.u32 2147483648, %v3560_v6  ;;  %v2181_v5 = vadd.s32 %v7304_v25, %v7313_v54  ;;  %v3817_v46 = vor.u32 %v3816_v39, %v3815_v15  ;;  %v7366_v45 = vadd.f32 %v7261_v22, %v6906_v24 }
 0x3c1   : > { %v2191_v4 = vsub.s32 0, %v7351_v49  ;;  %v3820_v26 = vor.u32 %v3819_v28, %v3818_v8  ;;  %v3837_v9 = vshll.u32 %v3797_v40, 8  ;;  %v2211_v63 = vsub.s32 4, %v7340_v30 }
 0x3c2   : > { %v3562_v11 = vsel %vm3479_vm9, %v3561_v52, %v3560_v6  ;;  %vm3821_vm1 = vcmp.lt.s32.totalorder %v3802_v44, 1  ;;  %vm3824_vm3 = vcmp.lt.s32.totalorder %v3802_v44, 4  ;;  %vm7375_vm4 = vcmp.le.f32.partialorder %v2125_v1, 0.7853982 }
 0x3c3   : > { %v3565_v55 = vsel %vm7279_vm7, %v7111_v23, %v3562_v11  ;;  %v4142_v36 = vmin.u32 %v2191_v4, %v7351_v49  ;;  %v3826_v54 = vsel %vm3824_vm3, %v3814_v42, 2102212464  ;;  %v3829_v51 = vsel %vm3821_vm1, %v3808_v61, %v3811_v43 }
 0x3c4   : > { %4584 = vcosq.f32 %v3565_v55  ;;  %v3805_v41 = vshrl.u32 %v4678_v10, %v3804_v50  ;;  %vm3823_vm5 = vcmp.lt.s32.totalorder %v3802_v44, 3  ;;  %v3830_v58 = vsel %vm3824_vm3, %v3817_v46, 920167782 }
 0x3c5   : > { %4586 = vsinq.f32 %v3565_v55  ;;  %v2193_v24 = vclz %v4142_v36  ;;  %v3833_v38 = vsel %vm3821_vm1, %v3811_v43, %v3814_v42  ;;  %vm3822_vm6 = vcmp.lt.s32.totalorder %v3802_v44, 2 }
 0x3c6   : > { %v3831_v0 = vsel %vm3823_vm5, %v3814_v42, %v3830_v58  ;;  %v3834_v17 = vsel %vm3824_vm3, %v3820_v26, 1326507024  ;;  %v3825_v21 = vsel %vm3821_vm1, %v3805_v41, %v3808_v61  ;;  %v3827_v59 = vsel %vm3823_vm5, %v3811_v43, %v3826_v54 }
 0x3c7   : > { %v4143_v57 = vadd.s32 4294967294, %v2193_v24  ;;  %v3832_v37 = vsel %vm3822_vm6, %v3829_v51, %v3831_v0  ;;  %v3835_v1 = vsel %vm3823_vm5, %v3817_v46, %v3834_v17  ;;  %v2024_v35 = vand.u32 2139095040, %v7366_v45 }
 0x3c8   : > { %v3836_v3 = vsel %vm3822_vm6, %v3833_v38, %v3835_v1  ;;  %v7382_v7 = vmul.u32.u64.low %v3837_v9, %v3832_v37  ;;  %v7383_v32 = vmul.u32.u64.high %v3837_v9, %v3832_v37, %v7382_v7  ;;  %vm3569_vm8 = vweird.f32 %v7111_v23 }
 0x3c9   : > { %vm4144_vm7 = vcmp.lt.s32.totalorder %v4143_v57, 0  ;;  %v7386_v53 = vmul.u32.u64.low %v3837_v9, %v3836_v3  ;;  %v7387_v33 = vmul.u32.u64.high %v3837_v9, %v3836_v3, %v7386_v53  ;;  %v2212_v19 = vsel %vm2127_vm2, %v2211_v63, %v7340_v30 }
 0x3ca   : > { %v2196_v50 = vsel %vm4144_vm7, 0, %v4143_v57  ;;  %v3828_v6 = vsel %vm3822_vm6, %v3825_v21, %v3827_v59  ;;  %vm3572_vm9 = vcmp.lt.s32.totalorder %v7343_v2, 2  ;;  %vm3576_vm10 = vcmp.eq.s32.totalorder %v7343_v2, 2 }
 0x3cb   : > { %v2197_v40 = vsub.s32 32, %v2196_v50  ;;  %v2201_v62 = vsub.s32 4294967266, %v2196_v50  ;;  %v2021_v48 = vand.u32 2147483647, %v7366_v45  ;;  %v2025_v13 = vshrl.u32 %v2024_v35, 23 }
 0x3cc   : > { %v2198_v39 = vshll.u32 %v7351_v49, %v2196_v50  ;;  %v3847_v28 = vadd.s32 1, %v7383_v32  ;;  %v2214_v15 = vsel %vm7375_vm4, 0, %v2212_v19  ;;  %v3844_v30 = vmul.u32 %v3837_v9, %v3828_v6 }
 0x3cd   : > { %v2199_v47 = vshrl.u32 %v2181_v5, %v2197_v40  ;;  %v2202_v56 = vadd.s32 127, %v2201_v62  ;;  %vm3846_vm11 = vc.u32 %v7387_v33, %v7382_v7  ;;  %v4137_v44 = vadd.s32 4294967169, %v2025_v13 }
 0x3ce   : > { %v4585_v52 = vpop.eup %4584  ;;  %v3848_v42 = vsel %vm3846_vm11, %v3847_v28, %v7383_v32  ;;  %v7407_v46 = vadd.f32 %v7261_v22, %v6997_v34  ;;  %vm3573_vm12 = vcmp.eq.s32.totalorder %v7343_v2, 0  ;;  %v2218_v26 = vadd.s32 3, %v2214_v15 }
 0x3cf   : > { %v4587_v8 = vpop.eup %4586  ;;  %v3577_v4 = vxor.u32 2147483648, %v4585_v52  ;;  %v2200_v61 = vor.u32 %v2199_v47, %v2198_v39  ;;  %v2203_v43 = vshll.u32 %v2202_v56, 23  ;;  %v3849_v11 = vadd.s32 %v3848_v42, %v3844_v30 }
 0x3d0   : > { %v3574_v49 = vxor.u32 2147483648, %v4587_v8  ;;  %v2031_v5 = vadd.s32 1, %v4137_v44  ;;  %v2028_v24 = vand.u32 8388607, %v2021_v48  ;;  %v3688_v57 = vand.u32 2139095040, %v7407_v46 }
 0x3d1   : > { %v3578_v55 = vsel %vm3576_vm10, %v3577_v4, %v4587_v8  ;;  %v2204_v36 = vor.u32 4788187, %v2203_v43  ;;  %v3850_v63 = vadd.s32 536870912, %v3849_v11  ;;  %v2207_v34 = vcvt.s32.f32 %v2200_v61 }
 0x3d2   : > { %v3575_v9 = vsel %vm3573_vm12, %v4585_v52, %v3574_v49  ;;  %vm2032_vm13 = vcmp.gt.s32.totalorder %v2031_v5, 0  ;;  %v7424_v37 = vand.u32 3, %v2218_v26  ;;  %v2029_v1 = vor.u32 8388608, %v2028_v24 }
 0x3d3   : > { %v3579_v54 = vsel %vm3572_vm9, %v3575_v9, %v3578_v55  ;;  %v2205_v51 = vand.u32 2147483647, %v2204_v36  ;;  %v2033_v22 = vsel %vm2032_vm13, %v2031_v5, 0  ;;  %v7418_v58 = vshrl.u32 %v3850_v63, 30 }
 0x3d4   : > { %v3580_v41 = vsel %vm3569_vm8, nan, %v3579_v54  ;;  %v2035_v38 = vand.u32 31, %v2033_v22  ;;  %v2034_v23 = vshrl.u32 %v2033_v22, 5  ;;  %v3689_v50 = vshrl.u32 %v3688_v57, 23 }
 0x3d5   : > { %v3928_v0 = vmul.f32 %v7337_v12, %v3580_v41  ;;  %v2208_v17 = vmul.f32 %v2207_v34, %v2205_v51  ;;  %v3852_v21 = vshll.u32 %v7418_v58, 30  ;;  %v2069_v4 = vshll.u32 %v2029_v1, 8 }
 0x3d6   : > { %v2036_v59 = vsub.s32 32, %v2035_v38  ;;  %v2038_v35 = vshll.u32 %v4678_v10, %v2035_v38  ;;  %v2041_v13 = vshll.u32 %v4679_v14, %v2035_v38  ;;  %v2044_v39 = vshll.u32 %v4680_v16, %v2035_v38 }
 0x3d7   : > { %3960 = vst [vmem:[%s5175_s14 + $0xe0] sm:$0xff] %v3928_v0  ;;  %v2209_v2 = vxor.u32 2147483648, %v2208_v17  ;;  %v7426_v3 = vsub.s32 %v3849_v11, %v3852_v21  ;;  %v2047_v56 = vshll.u32 %v4681_v18, %v2035_v38  ;;  %v2050_v25 = vshll.u32 %v4682_v20, %v2035_v38 }
 0x3d8   : > { %v2039_v32 = vshrl.u32 %v4679_v14, %v2036_v59  ;;  %v2042_v40 = vshrl.u32 %v4680_v16, %v2036_v59  ;;  %v2045_v62 = vshrl.u32 %v4681_v18, %v2036_v59  ;;  %v2048_v28 = vshrl.u32 %v4682_v20, %v2036_v59 }
 0x3d9   : > { %v2210_v53 = vsel %vm2127_vm2, %v2209_v2, %v2208_v17  ;;  %v3855_v6 = vsub.s32 0, %v7426_v3  ;;  %v2051_v8 = vshrl.u32 %v4683_v27, %v2036_v59  ;;  %v2037_v43 = vshrl.u32 %v4678_v10, %v2036_v59 }
 0x3da   : > { %v2213_v19 = vsel %vm7375_vm4, %v7160_v60, %v2210_v53  ;;  %v2040_v47 = vor.u32 %v2039_v32, %v2038_v35  ;;  %v2043_v15 = vor.u32 %v2042_v40, %v2041_v13  ;;  %v2046_v30 = vor.u32 %v2045_v62, %v2044_v39 }
 0x3db   : > { %4588 = vcosq.f32 %v2213_v19  ;;  %v4206_v52 = vmin.u32 %v3855_v6, %v7426_v3  ;;  %v2049_v44 = vor.u32 %v2048_v28, %v2047_v56  ;;  %vm2053_vm14 = vcmp.lt.s32.totalorder %v2034_v23, 1 }
 0x3dc   : > { %4590 = vsinq.f32 %v2213_v19  ;;  %v4201_v42 = vadd.s32 4294967169, %v3689_v50  ;;  %v2052_v49 = vor.u32 %v2051_v8, %v2050_v25  ;;  %vm2054_vm15 = vcmp.lt.s32.totalorder %v2034_v23, 2 }
 0x3dd   : > { %v3857_v61 = vclz %v4206_v52  ;;  %vm2055_vm0 = vcmp.lt.s32.totalorder %v2034_v23, 3  ;;  %vm2056_vm2 = vcmp.lt.s32.totalorder %v2034_v23, 4  ;;  %vm2221_vm1 = vcmp.eq.s32.totalorder %v7424_v37, 0 }
 0x3de   : > { %v2058_v5 = vsel %vm2056_vm2, %v2046_v30, 2102212464  ;;  %v2061_v55 = vsel %vm2053_vm14, %v2040_v47, %v2043_v15  ;;  %v2062_v36 = vsel %vm2056_vm2, %v2049_v44, 920167782  ;;  %vm2220_vm3 = vcmp.lt.s32.totalorder %v7424_v37, 2 }
 0x3df   : > { %v4207_v11 = vadd.s32 4294967294, %v3857_v61  ;;  %v2057_v26 = vsel %vm2053_vm14, %v2037_v43, %v2040_v47  ;;  %v2063_v9 = vsel %vm2055_vm0, %v2046_v30, %v2062_v36  ;;  %v2065_v63 = vsel %vm2053_vm14, %v2043_v15, %v2046_v30 }
 0x3e0   : > { %v2066_v24 = vsel %vm2056_vm2, %v2052_v49, 1326507024  ;;  %vm2217_vm4 = vweird.f32 %v7160_v60  ;;  %v2059_v54 = vsel %vm2055_vm0, %v2043_v15, %v2058_v5  ;;  %v2064_v51 = vsel %vm2054_vm15, %v2061_v55, %v2063_v9 }
 0x3e1   : > { %vm4208_vm5 = vcmp.lt.s32.totalorder %v4207_v11, 0  ;;  %v2067_v34 = vsel %vm2055_vm0, %v2049_v44, %v2066_v24  ;;  %v7454_v38 = vmul.u32.u64.low %v2069_v4, %v2064_v51  ;;  %v7455_v57 = vmul.u32.u64.high %v2069_v4, %v2064_v51, %v7454_v38 }
 0x3e2   : > { %v3860_v22 = vsel %vm4208_vm5, 0, %v4207_v11  ;;  %v2068_v41 = vsel %vm2054_vm15, %v2065_v63, %v2067_v34  ;;  %vm2224_vm6 = vcmp.eq.s32.totalorder %v7424_v37, 2  ;;  %v3845_v0 = vadd.s32 %v7382_v7, %v7387_v33 }
 0x3e3   : > { %v3861_v17 = vsub.s32 32, %v3860_v22  ;;  %v3865_v21 = vsub.s32 4294967266, %v3860_v22  ;;  %v2060_v2 = vsel %vm2054_vm15, %v2057_v26, %v2059_v54  ;;  %v3695_v50 = vadd.s32 1, %v4201_v42 }
 0x3e4   : > { %v7462_v1 = vmul.u32.u64.low %v2069_v4, %v2068_v41  ;;  %v7463_v32 = vmul.u32.u64.high %v2069_v4, %v2068_v41, %v7462_v1  ;;  %v3862_v40 = vshll.u32 %v7426_v3, %v3860_v22  ;;  %v2079_v13 = vadd.s32 1, %v7455_v57 }
 0x3e5   : > { %v4589_v59 = vpop.eup %4588  ;;  %v3863_v62 = vshrl.u32 %v3845_v0, %v3861_v17  ;;  %v3866_v19 = vadd.s32 127, %v3865_v21  ;;  %v3685_v7 = vand.u32 2147483647, %v7407_v46  ;;  %vm3696_vm7 = vcmp.gt.s32.totalorder %v3695_v50, 0 }
 0x3e6   : > { %v4591_v53 = vpop.eup %4590  ;;  %v2225_v35 = vxor.u32 2147483648, %v4589_v59  ;;  %v3697_v47 = vsel %vm3696_vm7, %v3695_v50, 0  ;;  %v3875_v28 = vsub.s32 4, %v7418_v58  ;;  %v2076_v3 = vmul.u32 %v2069_v4, %v2060_v2 }
 0x3e7   : > { %v2222_v6 = vxor.u32 2147483648, %v4591_v53  ;;  %v3864_v23 = vor.u32 %v3863_v62, %v3862_v40  ;;  %v3867_v39 = vshll.u32 %v3866_v19, 23  ;;  %vm2078_vm8 = vc.u32 %v7463_v32, %v7454_v38 }
 0x3e8   : > { %v2226_v33 = vsel %vm2224_vm6, %v2225_v35, %v4591_v53  ;;  %vm3791_vm9 = vcmp.lt.s32.totalorder %v7265_v29, 0  ;;  %v2080_v30 = vsel %vm2078_vm8, %v2079_v13, %v7455_v57  ;;  %vm7483_vm10 = vcmp.le.f32.partialorder %v3789_v31, 0.7853982 }
 0x3e9   : > { %v2223_v56 = vsel %vm2221_vm1, %v4589_v59, %v2222_v6  ;;  %v3868_v15 = vor.u32 4788187, %v3867_v39  ;;  %v2081_v8 = vadd.s32 %v2080_v30, %v2076_v3  ;;  %v3699_v4 = vand.u32 31, %v3697_v47 }
 0x3ea   : > { %v2227_v52 = vsel %vm2220_vm3, %v2223_v56, %v2226_v33  ;;  %v3871_v43 = vcvt.s32.f32 %v3864_v23  ;;  %v3692_v42 = vand.u32 8388607, %v3685_v7  ;;  %v3876_v60 = vsel %vm3791_vm9, %v3875_v28, %v7418_v58 }
 0x3eb   : > { %v2228_v44 = vsel %vm2217_vm4, nan, %v2227_v52  ;;  %v3869_v61 = vand.u32 2147483647, %v3868_v15  ;;  %v2082_v49 = vadd.s32 536870912, %v2081_v8  ;;  %v3698_v11 = vshrl.u32 %v3697_v47, 5 }
 0x3ec   : > { %v3915_v37 = vmul.f32 %v7337_v12, %v2228_v44  ;;  %v3700_v5 = vsub.s32 32, %v3699_v4  ;;  %v3702_v55 = vshll.u32 %v4678_v10, %v3699_v4  ;;  %v3705_v36 = vshll.u32 %v4679_v14, %v3699_v4 }
 0x3ed   : > { %v3872_v31 = vmul.f32 %v3871_v43, %v3869_v61  ;;  %v3708_v26 = vshll.u32 %v4680_v16, %v3699_v4  ;;  %v7497_v9 = vshrl.u32 %v2082_v49, 30  ;;  %v3711_v54 = vshll.u32 %v4681_v18, %v3699_v4 }
 0x3ee   : > { %3947 = vst [vmem:[%s5175_s14 + $0x78] sm:$0xff] %v3915_v37  ;;  %v3703_v63 = vshrl.u32 %v4679_v14, %v3700_v5  ;;  %v3706_v24 = vshrl.u32 %v4680_v16, %v3700_v5  ;;  %v3709_v51 = vshrl.u32 %v4681_v18, %v3700_v5  ;;  %v3712_v34 = vshrl.u32 %v4682_v20, %v3700_v5 }
 0x3ef   : > { %v3873_v58 = vxor.u32 2147483648, %v3872_v31  ;;  %v3715_v22 = vshrl.u32 %v4683_v27, %v3700_v5  ;;  %v3878_v41 = vsel %vm7483_vm10, 0, %v3876_v60  ;;  %v2084_v57 = vshll.u32 %v7497_v9, 30 }
 0x3f0   : > { %v3704_v0 = vor.u32 %v3703_v63, %v3702_v55  ;;  %v3714_v17 = vshll.u32 %v4682_v20, %v3699_v4  ;;  %v3707_v16 = vor.u32 %v3706_v24, %v3705_v36  ;;  %v3710_v21 = vor.u32 %v3709_v51, %v3708_v26 }
 0x3f1   : > { %v3874_v14 = vsel %vm3791_vm9, %v3873_v58, %v3872_v31  ;;  %v3713_v59 = vor.u32 %v3712_v34, %v3711_v54  ;;  %v2085_v2 = vsub.s32 %v2081_v8, %v2084_v57  ;;  %v3693_v27 = vor.u32 8388608, %v3692_v42 }
 0x3f2   : > { %v3877_v18 = vsel %vm7483_vm10, %v7265_v29, %v3874_v14  ;;  %v3716_v1 = vor.u32 %v3715_v22, %v3714_v17  ;;  %v3882_v50 = vadd.s32 3, %v3878_v41  ;;  %vm3717_vm11 = vcmp.lt.s32.totalorder %v3698_v11, 1 }
 0x3f3   : > { %4592 = vcosq.f32 %v3877_v18  ;;  %vm3718_vm12 = vcmp.lt.s32.totalorder %v3698_v11, 2  ;;  %v2087_v53 = vsub.s32 0, %v2085_v2  ;;  %vm3719_vm13 = vcmp.lt.s32.totalorder %v3698_v11, 3 }
 0x3f4   : > { %4594 = vsinq.f32 %v3877_v18  ;;  %vm3720_vm14 = vcmp.lt.s32.totalorder %v3698_v11, 4  ;;  %v3701_v20 = vshrl.u32 %v4678_v10, %v3700_v5  ;;  %v3725_v40 = vsel %vm3717_vm11, %v3704_v0, %v3707_v16 }
 0x3f5   : > { %v3722_v35 = vsel %vm3720_vm14, %v3710_v21, 2102212464  ;;  %v3726_v62 = vsel %vm3720_vm14, %v3713_v59, 920167782  ;;  %v4138_v19 = vmin.u32 %v2087_v53, %v2085_v2  ;;  %v3729_v13 = vsel %vm3717_vm11, %v3707_v16, %v3710_v21 }
 0x3f6   : > { %v3727_v6 = vsel %vm3719_vm13, %v3710_v21, %v3726_v62  ;;  %v3730_v33 = vsel %vm3720_vm14, %v3716_v1, 1326507024  ;;  %v3733_v47 = vshll.u32 %v3693_v27, 8  ;;  %v3883_v56 = vand.u32 3, %v3882_v50 }
 0x3f7   : > { %v3728_v23 = vsel %vm3718_vm12, %v3725_v40, %v3727_v6  ;;  %v3731_v39 = vsel %vm3719_vm13, %v3713_v59, %v3730_v33  ;;  %v2089_v28 = vclz %v4138_v19  ;;  %v3721_v3 = vsel %vm3717_vm11, %v3701_v20, %v3704_v0 }
 0x3f8   : > { %v3723_v10 = vsel %vm3719_vm13, %v3707_v16, %v3722_v35  ;;  %v3732_v52 = vsel %vm3718_vm12, %v3729_v13, %v3731_v39  ;;  %v7523_v15 = vmul.u32.u64.low %v3733_v47, %v3728_v23  ;;  %v7524_v30 = vmul.u32.u64.high %v3733_v47, %v3728_v23, %v7523_v15 }
 0x3f9   : > { %v4139_v44 = vadd.s32 4294967294, %v2089_v28  ;;  %v7526_v25 = vmul.u32.u64.low %v3733_v47, %v3732_v52  ;;  %v7527_v8 = vmul.u32.u64.high %v3733_v47, %v3732_v52, %v7526_v25  ;;  %v3724_v4 = vsel %vm3718_vm12, %v3721_v3, %v3723_v10 }
 0x3fa   : > { %vm3885_vm0 = vcmp.eq.s32.totalorder %v3883_v56, 0  ;;  %vm3888_vm2 = vcmp.eq.s32.totalorder %v3883_v56, 2  ;;  %v3743_v43 = vadd.s32 1, %v7524_v30  ;;  %v2077_v49 = vadd.s32 %v7454_v38, %v7463_v32 }
 0x3fb   : > { %vm4140_vm15 = vcmp.lt.s32.totalorder %v4139_v44, 0  ;;  %v3740_v26 = vmul.u32 %v3733_v47, %v3724_v4  ;;  %vm3742_vm1 = vc.u32 %v7527_v8, %v7523_v15  ;;  %vm3884_vm3 = vcmp.lt.s32.totalorder %v3883_v56, 2 }
 0x3fc   : > { %v2092_v61 = vsel %vm4140_vm15, 0, %v4139_v44  ;;  %v3744_v54 = vsel %vm3742_vm1, %v3743_v43, %v7524_v30  ;;  %vm3881_vm4 = vweird.f32 %v7265_v29  ;;  %v2107_v18 = vsub.s32 4, %v7497_v9 }
 0x3fd   : > { %v4593_v37 = vpop.eup %4592  ;;  %v2093_v5 = vsub.s32 32, %v2092_v61  ;;  %v2097_v31 = vsub.s32 4294967266, %v2092_v61  ;;  %v2094_v36 = vshll.u32 %v2085_v2, %v2092_v61  ;;  %v3745_v51 = vadd.s32 %v3744_v54, %v3740_v26 }
 0x3fe   : > { %v4595_v42 = vpop.eup %4594  ;;  %v3889_v60 = vxor.u32 2147483648, %v4593_v37  ;;  %vm2023_vm5 = vcmp.lt.s32.totalorder %v7366_v45, 0  ;;  %vm2022_vm6 = vcmp.le.f32.partialorder %v2021_v48, 0.7853982  ;;  %v3741_v13 = vadd.s32 %v7523_v15, %v7527_v8 }
 0x3ff   : > { %v3886_v55 = vxor.u32 2147483648, %v4595_v42  ;;  %v2095_v63 = vshrl.u32 %v2077_v49, %v2093_v5  ;;  %v2098_v24 = vadd.s32 127, %v2097_v31  ;;  %v3746_v41 = vadd.s32 536870912, %v3745_v51 }
 0x400   : > { %v3890_v11 = vsel %vm3888_vm2, %v3889_v60, %v4595_v42  ;;  %v2108_v50 = vsel %vm2023_vm5, %v2107_v18, %v7497_v9  ;;  %vm2113_vm11 = vweird.f32 %v7366_v45  ;;  %vm3687_vm12 = vcmp.lt.s32.totalorder %v7407_v46, 0 }
 0x401   : > { %v3887_v58 = vsel %vm3885_vm0, %v4593_v37, %v3886_v55  ;;  %v2096_v32 = vor.u32 %v2095_v63, %v2094_v36  ;;  %v2099_v34 = vshll.u32 %v2098_v24, 23  ;;  %v3747_v17 = vshrl.u32 %v3746_v41, 30 }
 0x402   : > { %v3891_v38 = vsel %vm3884_vm3, %v3887_v58, %v3890_v11  ;;  %v2110_v35 = vsel %vm2022_vm6, 0, %v2108_v50  ;;  %vm3686_vm13 = vcmp.le.f32.partialorder %v3685_v7, 0.7853982  ;;  %vm3777_vm2 = vweird.f32 %v7407_v46 }
 0x403   : > { %v3892_v22 = vsel %vm3881_vm4, nan, %v3891_v38  ;;  %v2100_v0 = vor.u32 4788187, %v2099_v34  ;;  %v2103_v16 = vcvt.s32.f32 %v2096_v32  ;;  %v3748_v21 = vshll.u32 %v3747_v17, 30 }
 0x404   : > { %v3931_v57 = vmul.f32 %v7337_v12, %v3892_v22  ;;  %v2114_v19 = vadd.s32 3, %v2110_v35  ;;  %v3771_v60 = vsub.s32 4, %v3747_v17 }
 0x405   : > { %v2101_v14 = vand.u32 2147483647, %v2100_v0  ;;  %v3749_v2 = vsub.s32 %v3745_v51, %v3748_v21 }
 0x406   : > { %3963 = vst [vmem:[%s5175_s14 + $0xf8] sm:$0xff] %v3931_v57  ;;  %v2115_v39 = vand.u32 3, %v2114_v19  ;;  %v3772_v31 = vsel %vm3687_vm12, %v3771_v60, %v3747_v17 }
 0x407   : > { %v2104_v59 = vmul.f32 %v2103_v16, %v2101_v14  ;;  %v3751_v29 = vsub.s32 0, %v3749_v2  ;;  %v3774_v55 = vsel %vm3686_vm13, 0, %v3772_v31 }
 0x408   : > { %vm2120_vm8 = vcmp.eq.s32.totalorder %v2115_v39, 2  ;;  %vm2117_vm9 = vcmp.eq.s32.totalorder %v2115_v39, 0  ;;  %vm2116_vm10 = vcmp.lt.s32.totalorder %v2115_v39, 2  ;;  %v3778_v36 = vadd.s32 3, %v3774_v55 }
 0x409   : > { %v2105_v27 = vxor.u32 2147483648, %v2104_v59  ;;  %v4202_v20 = vmin.u32 %v3751_v29, %v3749_v2 }
 0x40a   : > { %v3779_v26 = vand.u32 3, %v3778_v36 }
 0x40b   : > { %v2106_v1 = vsel %vm2023_vm5, %v2105_v27, %v2104_v59  ;;  %v3753_v40 = vclz %v4202_v20 }
 0x40c   : > { %v2109_v53 = vsel %vm2022_vm6, %v7366_v45, %v2106_v1  ;;  %vm3784_vm14 = vcmp.eq.s32.totalorder %v3779_v26, 2  ;;  %vm3781_vm15 = vcmp.eq.s32.totalorder %v3779_v26, 0  ;;  %vm3780_vm0 = vcmp.lt.s32.totalorder %v3779_v26, 2 }
 0x40d   : > { %4596 = vcosq.f32 %v2109_v53  ;;  %v4203_v62 = vadd.s32 4294967294, %v3753_v40 }
 0x40e   : > { %4598 = vsinq.f32 %v2109_v53 }
 0x40f   : > { %vm4204_vm7 = vcmp.lt.s32.totalorder %v4203_v62, 0 }
 0x410   : > { %v3756_v6 = vsel %vm4204_vm7, 0, %v4203_v62 }
 0x411   : > { %v3757_v33 = vsub.s32 32, %v3756_v6  ;;  %v3761_v23 = vsub.s32 4294967266, %v3756_v6  ;;  %v3758_v48 = vshll.u32 %v3749_v2, %v3756_v6 }
 0x413   : > { %v3759_v47 = vshrl.u32 %v3741_v13, %v3757_v33  ;;  %v3762_v56 = vadd.s32 127, %v3761_v23 }
 0x415   : > { %v3760_v10 = vor.u32 %v3759_v47, %v3758_v48  ;;  %v3763_v52 = vshll.u32 %v3762_v56, 23 }
 0x417   : > { %v4597_v9 = vpop.eup %4596  ;;  %v3764_v25 = vor.u32 4788187, %v3763_v52  ;;  %v3767_v37 = vcvt.s32.f32 %v3760_v10 }
 0x418   : > { %v4599_v28 = vpop.eup %4598  ;;  %v2121_v3 = vxor.u32 2147483648, %v4597_v9 }
 0x419   : > { %v2118_v30 = vxor.u32 2147483648, %v4599_v28  ;;  %v3765_v8 = vand.u32 2147483647, %v3764_v25 }
 0x41a   : > { %v2122_v44 = vsel %vm2120_vm8, %v2121_v3, %v4599_v28 }
 0x41b   : > { %v2119_v4 = vsel %vm2117_vm9, %v4597_v9, %v2118_v30  ;;  %v3768_v42 = vmul.f32 %v3767_v37, %v3765_v8 }
 0x41c   : > { %v2123_v15 = vsel %vm2116_vm10, %v2119_v4, %v2122_v44 }
 0x41d   : > { %v2124_v61 = vsel %vm2113_vm11, nan, %v2123_v15  ;;  %v3769_v49 = vxor.u32 2147483648, %v3768_v42 }
 0x41e   : > { %v3914_v43 = vmul.f32 %v7337_v12, %v2124_v61 }
 0x41f   : > { %v3770_v5 = vsel %vm3687_vm12, %v3769_v49, %v3768_v42 }
 0x420   : > { %3946 = vst [vmem:[%s5175_s14 + $0x70] sm:$0xff] %v3914_v43  ;;  %v3773_v45 = vsel %vm3686_vm13, %v7407_v46, %v3770_v5 }
 0x421   : > { %4600 = vcosq.f32 %v3773_v45 }
 0x422   : > { %4602 = vsinq.f32 %v3773_v45 }
 0x42b   : > { %v4601_v11 = vpop.eup %4600 }
 0x42c   : > { %v4603_v63 = vpop.eup %4602  ;;  %v3785_v24 = vxor.u32 2147483648, %v4601_v11 }
 0x42d   : > { %v3782_v54 = vxor.u32 2147483648, %v4603_v63 }
 0x42e   : > { %v3786_v7 = vsel %vm3784_vm14, %v3785_v24, %v4603_v63 }
 0x42f   : > { %v3783_v58 = vsel %vm3781_vm15, %v4601_v11, %v3782_v54 }
 0x430   : > { %v3787_v51 = vsel %vm3780_vm0, %v3783_v58, %v3786_v7 }
 0x431   : > { %v3788_v38 = vsel %vm3777_vm2, nan, %v3787_v51 }
 0x432   : > { %v3930_v32 = vmul.f32 %v7337_v12, %v3788_v38 }
 0x434   : > { %3962 = vst [vmem:[%s5175_s14 + $0xf0] sm:$0xff] %v3930_v32 }
 0x435   : > { %4627 = shalt.err (!%p4624_p3)
}
 0x436   : > { %s4628_s10 = scalar_lea.hbm %s7559_s7, 4096  ;;  %s4632_s20 = scalar_lea.hbm %s7612_s4, 8192 }
 0x437   : > { %p4629_p4 = scmp.ne.s32.totalorder %s7559_s7, %s4628_s10  ;;  %p4633_p9 = scmp.lt.u32.totalorder %s7559_s7, %s7612_s4 }
 0x438   : > { %p4634_p10 = scmp.lt.u32.totalorder %s4632_s20, %s4628_s10  ;;  %p4636_p12 = scmp.lt.u32.totalorder %s4628_s10, %s7559_s7 }
 0x439   : > { %p4630_p7 = pnand %p4629_p4, %p4750_p5 }
 0x43a   : > { %p4635_p11 = por %p4634_p10, %p4633_p9 }
 0x43b   : > { %p4631_p8 = pneg %p4630_p7 }
 0x43c   : > { %p4637_p13 = por %p4636_p12, %p4635_p11 }
 0x43e   : > { %p4638_p0 = pnand %p4637_p13, %p4631_p8 }
 0x440   : > { %4641 = shalt.err (!%p4638_p0)
}
 0x441   : > { %s4685_s27 = smov 128   ;;  %s4686_s28 = smov 8  }
 0x442   : > { %4429 = dma.vmem_to_hbm [thread:$0]  (%p4750_p5), %s7561_s30, 4096, %s7559_s7, %s7567_s19, %s4685_s27, %s4685_s27, %s4686_s28  }
 0x443 PF: > { %p4435_p1 = scmp.ge.s32.totalorder %s4676_s18, 2  ;;  %s3993_s29 = sand.u32 1, %s4664_s15  }
 0x444   : > { %s3994_s5 = scalar_lea.sflag [#allocation3], %s3993_s29 }
 0x445   : > { %p4432_p2 = pnand %p4435_p1, %p4754_p6 }
 0x447   : > { %4659 = dma.done.wait (!%p4432_p2), %s3994_s5, 4096  }
 0x448   : > { %4661 = vsyncadd (!%p4432_p2), %s3994_s5, 4294963200  ;;  %p14_p3 = scmp.ge.s32.totalorder %s4737_s21, 4   ;;  %s7675_s15 = smov %s4668_s16 }
 0x449   : > { %s7676_s16 = smov %s4672_s17  ;;  %s7677_s17 = smov %s4748_s24 }
 0x44a   : > { %s7678_s18 = smov %s4737_s21  ;;  %16 = sbr.rel (!%p14_p3) target bundleno = 3 (0x3), region = 71 }
 0x451   :  { %3999 = vsyncpa [#allocation3], 1 }
 0x452   :  { %4001 = vsyncpa [#allocation3 + $0x1], 1 }

</bundles_post_ra>
